<compile_context>
chip_gen: v7x
topology: tpu7x:2x2x1
jax: 0.10.0
libtpu: 0.0.40
codegen_flags: <defaults>
</compile_context>

<pallas_src>
import jax
import jax.numpy as jnp
from jax.experimental import pallas as pl
from jax.experimental.pallas import tpu as pltpu

IN_DIM = 512
OUT_DIM = 10
LAYER_DIMS = [512, 1024, 256]


def _round_up(n, m):
    return ((n + m - 1) // m) * m


def _default_compute_dtype():
    """bf16 bias/ReLU on v6e/v7x (native bf16 VPU); f32 on v5e and older."""
    try:
        kind = jax.devices()[0].device_kind.lower()
    except Exception:
        return jnp.bfloat16
    for old in ("v2", "v3", "v4", "v5"):
        if old in kind:
            return jnp.float32
    return jnp.bfloat16


def _choose_tile(B, max_tile):
    """Pick (batch_tile, padded_batch).

    Goals (per perf review):
      * >= 4 grid steps when the batch allows it, so the two TensorCores of a
        v7x megacore each get >= 2 steps (sharding + pipelined DMA overlap).
      * tile >= 128 rows for MXU occupancy whenever the batch is that big.
      * cap batch-padding waste for large batches instead of padding to a
        full 512-row tile.
    """
    B8 = _round_up(max(B, 1), 8)
    if B8 <= 2 * max_tile:
        tile = min(B8, max(128, _round_up((B8 + 3) // 4, 8)))
        return tile, _round_up(B8, tile)
    for tile in (max_tile, max_tile // 2, 128):
        if _round_up(B8, tile) - B8 <= 96:
            return tile, _round_up(B8, tile)
    return 128, _round_up(B8, 128)


def _fused_mlp_kernel(x_ref, w0, b0, w1, b1, w2, b2, w3, b3, o_ref):
    """Fused 3x(Linear+ReLU) + output Linear.

    bf16 MXU operands, f32 accumulation (preferred_element_type); bias/ReLU in
    the bias dtype (bf16 on v6e/v7x, f32 on v5e); bf16 inter-layer storage.
    """
    h = x_ref[...]  # bf16 activations, fed straight to the first MXU pass

    def dense(h, w, b, relu):
        acc = jnp.dot(h, w[...], preferred_element_type=jnp.float32)
        y = acc.astype(b.dtype) + b[...]
        if relu:
            y = jnp.maximum(y, 0).astype(w.dtype)  # bf16 for the next matmul
        return y

    h = dense(h, w0, b0, True)
    h = dense(h, w1, b1, True)
    h = dense(h, w2, b2, True)
    out = dense(h, w3, b3, False)
    o_ref[...] = out.astype(o_ref.dtype)


def my_network_forward(x, params, *, max_batch_tile=512,
                       weights_dtype=jnp.bfloat16, compute_dtype=None):
    """params: list of (W, b) with W shaped (in, out), b shaped (1, out)."""
    if compute_dtype is None:
        compute_dtype = _default_compute_dtype()
    B, D = x.shape
    assert D == IN_DIM

    tile, B_pad = _choose_tile(B, max_batch_tile)

    # bf16 activations at the pallas_call boundary: halves the x-tile DMA.
    xq = x.astype(weights_dtype)
    if B_pad != B:
        xq = jnp.pad(xq, ((0, B_pad - B), (0, 0)))

    (w0, b0), (w1, b1), (w2, b2), (w3, b3) = params

    # Lane-dense output: pad final-layer N from 10 -> 128 (sliced back below).
    OUT_PAD = _round_up(OUT_DIM, 128)
    w3p = jnp.pad(w3, ((0, 0), (0, OUT_PAD - OUT_DIM)))
    b3p = jnp.pad(b3, ((0, 0), (0, OUT_PAD - OUT_DIM)))

    # bf16 weights (single MXU pass per matmul, half the resident bytes);
    # biases in the elementwise compute dtype.
    w0q, w1q, w2q, w3q = (w.astype(weights_dtype) for w in (w0, w1, w2, w3p))
    b0c, b1c, b2c, b3c = (b.astype(compute_dtype) for b in (b0, b1, b2, b3p))

    def full_spec(arr):
        return pl.BlockSpec(arr.shape, lambda i: (0, 0))

    grid = (B_pad // tile,)

    flops = 2 * B_pad * (IN_DIM * LAYER_DIMS[0]
                         + LAYER_DIMS[0] * LAYER_DIMS[1]
                         + LAYER_DIMS[1] * LAYER_DIMS[2]
                         + LAYER_DIMS[2] * OUT_PAD)
    bytes_accessed = int(
        xq.size * xq.dtype.itemsize
        + sum(int(a.size) * a.dtype.itemsize
              for a in (w0q, b0c, w1q, b1c, w2q, b2c, w3q, b3c))
        + B_pad * OUT_PAD * 2)  # bf16 output

    out = pl.pallas_call(
        _fused_mlp_kernel,
        out_shape=jax.ShapeDtypeStruct((B_pad, OUT_PAD), jnp.bfloat16),
        grid_spec=pltpu.PrefetchScalarGridSpec(
            num_scalar_prefetch=0,
            grid=grid,
            in_specs=[
                pl.BlockSpec((tile, IN_DIM), lambda i: (i, 0)),
                full_spec(w0q), full_spec(b0c),
                full_spec(w1q), full_spec(b1c),
                full_spec(w2q), full_spec(b2c),
                full_spec(w3q), full_spec(b3c),
            ],
            out_specs=pl.BlockSpec((tile, OUT_PAD), lambda i: (i, 0)),
        ),
        compiler_params=pltpu.CompilerParams(
            dimension_semantics=("parallel",),
            # Covers 512-row tiles with double-buffered x/out + resident
            # weights on every generation (v5e scoped default is only 16 MiB;
            # v7x physical VMEM is 64 MiB, so stay well below it).
            vmem_limit_bytes=32 * 1024 * 1024,
        ),
        cost_estimate=pl.CostEstimate(
            flops=flops, transcendentals=0, bytes_accessed=bytes_accessed),
    )(xq, w0q, b0c, w1q, b1c, w2q, b2c, w3q, b3c)

    return out[:B, :OUT_DIM].astype(jnp.float32)


def init_params(key):
    """Deterministic init mirroring nn.Linear shapes (stored as (in, out))."""
    dims = [IN_DIM] + LAYER_DIMS + [OUT_DIM]
    params = []
    for i in range(len(dims) - 1):
        d_in, d_out = dims[i], dims[i + 1]
        key, kw, kb = jax.random.split(key, 3)
        bound = 1.0 / jnp.sqrt(d_in)
        w = jax.random.uniform(kw, (d_in, d_out), jnp.float32, -bound, bound)
        b = jax.random.uniform(kb, (1, d_out), jnp.float32, -bound, bound)
        params.append((w, b))
    return params


def reference_forward_mirror(x, params, *, weights_dtype=jnp.bfloat16,
                             compute_dtype=None):
    """Pure-JAX mirror of the kernel math (bf16 MXU operands, f32 accumulation,
    compute-dtype bias/ReLU, bf16 output) — validates self-consistency."""
    if compute_dtype is None:
        compute_dtype = _default_compute_dtype()
    h = x.astype(weights_dtype)
    n = len(params)
    for i, (w, b) in enumerate(params):
        acc = jnp.dot(h, w.astype(weights_dtype),
                      preferred_element_type=jnp.float32)
        y = acc.astype(compute_dtype) + b.astype(compute_dtype)
        if i < n - 1:
            h = jnp.maximum(y, 0).astype(weights_dtype)
        else:
            return y.astype(jnp.bfloat16).astype(jnp.float32)


def reference_forward_f32(x, params):
    """True f32 math of the PyTorch module (fidelity check)."""
    h = x
    n = len(params)
    for i, (w, b) in enumerate(params):
        h = h @ w + b
        if i < n - 1:
            h = jnp.maximum(h, 0.0)
    return h


if __name__ == "__main__":
    key = jax.random.PRNGKey(0)
    key, kx1, kx2, kx3 = jax.random.split(key, 4)
    params = init_params(key)

    # B=512 -> tile=128, grid=(4,): >=2 steps per TensorCore on a v7x megacore
    # with DMA/compute overlap inside each core.
    x = jax.random.normal(kx1, (512, IN_DIM), jnp.float32)
    out = jax.block_until_ready(my_network_forward(x, params))
    assert out.shape == (512, OUT_DIM)
    mirror = reference_forward_mirror(x, params)
    assert jnp.allclose(out, mirror, atol=2e-2, rtol=2e-2), float(
        jnp.max(jnp.abs(out - mirror)))
    # Fidelity vs the true f32 nn.Linear math (bf16 quantization tolerance).
    ref32 = reference_forward_f32(x, params)
    assert jnp.allclose(out, ref32, atol=1e-1, rtol=1e-1), float(
        jnp.max(jnp.abs(out - ref32)))

    # Large batch: tile=512, grid=(4,) — exercises the max-tile path.
    x_big = jax.random.normal(kx2, (2048, IN_DIM), jnp.float32)
    out_big = jax.block_until_ready(my_network_forward(x_big, params))
    assert out_big.shape == (2048, OUT_DIM)
    assert jnp.allclose(out_big, reference_forward_mirror(x_big, params),
                        atol=2e-2, rtol=2e-2)

    # Small ragged batch: exercises tile-shrink + sublane padding + slice-back.
    x_small = jax.random.normal(kx3, (5, IN_DIM), jnp.float32)
    out_small = jax.block_until_ready(my_network_forward(x_small, params))
    assert out_small.shape == (5, OUT_DIM)
    assert jnp.allclose(out_small, reference_forward_mirror(x_small, params),
                        atol=2e-2, rtol=2e-2)

    print("KERNEL_OK")
</pallas_src>

<mosaic_0001>
module attributes {stable_mosaic.version = 11 : i64} {
  func.func @_fused_mlp_kernel(%arg0: i32, %arg1: memref<128x512xbf16, #tpu.memory_space<vmem>>, %arg2: memref<512x512xbf16, #tpu.memory_space<vmem>>, %arg3: memref<1x512xbf16, #tpu.memory_space<vmem>>, %arg4: memref<512x1024xbf16, #tpu.memory_space<vmem>>, %arg5: memref<1x1024xbf16, #tpu.memory_space<vmem>>, %arg6: memref<1024x256xbf16, #tpu.memory_space<vmem>>, %arg7: memref<1x256xbf16, #tpu.memory_space<vmem>>, %arg8: memref<256x128xbf16, #tpu.memory_space<vmem>>, %arg9: memref<1x128xbf16, #tpu.memory_space<vmem>>, %arg10: memref<128x128xbf16, #tpu.memory_space<vmem>>) attributes {dimension_semantics = [#tpu.dimension_semantics<parallel>], iteration_bounds = array<i64: 4>, scalar_prefetch = 0 : i64, scratch_operands = 0 : i64, tpu.core_type = #tpu.core_type<tc>, window_params = [{transform_indices = @transform_0, window_bounds = array<i64: 128, 512>}, {pipeline_mode = #tpu.pipeline_mode<synchronous>, transform_indices = @transform_1, window_bounds = array<i64: 512, 512>}, {pipeline_mode = #tpu.pipeline_mode<synchronous>, transform_indices = @transform_2, window_bounds = array<i64: 1, 512>}, {pipeline_mode = #tpu.pipeline_mode<synchronous>, transform_indices = @transform_3, window_bounds = array<i64: 512, 1024>}, {pipeline_mode = #tpu.pipeline_mode<synchronous>, transform_indices = @transform_4, window_bounds = array<i64: 1, 1024>}, {pipeline_mode = #tpu.pipeline_mode<synchronous>, transform_indices = @transform_5, window_bounds = array<i64: 1024, 256>}, {pipeline_mode = #tpu.pipeline_mode<synchronous>, transform_indices = @transform_6, window_bounds = array<i64: 1, 256>}, {pipeline_mode = #tpu.pipeline_mode<synchronous>, transform_indices = @transform_7, window_bounds = array<i64: 256, 128>}, {pipeline_mode = #tpu.pipeline_mode<synchronous>, transform_indices = @transform_8, window_bounds = array<i64: 1, 128>}, {transform_indices = @transform_9, window_bounds = array<i64: 128, 128>}]} {
    %c0 = arith.constant 0 : index
    %c0_0 = arith.constant 0 : index
    %0 = vector.load %arg1[%c0, %c0_0] : memref<128x512xbf16, #tpu.memory_space<vmem>>, vector<128x512xbf16>
    %c0_1 = arith.constant 0 : index
    %c0_2 = arith.constant 0 : index
    %1 = vector.load %arg2[%c0_1, %c0_2] : memref<512x512xbf16, #tpu.memory_space<vmem>>, vector<512x512xbf16>
    %cst = arith.constant dense<0.000000e+00> : vector<128x512xf32>
    %2 = tpu.matmul %0, %1, %cst {dimension_numbers = #tpu.dot_dimension_numbers<[1], [0], [0], [1], [0, 0, 1, 1], [], []>} : vector<128x512xbf16>, vector<512x512xbf16>, vector<128x512xf32> -> vector<128x512xf32>
    %3 = arith.truncf %2 : vector<128x512xf32> to vector<128x512xbf16>
    %c0_3 = arith.constant 0 : index
    %c0_4 = arith.constant 0 : index
    %4 = vector.load %arg3[%c0_3, %c0_4] : memref<1x512xbf16, #tpu.memory_space<vmem>>, vector<1x512xbf16>
    %5 = vector.broadcast %4 : vector<1x512xbf16> to vector<128x512xbf16>
    %6 = arith.addf %3, %5 : vector<128x512xbf16>
    %cst_5 = arith.constant 0.000000e+00 : bf16
    %7 = vector.broadcast %cst_5 : bf16 to vector<128x512xbf16>
    %8 = arith.maximumf %6, %7 : vector<128x512xbf16>
    %c0_6 = arith.constant 0 : index
    %c0_7 = arith.constant 0 : index
    %9 = vector.load %arg4[%c0_6, %c0_7] : memref<512x1024xbf16, #tpu.memory_space<vmem>>, vector<512x1024xbf16>
    %cst_8 = arith.constant dense<0.000000e+00> : vector<128x1024xf32>
    %10 = tpu.matmul %8, %9, %cst_8 {dimension_numbers = #tpu.dot_dimension_numbers<[1], [0], [0], [1], [0, 0, 1, 1], [], []>} : vector<128x512xbf16>, vector<512x1024xbf16>, vector<128x1024xf32> -> vector<128x1024xf32>
    %11 = arith.truncf %10 : vector<128x1024xf32> to vector<128x1024xbf16>
    %c0_9 = arith.constant 0 : index
    %c0_10 = arith.constant 0 : index
    %12 = vector.load %arg5[%c0_9, %c0_10] : memref<1x1024xbf16, #tpu.memory_space<vmem>>, vector<1x1024xbf16>
    %13 = vector.broadcast %12 : vector<1x1024xbf16> to vector<128x1024xbf16>
    %14 = arith.addf %11, %13 : vector<128x1024xbf16>
    %cst_11 = arith.constant 0.000000e+00 : bf16
    %15 = vector.broadcast %cst_11 : bf16 to vector<128x1024xbf16>
    %16 = arith.maximumf %14, %15 : vector<128x1024xbf16>
    %c0_12 = arith.constant 0 : index
    %c0_13 = arith.constant 0 : index
    %17 = vector.load %arg6[%c0_12, %c0_13] : memref<1024x256xbf16, #tpu.memory_space<vmem>>, vector<1024x256xbf16>
    %cst_14 = arith.constant dense<0.000000e+00> : vector<128x256xf32>
    %18 = tpu.matmul %16, %17, %cst_14 {dimension_numbers = #tpu.dot_dimension_numbers<[1], [0], [0], [1], [0, 0, 1, 1], [], []>} : vector<128x1024xbf16>, vector<1024x256xbf16>, vector<128x256xf32> -> vector<128x256xf32>
    %19 = arith.truncf %18 : vector<128x256xf32> to vector<128x256xbf16>
    %c0_15 = arith.constant 0 : index
    %c0_16 = arith.constant 0 : index
    %20 = vector.load %arg7[%c0_15, %c0_16] : memref<1x256xbf16, #tpu.memory_space<vmem>>, vector<1x256xbf16>
    %21 = vector.broadcast %20 : vector<1x256xbf16> to vector<128x256xbf16>
    %22 = arith.addf %19, %21 : vector<128x256xbf16>
    %cst_17 = arith.constant 0.000000e+00 : bf16
    %23 = vector.broadcast %cst_17 : bf16 to vector<128x256xbf16>
    %24 = arith.maximumf %22, %23 : vector<128x256xbf16>
    %c0_18 = arith.constant 0 : index
    %c0_19 = arith.constant 0 : index
    %25 = vector.load %arg8[%c0_18, %c0_19] : memref<256x128xbf16, #tpu.memory_space<vmem>>, vector<256x128xbf16>
    %cst_20 = arith.constant dense<0.000000e+00> : vector<128x128xf32>
    %26 = tpu.matmul %24, %25, %cst_20 {dimension_numbers = #tpu.dot_dimension_numbers<[1], [0], [0], [1], [0, 0, 1, 1], [], []>} : vector<128x256xbf16>, vector<256x128xbf16>, vector<128x128xf32> -> vector<128x128xf32>
    %27 = arith.truncf %26 : vector<128x128xf32> to vector<128x128xbf16>
    %c0_21 = arith.constant 0 : index
    %c0_22 = arith.constant 0 : index
    %28 = vector.load %arg9[%c0_21, %c0_22] : memref<1x128xbf16, #tpu.memory_space<vmem>>, vector<1x128xbf16>
    %29 = vector.broadcast %28 : vector<1x128xbf16> to vector<128x128xbf16>
    %30 = arith.addf %27, %29 : vector<128x128xbf16>
    %c0_23 = arith.constant 0 : index
    %c0_24 = arith.constant 0 : index
    %31 = vector.load %arg10[%c0_23, %c0_24] : memref<128x128xbf16, #tpu.memory_space<vmem>>, vector<128x128xbf16>
    tpu.vector_store %arg10[%c0_23, %c0_24], %30 {strides = array<i32>} : memref<128x128xbf16, #tpu.memory_space<vmem>>, vector<128x128xbf16>,
    return
  }
  func.func @transform_0(%arg0: i32) -> (i32, i32) {
    %c0_i32 = arith.constant 0 : i32
    %c0_i32_0 = arith.constant 0 : i32
    return %arg0, %c0_i32 : i32, i32
  }
  func.func @transform_1(%arg0: i32) -> (i32, i32) {
    %c0_i32 = arith.constant 0 : i32
    %c0_i32_0 = arith.constant 0 : i32
    %c0_i32_1 = arith.constant 0 : i32
    return %c0_i32, %c0_i32_0 : i32, i32
  }
  func.func @transform_2(%arg0: i32) -> (i32, i32) {
    %c0_i32 = arith.constant 0 : i32
    %c0_i32_0 = arith.constant 0 : i32
    %c0_i32_1 = arith.constant 0 : i32
    return %c0_i32, %c0_i32_0 : i32, i32
  }
  func.func @transform_3(%arg0: i32) -> (i32, i32) {
    %c0_i32 = arith.constant 0 : i32
    %c0_i32_0 = arith.constant 0 : i32
    %c0_i32_1 = arith.constant 0 : i32
    return %c0_i32, %c0_i32_0 : i32, i32
  }
  func.func @transform_4(%arg0: i32) -> (i32, i32) {
    %c0_i32 = arith.constant 0 : i32
    %c0_i32_0 = arith.constant 0 : i32
    %c0_i32_1 = arith.constant 0 : i32
    return %c0_i32, %c0_i32_0 : i32, i32
  }
  func.func @transform_5(%arg0: i32) -> (i32, i32) {
    %c0_i32 = arith.constant 0 : i32
    %c0_i32_0 = arith.constant 0 : i32
    %c0_i32_1 = arith.constant 0 : i32
    return %c0_i32, %c0_i32_0 : i32, i32
  }
  func.func @transform_6(%arg0: i32) -> (i32, i32) {
    %c0_i32 = arith.constant 0 : i32
    %c0_i32_0 = arith.constant 0 : i32
    %c0_i32_1 = arith.constant 0 : i32
    return %c0_i32, %c0_i32_0 : i32, i32
  }
  func.func @transform_7(%arg0: i32) -> (i32, i32) {
    %c0_i32 = arith.constant 0 : i32
    %c0_i32_0 = arith.constant 0 : i32
    %c0_i32_1 = arith.constant 0 : i32
    return %c0_i32, %c0_i32_0 : i32, i32
  }
  func.func @transform_8(%arg0: i32) -> (i32, i32) {
    %c0_i32 = arith.constant 0 : i32
    %c0_i32_0 = arith.constant 0 : i32
    %c0_i32_1 = arith.constant 0 : i32
    return %c0_i32, %c0_i32_0 : i32, i32
  }
  func.func @transform_9(%arg0: i32) -> (i32, i32) {
    %c0_i32 = arith.constant 0 : i32
    %c0_i32_0 = arith.constant 0 : i32
    return %arg0, %c0_i32 : i32, i32
  }
}

</mosaic_0001>

<bundles_post_ra>
// kernel: tpu_custom_call.1
= control target key start
LH: loop header
LB: loop body
LE: loop exit
PB: predicated region body
PF: predicated region fallthrough
CT: control target
= control target key end

     0   :  { %s9726_s0 = inlined_call_operand.hbm [shape: bf16[512,512], index: 0, kind: input, shape index: {}]   ;;  %s9727_s1 = inlined_call_operand.hbm [shape: bf16[512,512], index: 1, kind: input, shape index: {}]   ;;  %s9728_s2 = inlined_call_operand.vmem [shape: bf16[1,512], index: 2, kind: input, shape index: {}]   ;;  %s9729_s3 = inlined_call_operand.hbm [shape: bf16[512,1024], index: 3, kind: input, shape index: {}]   ;;  %s9730_s4 = inlined_call_operand.vmem [shape: bf16[1,1024], index: 4, kind: input, shape index: {}]   ;;  %s9731_s5 = inlined_call_operand.hbm [shape: bf16[1024,256], index: 5, kind: input, shape index: {}]   ;;  %s9732_s6 = inlined_call_operand.vmem [shape: bf16[1,256], index: 6, kind: input, shape index: {}]   ;;  %s9733_s7 = inlined_call_operand.hbm [shape: bf16[256,128], index: 7, kind: input, shape index: {}]   ;;  %s9734_s8 = inlined_call_operand.vmem [shape: bf16[1,128], index: 8, kind: input, shape index: {}]   ;;  %s9735_s9 = inlined_call_operand.hbm [shape: bf16[512,128], index: 9, kind: output, shape index: {}]  }
   0x1   :  { %9769 = sst [smem:[#allocation42_spill]] %s9727_s1 }
   0x2   :  { %14 = vsyncpa [#allocation3], 0 }
   0x3   :  { %16 = vsyncpa [#allocation3 + $0x1], 0 }
   0x4   :  { %17 = vsyncpa [#allocation6], 0 }
   0x5   :  { %18 = vsyncpa [#allocation9], 0 }
   0x6   :  { %19 = vsyncpa [#allocation4], 0 }
   0x7   :  { %21 = vsyncpa [#allocation4 + $0x1], 0  ;;  %s8293_s30 = smov 0   ;;  %s8295_s10 = smov 0  }
   0x8   :  { %s8297_s11 = smov 0   ;;  %s8299_s12 = smov 0  }
   0x9 LB: > { %9770 = sst [smem:[#allocation16_spill]] %s8211_s30  ;;  %s8314_s13 = sadd.s32 4294967295, %s8223_s12   ;;  %s8223_s12 = sphi %s8299_s12, %s9858_s12   ;;  %s8219_s11 = sphi %s8297_s11, %s9857_s11   ;;  %s8215_s10 = sphi %s8295_s10, %s9856_s10   ;;  %s8211_s30 = sphi %s8293_s30, %s9855_s30  }
   0xa   : > { %s6466_s14 = sadd.s32 4294967294, %s8223_s12   ;;  %p47_p0 = scmp.ne.s32.totalorder %s8215_s10, %s8211_s30 }
   0xb   : > { %p9736_p1 = scmp.eq.s32.totalorder %s8314_s13, 0  ;;  %p245_p3 = scmp.eq.s32.totalorder %s6466_s14, 3 }
   0xc   : > { %p6467_p5 = scmp.ge.s32.totalorder %s8223_s12, 1  ;;  %p252_p7 = scmp.lt.s32.totalorder %s8223_s12, 5 }
   0xd   : > { %p8323_p4 = por %p9736_p1, %p47_p0  ;;  %p8328_p6 = por %p245_p3, %p47_p0 }
   0xe   : > { %p8333_p8 = pnand %p6467_p5, %p252_p7  ;;  %s8225_s18 = smov [#allocation5]  }
   0xf   : > { %s9771_s15 = scalar_select %p8323_p4, 1, 0 }
  0x10   : > { %s9772_s16 = scalar_select %p8328_p6, 1, 0 }
  0x11   : > { %s9774_s17 = scalar_select %p8333_p8, 1, 0 }
  0x12   : > { %9773 = sst [smem:[#allocation17_spill]] %s9772_s16  ;;  %s264_s19 = sshll.u32 %s8225_s18, 4  ;;  %s265_s19 = int_to_ptr.vmem [resolvable:$true] %s264_s19 }
  0x13   : > { %p7474_p9 = pneg %p8333_p8  ;;  %s8226_s21 = smov [#allocation8]  }
  0x14   : > { %s296_s22 = sshll.u32 %s8226_s21, 4  ;;  %s9776_s1 = sld [smem:[#allocation42_spill]]  ;;  %s8345_s22 = int_to_ptr.vmem [resolvable:$true] %s296_s22 }
  0x15   : > { %p8341_p10 = pnand %p7474_p9, %p9736_p1 }
  0x17   : > { %p8355_p12 = pneg %p8341_p10 }
  0x1a   : > { %s8007_s25 = scalar_lea.hbm %s9776_s1, 16384 }
  0x1b   : > { %p8008_p11 = scmp.ne.s32.totalorder %s9776_s1, %s8007_s25  ;;  %p8014_p3 = scmp.lt.u32.totalorder %s8007_s25, %s9776_s1 }
  0x1d   : > { %p8010_p13 = pnand %p8355_p12, %p8008_p11 }
  0x1f   : > { %p8011_p0 = pneg %p8010_p13 }
  0x21   : > { %p8016_p5 = pnand %p8014_p3, %p8011_p0 }
  0x23   : > { %8019 = shalt.err (!%p8016_p5)
}
  0x24   : > { %s8020_s18 = scalar_lea.vmem %s265_s19, 16384  ;;  %p8028_p2 = scmp.lt.s32.totalorder %s265_s19, %s265_s19 }
  0x25   : > { %p8021_p7 = scmp.ne.s32.totalorder %s265_s19, %s8020_s18  ;;  %p8029_p6 = scmp.lt.s32.totalorder %s8020_s18, %s8020_s18 }
  0x27   : > { %p8023_p9 = pnand %p8021_p7, %p8355_p12  ;;  %p8030_p4 = por %p8029_p6, %p8028_p2 }
  0x29   : > { %p8024_p1 = pneg %p8023_p9 }
  0x2b   : > { %p8031_p8 = pnand %p8030_p4, %p8024_p1 }
  0x2d   : > { %8034 = shalt.err (!%p8031_p8)
}
  0x2e   : > { %s9741_s21 = smov 256   ;;  %s9742_s23 = smov 16  }
  0x2f   : > { %7477 = dma.hbm_to_vmem [thread:$0]  (!%p8341_p10), %s9776_s1, 16384, %s265_s19, [#allocation6], %s9741_s21, %s9741_s21, %s9742_s23  }
  0x30   : > { %s8035_s29 = scalar_lea.hbm %s9731_s5, 16384 }
  0x31   : > { %p8036_p1 = scmp.ne.s32.totalorder %s9731_s5, %s8035_s29  ;;  %p8042_p6 = scmp.lt.u32.totalorder %s8035_s29, %s9731_s5 }
  0x33   : > { %p8038_p2 = pnand %p8036_p1, %p8355_p12 }
  0x35   : > { %p8039_p4 = pneg %p8038_p2 }
  0x37   : > { %p8044_p8 = pnand %p8042_p6, %p8039_p4 }
  0x39   : > { %8047 = shalt.err (!%p8044_p8)
}
  0x3a   : > { %s8048_s19 = scalar_lea.vmem %s8345_s22, 16384  ;;  %p8056_p3 = scmp.lt.s32.totalorder %s8345_s22, %s8345_s22 }
  0x3b   : > { %p8049_p11 = scmp.ne.s32.totalorder %s8345_s22, %s8048_s19  ;;  %p8057_p5 = scmp.lt.s32.totalorder %s8048_s19, %s8048_s19 }
  0x3d   : > { %p8051_p13 = pnand %p8049_p11, %p8355_p12  ;;  %p8058_p7 = por %p8057_p5, %p8056_p3 }
  0x3f   : > { %p8052_p0 = pneg %p8051_p13 }
  0x41   : > { %p8059_p9 = pnand %p8058_p7, %p8052_p0 }
  0x43   : > { %8062 = shalt.err (!%p8059_p9)
}
  0x44   : > { %s8229_s24 = smov 128   ;;  %s8230_s30 = smov 8  }
  0x45   : > { %7483 = dma.hbm_to_vmem [thread:$0]  (!%p8341_p10), %s9731_s5, 16384, %s8345_s22, [#allocation9], %s8229_s24, %s8229_s24, %s8230_s30  }
  0x46   : > { %s8231_s26 = smov [#allocation7]   ;;  %s8063_s18 = scalar_lea.hbm %s9729_s3, 32768 }
  0x47   : > { %s280_s27 = sshll.u32 %s8231_s26, 4  ;;  %p8064_p1 = scmp.ne.s32.totalorder %s9729_s3, %s8063_s18  ;;  %s281_s27 = int_to_ptr.vmem [resolvable:$true] %s280_s27 }
  0x48   : > { %p8070_p6 = scmp.lt.u32.totalorder %s8063_s18, %s9729_s3 }
  0x49   : > { %p8066_p2 = pnand %p8064_p1, %p8355_p12 }
  0x4b   : > { %p8067_p4 = pneg %p8066_p2 }
  0x4d   : > { %p8072_p8 = pnand %p8070_p6, %p8067_p4 }
  0x4f   : > { %8075 = shalt.err (!%p8072_p8)
}
  0x50   : > { %s8076_s22 = scalar_lea.vmem %s281_s27, 32768  ;;  %p8084_p3 = scmp.lt.s32.totalorder %s281_s27, %s281_s27 }
  0x51   : > { %p8077_p11 = scmp.ne.s32.totalorder %s281_s27, %s8076_s22  ;;  %p8085_p5 = scmp.lt.s32.totalorder %s8076_s22, %s8076_s22 }
  0x53   : > { %p8079_p13 = pnand %p8077_p11, %p8355_p12  ;;  %p8086_p7 = por %p8085_p5, %p8084_p3 }
  0x55   : > { %p8080_p0 = pneg %p8079_p13 }
  0x57   : > { %p8087_p9 = pnand %p8086_p7, %p8080_p0 }
  0x59   : > { %8090 = shalt.err (!%p8087_p9)
}
  0x5a   : > { %s8232_s21 = smov 512   ;;  %s8233_s24 = smov 32  }
  0x5b   : > { %7480 = dma.hbm_to_vmem [thread:$0]  (!%p8341_p10), %s9729_s3, 32768, %s281_s27, [#allocation6], %s8232_s21, %s8232_s21, %s8233_s24  }
  0x5c   : > { %s8234_s30 = smov [#allocation10]   ;;  %s8091_s29 = scalar_lea.hbm %s9733_s7, 2048 }
  0x5d   : > { %s312_s16 = sshll.u32 %s8234_s30, 4  ;;  %p8092_p1 = scmp.ne.s32.totalorder %s9733_s7, %s8091_s29  ;;  %s313_s16 = int_to_ptr.vmem [resolvable:$true] %s312_s16 }
  0x5e   : > { %p8098_p6 = scmp.lt.u32.totalorder %s8091_s29, %s9733_s7 }
  0x5f   : > { %p8094_p2 = pnand %p8092_p1, %p8355_p12 }
  0x61   : > { %p8095_p4 = pneg %p8094_p2 }
  0x63   : > { %p8100_p8 = pnand %p8098_p6, %p8095_p4 }
  0x65   : > { %8103 = shalt.err (!%p8100_p8)
}
  0x66   : > { %s8104_s27 = scalar_lea.vmem %s313_s16, 2048  ;;  %p8112_p3 = scmp.lt.s32.totalorder %s313_s16, %s313_s16 }
  0x67   : > { %p8105_p11 = scmp.ne.s32.totalorder %s313_s16, %s8104_s27  ;;  %p8113_p5 = scmp.lt.s32.totalorder %s8104_s27, %s8104_s27 }
  0x69   : > { %p8107_p13 = pnand %p8105_p11, %p8355_p12  ;;  %p8114_p7 = por %p8113_p5, %p8112_p3 }
  0x6b   : > { %p8108_p0 = pneg %p8107_p13 }
  0x6d   : > { %p8115_p9 = pnand %p8114_p7, %p8108_p0 }
  0x6f   : > { %8118 = shalt.err (!%p8115_p9)
}
  0x70   : > { %s8235_s21 = smov 64   ;;  %s8236_s28 = smov 4  }
  0x71   : > { %7486 = dma.hbm_to_vmem [thread:$0]  (!%p8341_p10), %s9733_s7, 2048, %s313_s16, [#allocation9], %s8235_s21, %s8235_s21, %s8236_s28  }
  0x72   : > { %s8434_s23 = sadd.s32 1, %s8223_s12   ;;  %s34_s25 = sadd.s32 1, %s8219_s11 }
  0x73   : > { %s31_s30 = ssub.s32 %s8223_s12, %s8434_s23  ;;  %p41_p1 = scmp.ne.s32.totalorder %s8219_s11, %s8215_s10 }
  0x74   : > { %p32_p12 = scmp.eq.s32.totalorder %s31_s30, 0  ;;  %p42_p2 = scmp.eq.s32.totalorder %s8223_s12, 0 }
  0x75   : > { %p9778_p6 = scmp.eq.s32.totalorder %s8314_s13, 3  ;;  %p7499_p11 = scmp.lt.s32.totalorder %s8223_s12, 4 }
  0x76   : > { %s8443_s26 = scalar_select %p32_p12, %s8219_s11, %s34_s25  }
  0x77   : > { %p43_p4 = por %p42_p2, %p41_p1  ;;  %p8447_p8 = por %p9778_p6, %p41_p1 }
  0x78   : > { %s329_s20 = sand.u32 1, %s8219_s11   ;;  %s7068_s16 = sshll.u32 %s8223_s12, 12 }
  0x79   : > { %s6473_s14 = sshll.u32 %s329_s20, 8  ;;  %s8457_s22 = scalar_lea.hbm %s9726_s0, %s7068_s16 }
  0x7a   : > { %s333_s27 = scalar_lea.vmem [#allocation2], %s6473_s14  ;;  %p8461_p10 = pnand %p7499_p11, %p43_p4 }
  0x7b   : > { %s341_s21 = sshll.u32 %s333_s27, 4  ;;  %s8465_s24 = scalar_lea.sflag [#allocation3], %s329_s20  ;;  %s8459_s21 = int_to_ptr.vmem [resolvable:$true] %s341_s21 }
  0x7c   : > { %s8119_s1 = scalar_lea.hbm %s8457_s22, 4096  ;;  %p8121_p0 = pneg %p8461_p10 }
  0x7d   : > { %p8120_p13 = scmp.ne.s32.totalorder %s8457_s22, %s8119_s1  ;;  %s8124_s14 = scalar_lea.hbm %s9726_s0, 16384 }
  0x7e   : > { %p8125_p7 = scmp.lt.u32.totalorder %s8457_s22, %s9726_s0  ;;  %p8126_p9 = scmp.lt.u32.totalorder %s8124_s14, %s8119_s1 }
  0x7f   : > { %p8122_p3 = pnand %p8121_p0, %p8120_p13  ;;  %p8128_p1 = scmp.lt.u32.totalorder %s8119_s1, %s8457_s22 }
  0x80   : > { %p8127_p12 = por %p8126_p9, %p8125_p7 }
  0x81   : > { %p8123_p5 = pneg %p8122_p3 }
  0x82   : > { %p8129_p2 = por %p8128_p1, %p8127_p12 }
  0x84   : > { %p8130_p4 = pnand %p8129_p2, %p8123_p5 }
  0x86   : > { %8133 = shalt.err (!%p8130_p4)
}
  0x87   : > { %s8134_s20 = scalar_lea.vmem %s8459_s21, 4096  ;;  %s8237_s19 = smov [#allocation2]  }
  0x88   : > { %p8135_p6 = scmp.ne.s32.totalorder %s8459_s21, %s8134_s20  ;;  %s8139_s27 = sshll.u32 %s8237_s19, 4  ;;  %s8140_s27 = int_to_ptr.vmem [resolvable:$false] %s8139_s27 }
  0x89   : > { %s8141_s30 = scalar_lea.vmem %s8140_s27, 8192  ;;  %p8142_p3 = scmp.lt.s32.totalorder %s8459_s21, %s8140_s27 }
  0x8a   : > { %p8137_p11 = pnand %p8135_p6, %p8121_p0  ;;  %p8143_p7 = scmp.lt.s32.totalorder %s8141_s30, %s8134_s20 }
  0x8c   : > { %p8138_p13 = pneg %p8137_p11  ;;  %p8144_p9 = por %p8143_p7, %p8142_p3 }
  0x8e   : > { %p8145_p12 = pnand %p8144_p9, %p8138_p13 }
  0x90   : > { %8148 = shalt.err (!%p8145_p12)
}
  0x91   : > { %s9781_s1 = smov 16   ;;  %s9782_s25 = smov 256  }
  0x92   : > { %7490 = dma.hbm_to_vmem [thread:$0]  (!%p8461_p10), %s8457_s22, 4096, %s8459_s21, %s8465_s24, %s9782_s25, %s9782_s25, %s9781_s1  }
  0x93   : > { %p9783_p0 = scmp.ne.s32.totalorder %s9774_s17, 0 }
  0x95   : > { %353 = sbr.rel (%p9783_p0) target bundleno = 1513 (0x5e9), region = 56 }
  0x9c   : > { %s8499_s14 = sand.u32 1, %s8215_s10   ;;  %p9784_p5 = scmp.ne.s32.totalorder %s9771_s15, 0 }
  0x9d   : > { %s6478_s16 = sshll.u32 %s8499_s14, 8  ;;  %s356_s18 = scalar_lea.sflag [#allocation3], %s8499_s14 }
  0x9e   : > { %s8503_s20 = scalar_lea.vmem [#allocation2], %s6478_s16 }
  0x9f   : > { %8194 = dma.done.wait (%p9784_p5), %s356_s18, 4096  }
  0xa0   : > { %8196 = vsyncadd (%p9784_p5), %s356_s18, 4294963200  ;;  %p9785_p10 = scmp.eq.s32.totalorder %s8314_s13, 0 }
  0xa2   : > { %8198 = dma.done.wait (%p9785_p10), [#allocation6], 49152   ;;  %p9786_p1 = pmov %p9785_p10 }
  0xa4   : > { %8200 = vsyncadd (%p9786_p1), [#allocation6], 4294918144  ;;  %p9787_p2 = pmov %p9786_p1 }
  0xa5   : > { %p9788_p4 = pmov %p9786_p1 }
  0xa6   : > { %8202 = dma.done.wait (%p9787_p2), [#allocation9], 18432  }
  0xa7   : > { %8204 = vsyncadd (%p9788_p4), [#allocation9], 4294948864  ;;  %v7553_v0 = vld [vmem:[#allocation5 + $0x4] ss:$16 sps:$4 sm:$0xff]   ;;  %v7557_v2 = vld [vmem:[#allocation5] ss:$16 sps:$4 sm:$0xff]  }
  0xa8   : > { %v7555_v1 = vld [vmem:[#allocation5 + $0x204] ss:$16 sps:$4 sm:$0xff]   ;;  %1373 = vmatprep.subr.bf16.mxu1 %v7553_v0  ;;  %v7558_v3 = vld [vmem:[#allocation5 + $0x200] ss:$16 sps:$4 sm:$0xff]   ;;  %v7654_v51 = vld [vmem:[%s8503_s20 + $0xc] ss:$16 sps:$4 sm:$0xff]  }
  0xa9   : > { %1486 = vmatprep.subr.bf16.mxu0 %v7555_v1  ;;  %v7559_v4 = vld [vmem:[#allocation5 + $0x24] ss:$16 sps:$4 sm:$0xff]   ;;  %1374 = vmatpush1.bf16.msra.mxu1 %v7557_v2  ;;  %v7563_v6 = vld [vmem:[#allocation5 + $0x20] ss:$16 sps:$4 sm:$0xff]   ;;  %v7657_v2 = vld [vmem:[#allocation5 + $0xc] ss:$16 sps:$4 sm:$0xff]  }
  0xaa   : > { %1487 = vmatpush1.bf16.msra.mxu0 %v7558_v3  ;;  %v7561_v5 = vld [vmem:[#allocation5 + $0x224] ss:$16 sps:$4 sm:$0xff]   ;;  %1375 = vmatprep.subr.bf16.mxu1 %v7559_v4  ;;  %v7564_v7 = vld [vmem:[#allocation5 + $0x220] ss:$16 sps:$4 sm:$0xff]   ;;  %v7652_v4 = vld [vmem:[%s8503_s20 + $0x8] ss:$16 sps:$4 sm:$0xff]  }
  0xab   : > { %1488 = vmatprep.subr.bf16.mxu0 %v7561_v5  ;;  %v7565_v8 = vld [vmem:[#allocation5 + $0x44] ss:$16 sps:$4 sm:$0xff]   ;;  %v7569_v10 = vld [vmem:[#allocation5 + $0x40] ss:$16 sps:$4 sm:$0xff]   ;;  %1518 = vmatprep.mubr.bf16.mxu0 %v7654_v51  ;;  %v7655_v5 = vld [vmem:[#allocation5 + $0x8] ss:$16 sps:$4 sm:$0xff]  }
  0xac   : > { %v7567_v9 = vld [vmem:[#allocation5 + $0x244] ss:$16 sps:$4 sm:$0xff]   ;;  %v7570_v11 = vld [vmem:[#allocation5 + $0x240] ss:$16 sps:$4 sm:$0xff]   ;;  %s6483_s30 = sshll.u32 %s8499_s14, 6  ;;  %s7069_s25 = sshll.u32 %s8314_s13, 10 }
  0xad   : > { %1376 = vmatpush1.bf16.msra.mxu1 %v7563_v6  ;;  %v7571_v12 = vld [vmem:[#allocation5 + $0x64] ss:$16 sps:$4 sm:$0xff]   ;;  %v7575_v14 = vld [vmem:[#allocation5 + $0x60] ss:$16 sps:$4 sm:$0xff]   ;;  %v7660_v6 = vld [vmem:[#allocation5 + $0x2c] ss:$16 sps:$4 sm:$0xff]   ;;  %s9679_s15 = scalar_lea.hbm %s9735_s9, %s7069_s25 }
  0xae   : > { %1489 = vmatpush1.bf16.msra.mxu0 %v7564_v7  ;;  %1377 = vmatprep.subr.bf16.mxu1 %v7565_v8  ;;  %v7573_v13 = vld [vmem:[#allocation5 + $0x264] ss:$16 sps:$4 sm:$0xff]   ;;  %v7576_v15 = vld [vmem:[#allocation5 + $0x260] ss:$16 sps:$4 sm:$0xff]   ;;  %v7663_v8 = vld [vmem:[%s8503_s20 + $0x2c] ss:$16 sps:$4 sm:$0xff]  }
  0xaf   : > { %1490 = vmatprep.subr.bf16.mxu0 %v7567_v9  ;;  %v7577_v16 = vld [vmem:[#allocation5 + $0x84] ss:$16 sps:$4 sm:$0xff]   ;;  %v7581_v18 = vld [vmem:[#allocation5 + $0x80] ss:$16 sps:$4 sm:$0xff]   ;;  %v7658_v9 = vld [vmem:[#allocation5 + $0x28] ss:$16 sps:$4 sm:$0xff]  }
  0xb0   : > { %v7579_v17 = vld [vmem:[#allocation5 + $0x284] ss:$16 sps:$4 sm:$0xff]   ;;  %v7582_v19 = vld [vmem:[#allocation5 + $0x280] ss:$16 sps:$4 sm:$0xff]   ;;  %s9651_s1 = scalar_lea.vmem [#allocation11], %s6483_s30  ;;  %s6342_s17 = scalar_lea.sflag [#allocation4], %s8499_s14 }
  0xb1   : > { %1378 = vmatpush1.bf16.msra.mxu1 %v7569_v10  ;;  %v7583_v20 = vld [vmem:[#allocation5 + $0xa4] ss:$16 sps:$4 sm:$0xff]   ;;  %v7587_v22 = vld [vmem:[#allocation5 + $0xa0] ss:$16 sps:$4 sm:$0xff]   ;;  %v7669_v10 = vld [vmem:[#allocation5 + $0x4c] ss:$16 sps:$4 sm:$0xff]  }
  0xb2   : > { %1491 = vmatpush1.bf16.msra.mxu0 %v7570_v11  ;;  %1379 = vmatprep.subr.bf16.mxu1 %v7571_v12  ;;  %v7585_v21 = vld [vmem:[#allocation5 + $0x2a4] ss:$16 sps:$4 sm:$0xff]   ;;  %v7588_v23 = vld [vmem:[#allocation5 + $0x2a0] ss:$16 sps:$4 sm:$0xff]   ;;  %v7666_v12 = vld [vmem:[%s8503_s20 + $0x28] ss:$16 sps:$4 sm:$0xff]  }
  0xb3   : > { %1492 = vmatprep.subr.bf16.mxu0 %v7573_v13  ;;  %v7589_v24 = vld [vmem:[#allocation5 + $0xc4] ss:$16 sps:$4 sm:$0xff]   ;;  %v7593_v26 = vld [vmem:[#allocation5 + $0xc0] ss:$16 sps:$4 sm:$0xff]   ;;  %v7667_v13 = vld [vmem:[#allocation5 + $0x48] ss:$16 sps:$4 sm:$0xff]  }
  0xb4   : > { %v7591_v25 = vld [vmem:[#allocation5 + $0x2c4] ss:$16 sps:$4 sm:$0xff]   ;;  %v7594_v27 = vld [vmem:[#allocation5 + $0x2c0] ss:$16 sps:$4 sm:$0xff]   ;;  %s6355_s16 = sshll.u32 %s9651_s1, 4  ;;  %s8240_s13 = smov [#allocation11]   ;;  %s9681_s16 = int_to_ptr.vmem [resolvable:$true] %s6355_s16 }
  0xb5   : > { %1380 = vmatpush1.bf16.msra.mxu1 %v7575_v14  ;;  %v7595_v28 = vld [vmem:[#allocation5 + $0xe4] ss:$16 sps:$4 sm:$0xff]   ;;  %v7599_v30 = vld [vmem:[#allocation5 + $0xe0] ss:$16 sps:$4 sm:$0xff]   ;;  %v7672_v14 = vld [vmem:[#allocation5 + $0x6c] ss:$16 sps:$4 sm:$0xff]  }
  0xb6   : > { %1493 = vmatpush1.bf16.msra.mxu0 %v7576_v15  ;;  %1381 = vmatprep.subr.bf16.mxu1 %v7577_v16  ;;  %v7597_v29 = vld [vmem:[#allocation5 + $0x2e4] ss:$16 sps:$4 sm:$0xff]   ;;  %v7600_v31 = vld [vmem:[#allocation5 + $0x2e0] ss:$16 sps:$4 sm:$0xff]   ;;  %v7675_v16 = vld [vmem:[%s8503_s20 + $0x4c] ss:$16 sps:$4 sm:$0xff]  }
  0xb7   : > { %1494 = vmatprep.subr.bf16.mxu0 %v7579_v17  ;;  %v7601_v32 = vld [vmem:[#allocation5 + $0x104] ss:$16 sps:$4 sm:$0xff]   ;;  %v7605_v34 = vld [vmem:[#allocation5 + $0x100] ss:$16 sps:$4 sm:$0xff]   ;;  %v7670_v17 = vld [vmem:[#allocation5 + $0x68] ss:$16 sps:$4 sm:$0xff]  }
  0xb8   : > { %v7603_v33 = vld [vmem:[#allocation5 + $0x304] ss:$16 sps:$4 sm:$0xff]   ;;  %v7606_v35 = vld [vmem:[#allocation5 + $0x300] ss:$16 sps:$4 sm:$0xff]   ;;  %s8149_s22 = scalar_lea.vmem %s9681_s16, 1024  ;;  %s8153_s21 = sshll.u32 %s8240_s13, 4  ;;  %s8154_s21 = int_to_ptr.vmem [resolvable:$false] %s8153_s21 }
  0xb9   : > { %1382 = vmatpush1.bf16.msra.mxu1 %v7581_v18  ;;  %v7607_v36 = vld [vmem:[#allocation5 + $0x124] ss:$16 sps:$4 sm:$0xff]   ;;  %v7611_v38 = vld [vmem:[#allocation5 + $0x120] ss:$16 sps:$4 sm:$0xff]   ;;  %v7681_v18 = vld [vmem:[#allocation5 + $0x8c] ss:$16 sps:$4 sm:$0xff]   ;;  %p8150_p6 = scmp.ne.s32.totalorder %s9681_s16, %s8149_s22  ;;  %p8156_p3 = scmp.lt.s32.totalorder %s9681_s16, %s8154_s21 }
  0xba   : > { %1495 = vmatpush1.bf16.msra.mxu0 %v7582_v19  ;;  %1383 = vmatprep.subr.bf16.mxu1 %v7583_v20  ;;  %v7609_v37 = vld [vmem:[#allocation5 + $0x324] ss:$16 sps:$4 sm:$0xff]   ;;  %v7612_v39 = vld [vmem:[#allocation5 + $0x320] ss:$16 sps:$4 sm:$0xff]   ;;  %v8546_v20 = vld [vmem:[%s8503_s20 + $0x48] ss:$16 sps:$4 sm:$0xff]  }
  0xbb   : > { %1496 = vmatprep.subr.bf16.mxu0 %v7585_v21  ;;  %v7613_v40 = vld [vmem:[#allocation5 + $0x144] ss:$16 sps:$4 sm:$0xff]   ;;  %v7617_v42 = vld [vmem:[#allocation5 + $0x140] ss:$16 sps:$4 sm:$0xff]   ;;  %v7679_v21 = vld [vmem:[#allocation5 + $0x88] ss:$16 sps:$4 sm:$0xff]   ;;  %p8151_p11 = pnand %p8150_p6, %p8447_p8 }
  0xbc   : > { %v7615_v41 = vld [vmem:[#allocation5 + $0x344] ss:$16 sps:$4 sm:$0xff]   ;;  %v7618_v43 = vld [vmem:[#allocation5 + $0x340] ss:$16 sps:$4 sm:$0xff]   ;;  %s8155_s28 = scalar_lea.vmem %s8154_s21, 2048 }
  0xbd   : > { %1384 = vmatpush1.bf16.msra.mxu1 %v7587_v22  ;;  %v7619_v44 = vld [vmem:[#allocation5 + $0x164] ss:$16 sps:$4 sm:$0xff]   ;;  %v7623_v46 = vld [vmem:[#allocation5 + $0x160] ss:$16 sps:$4 sm:$0xff]   ;;  %v7684_v22 = vld [vmem:[#allocation5 + $0xac] ss:$16 sps:$4 sm:$0xff]   ;;  %p8152_p13 = pneg %p8151_p11  ;;  %p8157_p7 = scmp.lt.s32.totalorder %s8155_s28, %s8149_s22 }
  0xbe   : > { %1497 = vmatpush1.bf16.msra.mxu0 %v7588_v23  ;;  %1385 = vmatprep.subr.bf16.mxu1 %v7589_v24  ;;  %v7621_v45 = vld [vmem:[#allocation5 + $0x364] ss:$16 sps:$4 sm:$0xff]   ;;  %v7624_v47 = vld [vmem:[#allocation5 + $0x360] ss:$16 sps:$4 sm:$0xff]   ;;  %v8552_v24 = vld [vmem:[%s8503_s20 + $0x6c] ss:$16 sps:$4 sm:$0xff]  }
  0xbf   : > { %1498 = vmatprep.subr.bf16.mxu0 %v7591_v25  ;;  %v7625_v48 = vld [vmem:[#allocation5 + $0x184] ss:$16 sps:$4 sm:$0xff]   ;;  %v7629_v52 = vld [vmem:[#allocation5 + $0x180] ss:$16 sps:$4 sm:$0xff]   ;;  %v7682_v25 = vld [vmem:[#allocation5 + $0xa8] ss:$16 sps:$4 sm:$0xff]   ;;  %p8158_p9 = por %p8157_p7, %p8156_p3 }
  0xc0   : > { %v8518_v49 = vld [vmem:[%s8503_s20 + $0x4] ss:$16 sps:$4 sm:$0xff]   ;;  %v7630_v53 = vld [vmem:[#allocation5 + $0x380] ss:$16 sps:$4 sm:$0xff]  }
  0xc1   : > { %1386 = vmatpush1.bf16.msra.mxu1 %v7593_v26  ;;  %v7627_v50 = vld [vmem:[#allocation5 + $0x384] ss:$16 sps:$4 sm:$0xff]   ;;  %1405 = vmatprep.mubr.bf16.mxu1 %v8518_v49  ;;  %v7635_v56 = vld [vmem:[#allocation5 + $0x1a0] ss:$16 sps:$4 sm:$0xff]   ;;  %v7693_v26 = vld [vmem:[#allocation5 + $0xcc] ss:$16 sps:$4 sm:$0xff]   ;;  %p8159_p12 = pnand %p8158_p9, %p8152_p13 }
  0xc2   : > { %1499 = vmatpush1.bf16.msra.mxu0 %v7594_v27  ;;  %1387 = vmatprep.subr.bf16.mxu1 %v7595_v28  ;;  %v7631_v54 = vld [vmem:[#allocation5 + $0x1a4] ss:$16 sps:$4 sm:$0xff]   ;;  %v7636_v57 = vld [vmem:[#allocation5 + $0x3a0] ss:$16 sps:$4 sm:$0xff]   ;;  %v8562_v28 = vld [vmem:[%s8503_s20 + $0x68] ss:$16 sps:$4 sm:$0xff]  }
  0xc3   : > { %1500 = vmatprep.subr.bf16.mxu0 %v7597_v29  ;;  %v7633_v55 = vld [vmem:[#allocation5 + $0x3a4] ss:$16 sps:$4 sm:$0xff]   ;;  %v7641_v60 = vld [vmem:[#allocation5 + $0x1c0] ss:$16 sps:$4 sm:$0xff]   ;;  %v7691_v29 = vld [vmem:[#allocation5 + $0xc8] ss:$16 sps:$4 sm:$0xff]  }
  0xc4   : > { %v7637_v58 = vld [vmem:[#allocation5 + $0x1c4] ss:$16 sps:$4 sm:$0xff]   ;;  %v7642_v61 = vld [vmem:[#allocation5 + $0x3c0] ss:$16 sps:$4 sm:$0xff]  }
  0xc5   : > { %1388 = vmatpush1.bf16.msra.mxu1 %v7599_v30  ;;  %v7639_v59 = vld [vmem:[#allocation5 + $0x3c4] ss:$16 sps:$4 sm:$0xff]   ;;  %v7647_v0 = vld [vmem:[#allocation5 + $0x1e0] ss:$16 sps:$4 sm:$0xff]   ;;  %v7696_v30 = vld [vmem:[#allocation5 + $0xec] ss:$16 sps:$4 sm:$0xff]  }
  0xc6   : > { %1501 = vmatpush1.bf16.msra.mxu0 %v7600_v31  ;;  %1389 = vmatprep.subr.bf16.mxu1 %v7601_v32  ;;  %v7643_v62 = vld [vmem:[#allocation5 + $0x1e4] ss:$16 sps:$4 sm:$0xff]   ;;  %v7648_v1 = vld [vmem:[#allocation5 + $0x3e0] ss:$16 sps:$4 sm:$0xff]   ;;  %v8568_v32 = vld [vmem:[%s8503_s20 + $0x8c] ss:$16 sps:$4 sm:$0xff]  }
  0xc7   : > { %1502 = vmatprep.subr.bf16.mxu0 %v7603_v33  ;;  %v7645_v63 = vld [vmem:[#allocation5 + $0x3e4] ss:$16 sps:$4 sm:$0xff]   ;;  %v8523_v3 = vld [vmem:[%s8503_s20] ss:$16 sps:$4 sm:$0xff]   ;;  %v7694_v33 = vld [vmem:[#allocation5 + $0xe8] ss:$16 sps:$4 sm:$0xff]  }
  0xc8   : > { %v8527_v7 = vld [vmem:[%s8503_s20 + $0x24] ss:$16 sps:$4 sm:$0xff]   ;;  %v8533_v11 = vld [vmem:[%s8503_s20 + $0x20] ss:$16 sps:$4 sm:$0xff]  }
  0xc9   : > { %1390 = vmatpush1.bf16.msra.mxu1 %v7605_v34  ;;  %v8537_v15 = vld [vmem:[%s8503_s20 + $0x44] ss:$16 sps:$4 sm:$0xff]   ;;  %v8543_v19 = vld [vmem:[%s8503_s20 + $0x40] ss:$16 sps:$4 sm:$0xff]   ;;  %v7705_v34 = vld [vmem:[#allocation5 + $0x10c] ss:$16 sps:$4 sm:$0xff]  }
  0xca   : > { %1503 = vmatpush1.bf16.msra.mxu0 %v7606_v35  ;;  %1391 = vmatprep.subr.bf16.mxu1 %v7607_v36  ;;  %v8549_v23 = vld [vmem:[%s8503_s20 + $0x64] ss:$16 sps:$4 sm:$0xff]   ;;  %v8559_v27 = vld [vmem:[%s8503_s20 + $0x60] ss:$16 sps:$4 sm:$0xff]   ;;  %v8578_v36 = vld [vmem:[%s8503_s20 + $0x88] ss:$16 sps:$4 sm:$0xff]  }
  0xcb   : > { %1504 = vmatprep.subr.bf16.mxu0 %v7609_v37  ;;  %v8565_v31 = vld [vmem:[%s8503_s20 + $0x84] ss:$16 sps:$4 sm:$0xff]   ;;  %v8575_v35 = vld [vmem:[%s8503_s20 + $0x80] ss:$16 sps:$4 sm:$0xff]   ;;  %v7703_v37 = vld [vmem:[#allocation5 + $0x108] ss:$16 sps:$4 sm:$0xff]  }
  0xcc   : > { %v1979_v51 = vld [vmem:[#allocation7 + $0x20] sm:$0xff] }
  0xcd   : > { %1392 = vmatpush1.bf16.msra.mxu1 %v7611_v38  ;;  %v7708_v38 = vld [vmem:[#allocation5 + $0x12c] ss:$16 sps:$4 sm:$0xff]  }
  0xce   : > { %1505 = vmatpush1.bf16.msra.mxu0 %v7612_v39  ;;  %1393 = vmatprep.subr.bf16.mxu1 %v7613_v40  ;;  %v8581_v39 = vld [vmem:[%s8503_s20 + $0xa4] ss:$16 sps:$4 sm:$0xff]   ;;  %v8584_v40 = vld [vmem:[%s8503_s20 + $0xac] ss:$16 sps:$4 sm:$0xff]  }
  0xcf   : > { %1506 = vmatprep.subr.bf16.mxu0 %v7615_v41  ;;  %v7706_v41 = vld [vmem:[#allocation5 + $0x128] ss:$16 sps:$4 sm:$0xff]  }
  0xd1   : > { %1394 = vmatpush1.bf16.msra.mxu1 %v7617_v42  ;;  %v7717_v42 = vld [vmem:[#allocation5 + $0x14c] ss:$16 sps:$4 sm:$0xff]  }
  0xd2   : > { %1507 = vmatpush1.bf16.msra.mxu0 %v7618_v43  ;;  %1395 = vmatprep.subr.bf16.mxu1 %v7619_v44  ;;  %v8591_v43 = vld [vmem:[%s8503_s20 + $0xa0] ss:$16 sps:$4 sm:$0xff]   ;;  %v8594_v44 = vld [vmem:[%s8503_s20 + $0xa8] ss:$16 sps:$4 sm:$0xff]  }
  0xd3   : > { %1508 = vmatprep.subr.bf16.mxu0 %v7621_v45  ;;  %v7715_v45 = vld [vmem:[#allocation5 + $0x148] ss:$16 sps:$4 sm:$0xff]  }
  0xd5   : > { %1396 = vmatpush1.bf16.msra.mxu1 %v7623_v46  ;;  %v7720_v46 = vld [vmem:[#allocation5 + $0x16c] ss:$16 sps:$4 sm:$0xff]  }
  0xd6   : > { %1509 = vmatpush1.bf16.msra.mxu0 %v7624_v47  ;;  %1397 = vmatprep.subr.bf16.mxu1 %v7625_v48  ;;  %v8597_v47 = vld [vmem:[%s8503_s20 + $0xc4] ss:$16 sps:$4 sm:$0xff]   ;;  %v8600_v48 = vld [vmem:[%s8503_s20 + $0xcc] ss:$16 sps:$4 sm:$0xff]  }
  0xd7   : > { %1510 = vmatprep.subr.bf16.mxu0 %v7627_v50  ;;  %v1975_v50 = vld [vmem:[#allocation7] sm:$0xff] }
  0xd9   : > { %1398 = vmatpush1.bf16.msra.mxu1 %v7629_v52  ;;  %v7718_v52 = vld [vmem:[#allocation5 + $0x168] ss:$16 sps:$4 sm:$0xff]  }
  0xda   : > { %1511 = vmatpush1.bf16.msra.mxu0 %v7630_v53  ;;  %1399 = vmatprep.subr.bf16.mxu1 %v7631_v54  ;;  %v6645_v53 = vcombine.low %v1975_v50, %v1979_v51  ;;  %v6646_v54 = vcombine.high %v1975_v50, %v1979_v51  ;;  %v7748_v50 = vld [vmem:[#allocation5 + $0x228] ss:$16 sps:$4 sm:$0xff]  }
  0xdb   : > { %1512 = vmatprep.subr.bf16.mxu0 %v7633_v55  ;;  %v1983_v55 = vld [vmem:[#allocation7 + $0x40] sm:$0xff] }
  0xdd   : > { %1400 = vmatpush1.bf16.msra.mxu1 %v7635_v56  ;;  %v1987_v56 = vld [vmem:[#allocation7 + $0x60] sm:$0xff] }
  0xde   : > { %1513 = vmatpush1.bf16.msra.mxu0 %v7636_v57  ;;  %1401 = vmatprep.subr.bf16.mxu1 %v7637_v58  ;;  %v7729_v57 = vld [vmem:[#allocation5 + $0x18c] ss:$16 sps:$4 sm:$0xff]   ;;  %v6654_v58 = vcombine.high %v1983_v55, %v1987_v56 }
  0xdf   : > { %1514 = vmatprep.subr.bf16.mxu0 %v7639_v59  ;;  %v8607_v59 = vld [vmem:[%s8503_s20 + $0xc0] ss:$16 sps:$4 sm:$0xff]  }
  0xe1   : > { %1402 = vmatpush1.bf16.msra.mxu1 %v7641_v60  ;;  %v8610_v60 = vld [vmem:[%s8503_s20 + $0xc8] ss:$16 sps:$4 sm:$0xff]  }
  0xe2   : > { %1515 = vmatpush1.bf16.msra.mxu0 %v7642_v61  ;;  %1403 = vmatprep.subr.bf16.mxu1 %v7643_v62  ;;  %v7727_v61 = vld [vmem:[#allocation5 + $0x188] ss:$16 sps:$4 sm:$0xff]   ;;  %v7732_v62 = vld [vmem:[#allocation5 + $0x1ac] ss:$16 sps:$4 sm:$0xff]  }
  0xe3   : > { %1516 = vmatprep.subr.bf16.mxu0 %v7645_v63  ;;  %v8613_v63 = vld [vmem:[%s8503_s20 + $0xe4] ss:$16 sps:$4 sm:$0xff]  }
  0xe5   : > { %1404 = vmatpush1.bf16.msra.mxu1 %v7647_v0  ;;  %v1991_v0 = vld [vmem:[#allocation7 + $0x80] sm:$0xff] }
  0xe6   : > { %1517 = vmatpush1.bf16.msra.mxu0 %v7648_v1  ;;  %1599 = vmatprep.subr.bf16.mxu1 %v7657_v2  ;;  %v1995_v1 = vld [vmem:[#allocation7 + $0xa0] sm:$0xff]  ;;  %v8616_v2 = vld [vmem:[%s8503_s20 + $0xec] ss:$16 sps:$4 sm:$0xff]  }
  0xe7   : > { %3511 = vmatprep.subr.bf16.mxu0 %v6646_v54 }
  0xe8   : > { %1406 = vmatmul.mubr.bf16.vlgmr.msra.gmra.mrb[0].mxu1 %v8523_v3 }
  0xe9   : > { %1519 = vmatmul.mubr.bf16.vlgmr.msra.gmra.mrb[0].mxu0 %v7652_v4  ;;  %1600 = vmatpush1.bf16.msra.mxu1 %v7655_v5  ;;  %v6653_v4 = vcombine.low %v1983_v55, %v1987_v56  ;;  %v7730_v5 = vld [vmem:[#allocation5 + $0x1a8] ss:$16 sps:$4 sm:$0xff]  }
  0xea   : > { %1415 = vmatprep.mubr.bf16.mxu1 %v8527_v7  ;;  %1601 = vmatprep.subr.bf16.mxu1 %v7660_v6  ;;  %v7741_v6 = vld [vmem:[#allocation5 + $0x1cc] ss:$16 sps:$4 sm:$0xff]   ;;  %v7751_v55 = vld [vmem:[#allocation5 + $0x248] ss:$16 sps:$4 sm:$0xff]  }
  0xeb   : > { %1528 = vmatprep.mubr.bf16.mxu0 %v7663_v8  ;;  %3512 = vmatpush1.bf16.msra.mxu0 %v6645_v53  ;;  %v6662_v8 = vcombine.high %v1991_v0, %v1995_v1  ;;  %v7753_v53 = vld [vmem:[#allocation5 + $0x24c] ss:$16 sps:$4 sm:$0xff]  }
  0xec   : > { %3513 = vmatprep.subr.bf16.mxu0 %v6654_v58  ;;  %v2043_v58 = vld [vmem:[#allocation7 + $0x220] sm:$0xff] }
  0xed   : > { %1602 = vmatpush1.bf16.msra.mxu1 %v7658_v9  ;;  %v1999_v9 = vld [vmem:[#allocation7 + $0xc0] sm:$0xff] }
  0xee   : > { %1603 = vmatprep.subr.bf16.mxu1 %v7669_v10  ;;  %v2003_v10 = vld [vmem:[#allocation7 + $0xe0] sm:$0xff] }
  0xef   : > { %3514 = vmatpush1.bf16.msra.mxu0 %v6653_v4  ;;  %v2051_v4 = vld [vmem:[#allocation7 + $0x260] sm:$0xff] }
  0xf0   : > { %1416 = vmatmul.mubr.bf16.gmra.mrb[4].mxu1 %v8533_v11  ;;  %3515 = vmatprep.subr.bf16.mxu0 %v6662_v8 }
  0xf1   : > { %1529 = vmatmul.mubr.bf16.gmra.mrb[4].mxu0 %v7666_v12  ;;  %1604 = vmatpush1.bf16.msra.mxu1 %v7667_v13  ;;  %v8623_v12 = vld [vmem:[%s8503_s20 + $0xe0] ss:$16 sps:$4 sm:$0xff]   ;;  %v8626_v13 = vld [vmem:[%s8503_s20 + $0xe8] ss:$16 sps:$4 sm:$0xff]  }
  0xf2   : > { %1425 = vmatprep.mubr.bf16.mxu1 %v8537_v15  ;;  %1605 = vmatprep.subr.bf16.mxu1 %v7672_v14  ;;  %v6661_v14 = vcombine.low %v1991_v0, %v1995_v1  ;;  %v7754_v0 = vld [vmem:[#allocation5 + $0x268] ss:$16 sps:$4 sm:$0xff]   ;;  %v2047_v1 = vld [vmem:[#allocation7 + $0x240] sm:$0xff] }
  0xf3   : > { %1538 = vmatprep.mubr.bf16.mxu0 %v7675_v16  ;;  %v7739_v16 = vld [vmem:[#allocation5 + $0x1c8] ss:$16 sps:$4 sm:$0xff]  }
  0xf4   : > { %3516 = vmatpush1.bf16.msra.mxu0 %v6661_v14  ;;  %v7762_v14 = vld [vmem:[#allocation5 + $0x2ac] ss:$16 sps:$4 sm:$0xff]  }
  0xf5   : > { %1606 = vmatpush1.bf16.msra.mxu1 %v7670_v17  ;;  %v2007_v17 = vld [vmem:[#allocation7 + $0x100] sm:$0xff] }
  0xf6   : > { %1607 = vmatprep.subr.bf16.mxu1 %v7681_v18  ;;  %v2011_v18 = vld [vmem:[#allocation7 + $0x120] sm:$0xff] }
  0xf8   : > { %1426 = vmatmul.mubr.bf16.gmra.mrb[8].mxu1 %v8543_v19 }
  0xf9   : > { %1539 = vmatmul.mubr.bf16.gmra.mrb[8].mxu0 %v8546_v20  ;;  %1608 = vmatpush1.bf16.msra.mxu1 %v7679_v21  ;;  %v7744_v21 = vld [vmem:[#allocation5 + $0x1ec] ss:$16 sps:$4 sm:$0xff]  }
  0xfa   : > { %1435 = vmatprep.mubr.bf16.mxu1 %v8549_v23  ;;  %1609 = vmatprep.subr.bf16.mxu1 %v7684_v22  ;;  %v6670_v22 = vcombine.high %v1999_v9, %v2003_v10 }
  0xfb   : > { %1548 = vmatprep.mubr.bf16.mxu0 %v8552_v24 }
  0xfc   : > { %3517 = vmatprep.subr.bf16.mxu0 %v6670_v22  ;;  %v7765_v22 = vld [vmem:[#allocation5 + $0x2cc] ss:$16 sps:$4 sm:$0xff]  }
  0xfd   : > { %1610 = vmatpush1.bf16.msra.mxu1 %v7682_v25  ;;  %v6669_v25 = vcombine.low %v1999_v9, %v2003_v10  ;;  %v2055_v9 = vld [vmem:[#allocation7 + $0x280] sm:$0xff] }
  0xfe   : > { %1611 = vmatprep.subr.bf16.mxu1 %v7693_v26  ;;  %v6678_v26 = vcombine.high %v2007_v17, %v2011_v18  ;;  %v2059_v10 = vld [vmem:[#allocation7 + $0x2a0] sm:$0xff] }
  0xff   : > { %3518 = vmatpush1.bf16.msra.mxu0 %v6669_v25  ;;  %v6725_v25 = vcombine.low %v2055_v9, %v2059_v10 }
 0x100   : > { %1436 = vmatmul.mubr.bf16.gmra.mrb[12].mxu1 %v8559_v27  ;;  %3519 = vmatprep.subr.bf16.mxu0 %v6678_v26 }
 0x101   : > { %1549 = vmatmul.mubr.bf16.gmra.mrb[12].mxu0 %v8562_v28  ;;  %1612 = vmatpush1.bf16.msra.mxu1 %v7691_v29  ;;  %v7742_v29 = vld [vmem:[#allocation5 + $0x1e8] ss:$16 sps:$4 sm:$0xff]  }
 0x102   : > { %1445 = vmatprep.mubr.bf16.mxu1 %v8565_v31  ;;  %1613 = vmatprep.subr.bf16.mxu1 %v7696_v30  ;;  %v2015_v30 = vld [vmem:[#allocation7 + $0x140] sm:$0xff] }
 0x103   : > { %1558 = vmatprep.mubr.bf16.mxu0 %v8568_v32 }
 0x105   : > { %1614 = vmatpush1.bf16.msra.mxu1 %v7694_v33  ;;  %v2019_v33 = vld [vmem:[#allocation7 + $0x160] sm:$0xff] }
 0x106   : > { %1615 = vmatprep.subr.bf16.mxu1 %v7705_v34  ;;  %v7747_v34 = vld [vmem:[#allocation5 + $0x20c] ss:$16 sps:$4 sm:$0xff]   ;;  %v6685_v51 = vcombine.low %v2015_v30, %v2019_v33 }
 0x108   : > { %1446 = vmatmul.mubr.bf16.gmra.mrb[16].mxu1 %v8575_v35 }
 0x109   : > { %1559 = vmatmul.mubr.bf16.gmra.mrb[16].mxu0 %v8578_v36  ;;  %1616 = vmatpush1.bf16.msra.mxu1 %v7703_v37  ;;  %v6677_v37 = vcombine.low %v2007_v17, %v2011_v18  ;;  %v6717_v17 = vcombine.low %v2047_v1, %v2051_v4  ;;  %v7760_v18 = vld [vmem:[#allocation5 + $0x2a8] ss:$16 sps:$4 sm:$0xff]  }
 0x10a   : > { %1455 = vmatprep.mubr.bf16.mxu1 %v8581_v39  ;;  %1617 = vmatprep.subr.bf16.mxu1 %v7708_v38  ;;  %v6686_v38 = vcombine.high %v2015_v30, %v2019_v33  ;;  %v2071_v30 = vld [vmem:[#allocation7 + $0x300] sm:$0xff] }
 0x10b   : > { %1568 = vmatprep.mubr.bf16.mxu0 %v8584_v40  ;;  %3520 = vmatpush1.bf16.msra.mxu0 %v6677_v37  ;;  %v2075_v33 = vld [vmem:[#allocation7 + $0x320] sm:$0xff]  ;;  %v7766_v37 = vld [vmem:[#allocation5 + $0x2e8] ss:$16 sps:$4 sm:$0xff]  }
 0x10c   : > { %3521 = vmatprep.subr.bf16.mxu0 %v6686_v38  ;;  %v2079_v38 = vld [vmem:[#allocation7 + $0x340] sm:$0xff] }
 0x10d   : > { %1618 = vmatpush1.bf16.msra.mxu1 %v7706_v41  ;;  %v7745_v41 = vld [vmem:[#allocation5 + $0x208] ss:$16 sps:$4 sm:$0xff]  }
 0x10e   : > { %1619 = vmatprep.subr.bf16.mxu1 %v7717_v42  ;;  %v2023_v42 = vld [vmem:[#allocation7 + $0x180] sm:$0xff] }
 0x10f   : > { %3522 = vmatpush1.bf16.msra.mxu0 %v6685_v51  ;;  %v2091_v51 = vld [vmem:[#allocation7 + $0x3a0] sm:$0xff] }
 0x110   : > { %1456 = vmatmul.mubr.bf16.gmra.mrb[20].mxu1 %v8591_v43 }
 0x111   : > { %1569 = vmatmul.mubr.bf16.gmra.mrb[20].mxu0 %v8594_v44  ;;  %1620 = vmatpush1.bf16.msra.mxu1 %v7715_v45  ;;  %v2027_v45 = vld [vmem:[#allocation7 + $0x1a0] sm:$0xff] }
 0x112   : > { %1465 = vmatprep.mubr.bf16.mxu1 %v8597_v47  ;;  %1621 = vmatprep.subr.bf16.mxu1 %v7720_v46  ;;  %v7750_v46 = vld [vmem:[#allocation5 + $0x22c] ss:$16 sps:$4 sm:$0xff]   ;;  %v6694_v54 = vcombine.high %v2023_v42, %v2027_v45  ;;  %v6693_v56 = vcombine.low %v2023_v42, %v2027_v45  ;;  %v7769_v45 = vld [vmem:[#allocation5 + $0x308] ss:$16 sps:$4 sm:$0xff]  }
 0x113   : > { %1578 = vmatprep.mubr.bf16.mxu0 %v8600_v48  ;;  %v7771_v42 = vld [vmem:[#allocation5 + $0x30c] ss:$16 sps:$4 sm:$0xff]  }
 0x114   : > { %3523 = vmatprep.subr.bf16.mxu0 %v6694_v54  ;;  %v2095_v54 = vld [vmem:[#allocation7 + $0x3c0] sm:$0xff] }
 0x115   : > { %1622 = vmatpush1.bf16.msra.mxu1 %v7718_v52  ;;  %v2031_v52 = vld [vmem:[#allocation7 + $0x1c0] sm:$0xff]  ;;  %3524 = vmatpush1.bf16.msra.mxu0 %v6693_v56 }
 0x116   : > { %1623 = vmatprep.subr.bf16.mxu1 %v7729_v57  ;;  %v2039_v57 = vld [vmem:[#allocation7 + $0x200] sm:$0xff] }
 0x117   : > { %v6709_v8 = vcombine.low %v2039_v57, %v2043_v58 }
 0x118   : > { %1466 = vmatmul.mubr.bf16.gmra.mrb[24].mxu1 %v8607_v59 }
 0x119   : > { %1579 = vmatmul.mubr.bf16.gmra.mrb[24].mxu0 %v8610_v60  ;;  %1624 = vmatpush1.bf16.msra.mxu1 %v7727_v61  ;;  %v7756_v61 = vld [vmem:[#allocation5 + $0x26c] ss:$16 sps:$4 sm:$0xff]  }
 0x11a   : > { %1475 = vmatprep.mubr.bf16.mxu1 %v8613_v63  ;;  %1625 = vmatprep.subr.bf16.mxu1 %v7732_v62 }
 0x11b   : > { %1588 = vmatprep.mubr.bf16.mxu0 %v8616_v2 }
 0x11d   : > { %1626 = vmatpush1.bf16.msra.mxu1 %v7730_v5  ;;  %v7759_v5 = vld [vmem:[#allocation5 + $0x28c] ss:$16 sps:$4 sm:$0xff]  }
 0x11e   : > { %1627 = vmatprep.subr.bf16.mxu1 %v7741_v6  ;;  %v7757_v6 = vld [vmem:[#allocation5 + $0x288] ss:$16 sps:$4 sm:$0xff]  }
 0x120   : > { %1476 = vmatmul.mubr.bf16.gmra.mrb[28].mxu1 %v8623_v12 }
 0x121   : > { %1589 = vmatmul.mubr.bf16.gmra.mrb[28].mxu0 %v8626_v13  ;;  %1628 = vmatpush1.bf16.msra.mxu1 %v7739_v16  ;;  %v6718_v16 = vcombine.high %v2047_v1, %v2051_v4  ;;  %v7786_v1 = vld [vmem:[#allocation5 + $0x3ac] ss:$16 sps:$4 sm:$0xff]   ;;  %v7784_v4 = vld [vmem:[#allocation5 + $0x3a8] ss:$16 sps:$4 sm:$0xff]  }
 0x122   : > { %1631 = vmatprep.mubr.bf16.mxu1 %v8518_v49  ;;  %1629 = vmatprep.subr.bf16.mxu1 %v7744_v21  ;;  %v2035_v49 = vld [vmem:[#allocation7 + $0x1e0] sm:$0xff] }
 0x123   : > { %v6702_v62 = vcombine.high %v2031_v52, %v2035_v49  ;;  %v2067_v21 = vld [vmem:[#allocation7 + $0x2e0] sm:$0xff] }
 0x125   : > { %1630 = vmatpush1.bf16.msra.mxu1 %v7742_v29  ;;  %3525 = vmatprep.subr.bf16.mxu0 %v6702_v62  ;;  %v7763_v29 = vld [vmem:[#allocation5 + $0x2c8] ss:$16 sps:$4 sm:$0xff]  }
 0x126   : > { %1712 = vmatprep.subr.bf16.mxu1 %v7747_v34 }
 0x128   : > { %1632 = vmatmul.mubr.bf16.vlgmr.msra.gmra.mrb[32].mxu1 %v8523_v3  ;;  %v6701_v3 = vcombine.low %v2031_v52, %v2035_v49  ;;  %v7774_v52 = vld [vmem:[#allocation5 + $0x32c] ss:$16 sps:$4 sm:$0xff]  }
 0x129   : > { %1713 = vmatpush1.bf16.msra.mxu1 %v7745_v41  ;;  %1641 = vmatprep.mubr.bf16.mxu1 %v8527_v7  ;;  %v6710_v7 = vcombine.high %v2039_v57, %v2043_v58  ;;  %v2083_v41 = vld [vmem:[#allocation7 + $0x360] sm:$0xff]  ;;  %v7775_v57 = vld [vmem:[#allocation5 + $0x348] ss:$16 sps:$4 sm:$0xff]  }
 0x12a   : > { %1714 = vmatprep.subr.bf16.mxu1 %v7750_v46  ;;  %3526 = vmatpush1.bf16.msra.mxu0 %v6701_v3  ;;  %v6741_v46 = vcombine.low %v2071_v30, %v2075_v33  ;;  %v6750_v49 = vcombine.high %v2079_v38, %v2083_v41 }
 0x12b   : > { %3527 = vmatprep.subr.bf16.mxu0 %v6710_v7  ;;  %v7792_v7 = vld [vmem:[#allocation5 + $0x3ec] ss:$16 sps:$4 sm:$0xff]  }
 0x12d   : > { %1715 = vmatpush1.bf16.msra.mxu1 %v7748_v50  ;;  %v2087_v50 = vld [vmem:[#allocation7 + $0x380] sm:$0xff] }
 0x12e   : > { %1716 = vmatprep.subr.bf16.mxu1 %v7753_v53  ;;  %3528 = vmatpush1.bf16.msra.mxu0 %v6709_v8  ;;  %v6749_v53 = vcombine.low %v2079_v38, %v2083_v41  ;;  %v6758_v56 = vcombine.high %v2087_v50, %v2091_v51  ;;  %v6757_v58 = vcombine.low %v2087_v50, %v2091_v51  ;;  %v7790_v8 = vld [vmem:[#allocation5 + $0x3e8] ss:$16 sps:$4 sm:$0xff]  }
 0x12f   : > { %3529 = vmatprep.subr.bf16.mxu0 %v6718_v16  ;;  %v2016_v38 = vld [vmem:[#allocation7 + $0x148] sm:$0xff] }
 0x130   : > { %1642 = vmatmul.mubr.bf16.gmra.mrb[36].mxu1 %v8533_v11  ;;  %v6726_v11 = vcombine.high %v2055_v9, %v2059_v10  ;;  %v8002_v9 = vld [vmem:[%s8503_s20 + $0xc] ss:$16 sps:$4 sm:$0xff]  }
 0x131   : > { %1717 = vmatpush1.bf16.msra.mxu1 %v7751_v55  ;;  %1651 = vmatprep.mubr.bf16.mxu1 %v8537_v15  ;;  %v2063_v15 = vld [vmem:[#allocation7 + $0x2c0] sm:$0xff]  ;;  %v1984_v10 = vld [vmem:[#allocation7 + $0x48] sm:$0xff] }
 0x132   : > { %1718 = vmatprep.subr.bf16.mxu1 %v7756_v61  ;;  %3530 = vmatpush1.bf16.msra.mxu0 %v6717_v17  ;;  %v6734_v26 = vcombine.high %v2063_v15, %v2067_v21  ;;  %v6733_v34 = vcombine.low %v2063_v15, %v2067_v21  ;;  %v2099_v55 = vld [vmem:[#allocation7 + $0x3e0] sm:$0xff]  ;;  %v7780_v61 = vld [vmem:[#allocation5 + $0x36c] ss:$16 sps:$4 sm:$0xff]  }
 0x133   : > { %3531 = vmatprep.subr.bf16.mxu0 %v6726_v11  ;;  %v6766_v62 = vcombine.high %v2095_v54, %v2099_v55  ;;  %v6765_v3 = vcombine.low %v2095_v54, %v2099_v55  ;;  %v1992_v17 = vld [vmem:[#allocation7 + $0x88] sm:$0xff] }
 0x134   : > { %v1996_v11 = vld [vmem:[#allocation7 + $0xa8] sm:$0xff] }
 0x135   : > { %1719 = vmatpush1.bf16.msra.mxu1 %v7754_v0  ;;  %v7778_v0 = vld [vmem:[#allocation5 + $0x368] ss:$16 sps:$4 sm:$0xff]   ;;  %v8004_v15 = vld [vmem:[%s8503_s20 + $0x2c] ss:$16 sps:$4 sm:$0xff]   ;;  %v6664_v21 = vcombine.high %v1992_v17, %v1996_v11 }
 0x136   : > { %1720 = vmatprep.subr.bf16.mxu1 %v7759_v5  ;;  %3532 = vmatpush1.bf16.msra.mxu0 %v6725_v25  ;;  %v7787_v5 = vld [vmem:[#allocation5 + $0x3c8] ss:$16 sps:$4 sm:$0xff]  }
 0x137   : > { %3533 = vmatprep.subr.bf16.mxu0 %v6734_v26  ;;  %v2004_v25 = vld [vmem:[#allocation7 + $0xe8] sm:$0xff]  ;;  %v6663_v26 = vcombine.low %v1992_v17, %v1996_v11 }
 0x138   : > { %1652 = vmatmul.mubr.bf16.gmra.mrb[40].mxu1 %v8543_v19  ;;  %v7768_v19 = vld [vmem:[#allocation5 + $0x2ec] ss:$16 sps:$4 sm:$0xff]  }
 0x139   : > { %1721 = vmatpush1.bf16.msra.mxu1 %v7757_v6  ;;  %1661 = vmatprep.mubr.bf16.mxu1 %v8549_v23  ;;  %v6742_v23 = vcombine.high %v2071_v30, %v2075_v33  ;;  %v1980_v6 = vld [vmem:[#allocation7 + $0x28] sm:$0xff] }
 0x13a   : > { %1722 = vmatprep.subr.bf16.mxu1 %v7762_v14  ;;  %3534 = vmatpush1.bf16.msra.mxu0 %v6733_v34  ;;  %v2008_v30 = vld [vmem:[#allocation7 + $0x108] sm:$0xff] }
 0x13b   : > { %3535 = vmatprep.subr.bf16.mxu0 %v6742_v23  ;;  %v2012_v33 = vld [vmem:[#allocation7 + $0x128] sm:$0xff] }
 0x13c   : > { %v8006_v34 = vld [vmem:[%s8503_s20 + $0x4c] ss:$16 sps:$4 sm:$0xff]  }
 0x13d   : > { %1723 = vmatpush1.bf16.msra.mxu1 %v7760_v18  ;;  %v8003_v18 = vld [vmem:[%s8503_s20 + $0x8] ss:$16 sps:$4 sm:$0xff]  }
 0x13e   : > { %1724 = vmatprep.subr.bf16.mxu1 %v7765_v22  ;;  %3536 = vmatpush1.bf16.msra.mxu0 %v6741_v46  ;;  %v2000_v22 = vld [vmem:[#allocation7 + $0xc8] sm:$0xff] }
 0x13f   : > { %3537 = vmatprep.subr.bf16.mxu0 %v6750_v49  ;;  %v6671_v23 = vcombine.low %v2000_v22, %v2004_v25  ;;  %v2020_v41 = vld [vmem:[#allocation7 + $0x168] sm:$0xff] }
 0x140   : > { %1662 = vmatmul.mubr.bf16.gmra.mrb[44].mxu1 %v8559_v27  ;;  %v7772_v27 = vld [vmem:[#allocation5 + $0x328] ss:$16 sps:$4 sm:$0xff]   ;;  %v6687_v51 = vcombine.low %v2016_v38, %v2020_v41 }
 0x141   : > { %1725 = vmatpush1.bf16.msra.mxu1 %v7763_v29  ;;  %1671 = vmatprep.mubr.bf16.mxu1 %v8565_v31  ;;  %v7777_v31 = vld [vmem:[#allocation5 + $0x34c] ss:$16 sps:$4 sm:$0xff]   ;;  %v6672_v29 = vcombine.high %v2000_v22, %v2004_v25  ;;  %v1870_v25 = vlaneseq }
 0x142   : > { %1726 = vmatprep.subr.bf16.mxu1 %v7768_v19  ;;  %3538 = vmatpush1.bf16.msra.mxu0 %v6749_v53  ;;  %v8005_v19 = vld [vmem:[%s8503_s20 + $0x28] ss:$16 sps:$4 sm:$0xff]  }
 0x143   : > { %3539 = vmatprep.subr.bf16.mxu0 %v6758_v56  ;;  %v2024_v46 = vld [vmem:[#allocation7 + $0x188] sm:$0xff]  ;;  %v8654_v56 = vld [vmem:[#allocation7 + $0x400] sm:$0xff] }
 0x144   : > { %v2028_v50 = vld [vmem:[#allocation7 + $0x1a8] sm:$0xff] }
 0x145   : > { %1727 = vmatpush1.bf16.msra.mxu1 %v7766_v37  ;;  %v6680_v37 = vcombine.high %v2008_v30, %v2012_v33  ;;  %v2032_v49 = vld [vmem:[#allocation7 + $0x1c8] sm:$0xff]  ;;  %v6695_v53 = vcombine.low %v2024_v46, %v2028_v50 }
 0x146   : > { %1728 = vmatprep.subr.bf16.mxu1 %v7771_v42  ;;  %3540 = vmatpush1.bf16.msra.mxu0 %v6757_v58  ;;  %v6679_v42 = vcombine.low %v2008_v30, %v2012_v33  ;;  %v2040_v55 = vld [vmem:[#allocation7 + $0x208] sm:$0xff]  ;;  %v6644_v30 = vld.sshfl [vmem:[%s9728_s2] sm:$0x33 pattern:$0x75316420] }
 0x147   : > { %3541 = vmatprep.subr.bf16.mxu0 %v6766_v62  ;;  %v2048_v62 = vld [vmem:[#allocation7 + $0x248] sm:$0xff] }
 0x148   : > { %1672 = vmatmul.mubr.bf16.gmra.mrb[48].mxu1 %v8575_v35  ;;  %v7783_v35 = vld [vmem:[#allocation5 + $0x38c] ss:$16 sps:$4 sm:$0xff]  }
 0x149   : > { %1729 = vmatpush1.bf16.msra.mxu1 %v7769_v45  ;;  %1681 = vmatprep.mubr.bf16.mxu1 %v8581_v39  ;;  %v7781_v39 = vld [vmem:[#allocation5 + $0x388] ss:$16 sps:$4 sm:$0xff]   ;;  %v6688_v45 = vcombine.high %v2016_v38, %v2020_v41 }
 0x14a   : > { %1730 = vmatprep.subr.bf16.mxu1 %v7774_v52  ;;  %3542 = vmatpush1.bf16.msra.mxu0 %v6765_v3  ;;  %v6696_v52 = vcombine.high %v2024_v46, %v2028_v50  ;;  %v2100_v17 = vld [vmem:[#allocation7 + $0x3e8] sm:$0xff] }
 0x14d   : > { %1731 = vmatpush1.bf16.msra.mxu1 %v7772_v27  ;;  %v2036_v27 = vld [vmem:[#allocation7 + $0x1e8] sm:$0xff] }
 0x14e   : > { %1732 = vmatprep.subr.bf16.mxu1 %v7777_v31  ;;  %v6704_v54 = vcombine.high %v2032_v49, %v2036_v27  ;;  %v2044_v31 = vld [vmem:[#allocation7 + $0x228] sm:$0xff] }
 0x150   : > { %1682 = vmatmul.mubr.bf16.gmra.mrb[52].mxu1 %v8591_v43  ;;  %v7789_v43 = vld [vmem:[#allocation5 + $0x3cc] ss:$16 sps:$4 sm:$0xff]  }
 0x151   : > { %1733 = vmatpush1.bf16.msra.mxu1 %v7775_v57  ;;  %1691 = vmatprep.mubr.bf16.mxu1 %v8597_v47  ;;  %v1976_v47 = vld [vmem:[#allocation7 + $0x8] sm:$0xff]  ;;  %v8656_v57 = vld [vmem:[#allocation7 + $0x420] sm:$0xff] }
 0x152   : > { %1734 = vmatprep.subr.bf16.mxu1 %v7780_v61  ;;  %v6647_v14 = vcombine.low %v1976_v47, %v1980_v6  ;;  %v6774_v58 = vcombine.high %v8654_v56, %v8656_v57  ;;  %v6712_v61 = vcombine.high %v2040_v55, %v2044_v31 }
 0x154   : > { %3624 = vmatprep.subr.bf16.mxu0 %v6774_v58 }
 0x155   : > { %1735 = vmatpush1.bf16.msra.mxu1 %v7778_v0  ;;  %v2052_v0 = vld [vmem:[#allocation7 + $0x268] sm:$0xff] }
 0x156   : > { %1736 = vmatprep.subr.bf16.mxu1 %v7783_v35  ;;  %v6720_v3 = vcombine.high %v2048_v62, %v2052_v0  ;;  %v2056_v35 = vld [vmem:[#allocation7 + $0x288] sm:$0xff] }
 0x158   : > { %1692 = vmatmul.mubr.bf16.gmra.mrb[56].mxu1 %v8607_v59  ;;  %v6648_v59 = vcombine.high %v1976_v47, %v1980_v6  ;;  %v2072_v47 = vld [vmem:[#allocation7 + $0x308] sm:$0xff] }
 0x159   : > { %1737 = vmatpush1.bf16.msra.mxu1 %v7781_v39  ;;  %1701 = vmatprep.mubr.bf16.mxu1 %v8613_v63  ;;  %v1988_v63 = vld [vmem:[#allocation7 + $0x68] sm:$0xff] }
 0x15a   : > { %1738 = vmatprep.subr.bf16.mxu1 %v7786_v1  ;;  %v6656_v16 = vcombine.high %v1984_v10, %v1988_v63  ;;  %v2060_v39 = vld [vmem:[#allocation7 + $0x2a8] sm:$0xff] }
 0x15b   : > { %v6728_v1 = vcombine.high %v2056_v35, %v2060_v39  ;;  %v2076_v6 = vld [vmem:[#allocation7 + $0x328] sm:$0xff] }
 0x15d   : > { %1739 = vmatpush1.bf16.msra.mxu1 %v7784_v4  ;;  %v2064_v4 = vld [vmem:[#allocation7 + $0x2c8] sm:$0xff] }
 0x15e   : > { %1740 = vmatprep.subr.bf16.mxu1 %v7789_v43  ;;  %v2068_v43 = vld [vmem:[#allocation7 + $0x2e8] sm:$0xff] }
 0x160   : > { %1702 = vmatmul.mubr.bf16.gmra.mrb[60].mxu1 %v8623_v12  ;;  %v6655_v12 = vcombine.low %v1984_v10, %v1988_v63  ;;  %v2088_v63 = vld [vmem:[#allocation7 + $0x388] sm:$0xff] }
 0x161   : > { %1741 = vmatpush1.bf16.msra.mxu1 %v7787_v5  ;;  %1744 = vmatprep.mubr.bf16.mxu1 %v8002_v9  ;;  %v6727_v5 = vcombine.low %v2056_v35, %v2060_v39  ;;  %v2084_v9 = vld [vmem:[#allocation7 + $0x368] sm:$0xff] }
 0x162   : > { %1742 = vmatprep.subr.bf16.mxu1 %v7792_v7  ;;  %v6736_v7 = vcombine.high %v2064_v4, %v2068_v43  ;;  %v2116_v35 = vld [vmem:[#allocation7 + $0x468] sm:$0xff] }
 0x165   : > { %1743 = vmatpush1.bf16.msra.mxu1 %v7790_v8  ;;  %v2080_v8 = vld [vmem:[#allocation7 + $0x348] sm:$0xff] }
 0x166   : > { %3737 = vmatprep.subr.bf16.mxu1 %v6648_v59  ;;  %v6743_v59 = vcombine.low %v2072_v47, %v2076_v6  ;;  %v6752_v10 = vcombine.high %v2080_v8, %v2084_v9 }
 0x168   : > { %1745 = vmatmul.mubr.bf16.vlgmr.msra.gmra.mrb[32].mxu1 %v8003_v18 }
 0x169   : > { %1754 = vmatprep.mubr.bf16.mxu1 %v8004_v15  ;;  %3738 = vmatpush1.bf16.msra.mxu1 %v6647_v14  ;;  %v2092_v14 = vld [vmem:[#allocation7 + $0x3a8] sm:$0xff] }
 0x16a   : > { %3739 = vmatprep.subr.bf16.mxu1 %v6656_v16  ;;  %v2096_v16 = vld [vmem:[#allocation7 + $0x3c8] sm:$0xff]  ;;  %v6759_v11 = vcombine.low %v2088_v63, %v2092_v14 }
 0x16b   : > { %v6768_v18 = vcombine.high %v2096_v16, %v2100_v17  ;;  %v8669_v15 = vld [vmem:[#allocation7 + $0x408] sm:$0xff] }
 0x16d   : > { %3740 = vmatpush1.bf16.msra.mxu1 %v6655_v12  ;;  %v8671_v12 = vld [vmem:[#allocation7 + $0x428] sm:$0xff] }
 0x16e   : > { %3741 = vmatprep.subr.bf16.mxu1 %v6664_v21  ;;  %v8238_v21 = vmov 1966171168  }
 0x16f   : > { %v1868_v22 = vunpack.c.l.s4 %v8238_v21  ;;  %v2120_v21 = vld [vmem:[#allocation7 + $0x488] sm:$0xff] }
 0x170   : > { %1755 = vmatmul.mubr.bf16.gmra.mrb[36].mxu1 %v8005_v19 }
 0x171   : > { %1764 = vmatprep.mubr.bf16.mxu1 %v8006_v34  ;;  %3742 = vmatpush1.bf16.msra.mxu1 %v6663_v26  ;;  %v1869_v26 = vunpack.c.0.s8 %v1868_v22  ;;  %v2124_v22 = vld [vmem:[#allocation7 + $0x4a8] sm:$0xff] }
 0x172   : > { %3743 = vmatprep.subr.bf16.mxu1 %v6672_v29  ;;  %v1871_v29 = vshrl.u32 %v1870_v25, 7 }
 0x174   : > { %v8679_v33 = vsub.s32 %v1869_v26, %v1871_v29 }
 0x175   : > { %3744 = vmatpush1.bf16.msra.mxu1 %v6671_v23 }
 0x176   : > { %3745 = vmatprep.subr.bf16.mxu1 %v6680_v37  ;;  %v8682_v19 = vrot.slane %v6644_v30, %v8679_v33  ;;  %v8689_v37 = vsub.s32 0, %v1871_v29 }
 0x178   : > { %1765 = vmatmul.mubr.bf16.gmra.mrb[40].mxu1 %v8546_v20  ;;  %v6703_v20 = vcombine.low %v2032_v49, %v2036_v27  ;;  %v1884_v23 = vpack.i.b16 %v8682_v19, %v8682_v19 }
 0x179   : > { %1774 = vmatprep.mubr.bf16.mxu1 %v8552_v24  ;;  %3746 = vmatpush1.bf16.msra.mxu1 %v6679_v42  ;;  %v6773_v24 = vcombine.low %v8654_v56, %v8656_v57  ;;  %v2128_v56 = vld [vmem:[#allocation7 + $0x4c8] sm:$0xff] }
 0x17a   : > { %3747 = vmatprep.subr.bf16.mxu1 %v6688_v45  ;;  %v2132_v57 = vld [vmem:[#allocation7 + $0x4e8] sm:$0xff] }
 0x17d   : > { %3748 = vmatpush1.bf16.msra.mxu1 %v6687_v51 }
 0x17e   : > { %3749 = vmatprep.subr.bf16.mxu1 %v6696_v52 }
 0x180   : > { %1775 = vmatmul.mubr.bf16.gmra.mrb[44].mxu1 %v8562_v28  ;;  %v6711_v28 = vcombine.low %v2040_v55, %v2044_v31 }
 0x181   : > { %1784 = vmatprep.mubr.bf16.mxu1 %v8568_v32  ;;  %3750 = vmatpush1.bf16.msra.mxu1 %v6695_v53  ;;  %v6719_v32 = vcombine.low %v2048_v62, %v2052_v0  ;;  %v8694_v53 = vrot.slane %v1884_v23, %v8689_v37  ;;  %v8699_v62 = vld [vmem:[#allocation7 + $0x440] sm:$0xff] }
 0x182   : > { %3751 = vmatprep.subr.bf16.mxu1 %v6704_v54 }
 0x185   : > { %3752 = vmatpush1.bf16.msra.mxu1 %v6703_v20 }
 0x186   : > { %3753 = vmatprep.subr.bf16.mxu1 %v6712_v61 }
 0x188   : > { %1785 = vmatmul.mubr.bf16.gmra.mrb[48].mxu1 %v8578_v36  ;;  %v6735_v36 = vcombine.low %v2064_v4, %v2068_v43  ;;  %v8707_v4 = vld [vmem:[#allocation7 + $0x10] sm:$0xff] }
 0x189   : > { %1794 = vmatprep.mubr.bf16.mxu1 %v8584_v40  ;;  %3754 = vmatpush1.bf16.msra.mxu1 %v6711_v28  ;;  %v6744_v40 = vcombine.high %v2072_v47, %v2076_v6  ;;  %v8702_v28 = vld [vmem:[#allocation7 + $0x460] sm:$0xff]  ;;  %v8709_v43 = vld [vmem:[#allocation7 + $0x30] sm:$0xff] }
 0x18a   : > { %3755 = vmatprep.subr.bf16.mxu1 %v6720_v3  ;;  %v8704_v3 = vld [vmem:[#allocation7 + $0x448] sm:$0xff]  ;;  %v6781_v29 = vcombine.low %v8699_v62, %v8702_v28 }
 0x18d   : > { %3756 = vmatpush1.bf16.msra.mxu1 %v6719_v32 }
 0x18e   : > { %3757 = vmatprep.subr.bf16.mxu1 %v6728_v1 }
 0x190   : > { %1795 = vmatmul.mubr.bf16.gmra.mrb[52].mxu1 %v8594_v44  ;;  %v6751_v44 = vcombine.low %v2080_v8, %v2084_v9  ;;  %v9748_v8 = vmov 0  }
 0x191   : > { %1804 = vmatprep.mubr.bf16.mxu1 %v8600_v48  ;;  %3758 = vmatpush1.bf16.msra.mxu1 %v6727_v5  ;;  %v6760_v48 = vcombine.high %v2088_v63, %v2092_v14  ;;  %v8711_v5 = vld [vmem:[#allocation7 + $0x18] sm:$0xff]  ;;  %v6649_v14 = vcombine.low %v8707_v4, %v8709_v43 }
 0x192   : > { %3759 = vmatprep.subr.bf16.mxu1 %v6736_v7 }
 0x195   : > { %3760 = vmatpush1.bf16.msra.mxu1 %v6735_v36  ;;  %v6775_v36 = vcombine.low %v8669_v15, %v8671_v12 }
 0x196   : > { %3761 = vmatprep.subr.bf16.mxu1 %v6744_v40  ;;  %v8715_v40 = vld [vmem:[#allocation7 + $0x38] sm:$0xff] }
 0x198   : > { %1805 = vmatmul.mubr.bf16.gmra.mrb[56].mxu1 %v8610_v60  ;;  %v6767_v60 = vcombine.low %v2096_v16, %v2100_v17 }
 0x199   : > { %1814 = vmatprep.mubr.bf16.mxu1 %v8616_v2  ;;  %3762 = vmatpush1.bf16.msra.mxu1 %v6743_v59  ;;  %v6776_v2 = vcombine.high %v8669_v15, %v8671_v12  ;;  %v6784_v15 = vcombine.high %v8704_v3, %v2116_v35  ;;  %v2119_v12 = vld [vmem:[#allocation7 + $0x480] sm:$0xff] }
 0x19a   : > { %3763 = vmatprep.subr.bf16.mxu1 %v6752_v10 }
 0x19d   : > { %3764 = vmatpush1.bf16.msra.mxu1 %v6751_v44  ;;  %v6651_v44 = vcombine.low %v8711_v5, %v8715_v40 }
 0x19e   : > { %3765 = vmatprep.subr.bf16.mxu1 %v6760_v48 }
 0x1a0   : > { %1815 = vmatmul.mubr.bf16.gmra.mrb[60].mxu1 %v8626_v13  ;;  %v1866_v13 = vcombine.high %v6644_v30, %v6644_v30  ;;  %v6783_v30 = vcombine.low %v8704_v3, %v2116_v35  ;;  %v6800_v35 = vcombine.high %v2128_v56, %v2132_v57 }
 0x1a1   : > { %3766 = vmatpush1.bf16.msra.mxu1 %v6759_v11 }
 0x1a2   : > { %3767 = vmatprep.subr.bf16.mxu1 %v6768_v18  ;;  %v8685_v34 = vrot.slane %v1866_v13, %v8679_v33  ;;  %v6782_v18 = vcombine.high %v8699_v62, %v8702_v28 }
 0x1a4   : > { %v1891_v42 = vpack.i.b16 %v8685_v34, %v8685_v34 }
 0x1a5   : > { %3768 = vmatpush1.bf16.msra.mxu1 %v6767_v60 }
 0x1a6   : > { %3850 = vmatprep.subr.bf16.mxu1 %v6776_v2  ;;  %v8697_v20 = vrot.slane %v1891_v42, %v8689_v37  ;;  %v2123_v2 = vld [vmem:[#allocation7 + $0x4a0] sm:$0xff] }
 0x1a7   : > { %v6790_v23 = vcombine.high %v2119_v12, %v2123_v2  ;;  %v2131_v42 = vld [vmem:[#allocation7 + $0x4e0] sm:$0xff] }
 0x1bb   : > { %v1407_v38 = vpop.f32.mrb[0].mxu1 }
 0x1bc   : > { %v1520_v41 = vpop.f32.mrb[0].mxu0  ;;  %v1409_v46 = vpop.f32.mrb[1].mxu1 }
 0x1bd   : > { %v1521_v45 = vadd.f32 %v1520_v41, %v1407_v38  ;;  %v1522_v50 = vpop.f32.mrb[1].mxu0  ;;  %v1411_v52 = vpop.f32.mrb[2].mxu1  ;;  %v6792_v38 = vcombine.high %v2120_v21, %v2124_v22  ;;  %v2127_v41 = vld [vmem:[#allocation7 + $0x4c0] sm:$0xff] }
 0x1be   : > { %v1523_v51 = vadd.f32 %v1522_v50, %v1409_v46  ;;  %v1524_v49 = vpop.f32.mrb[2].mxu0  ;;  %v1413_v54 = vpop.f32.mrb[3].mxu1 }
 0x1bf   : > { %v1525_v27 = vadd.f32 %v1524_v49, %v1411_v52  ;;  %v1526_v55 = vpop.f32.mrb[3].mxu0  ;;  %v6789_v49 = vcombine.low %v2119_v12, %v2123_v2  ;;  %v2144_v2 = vld [vmem:[#allocation7 + $0x548] sm:$0xff] }
 0x1c0   : > { %v1527_v31 = vadd.f32 %v1526_v55, %v1413_v54 }
 0x1c1   : > { %v1825_v58 = vpack.c.bf16 %v1525_v27, %v1521_v45  ;;  %v6791_v27 = vcombine.low %v2120_v21, %v2124_v22  ;;  %v2148_v21 = vld [vmem:[#allocation7 + $0x568] sm:$0xff] }
 0x1c2   : > { %v1826_v61 = vpack.c.bf16 %v1527_v31, %v1523_v51 }
 0x1c3   : > { %v1911_v0 = vadd.bf16 %v8694_v53, %v1825_v58  ;;  %v1417_v32 = vpop.f32.mrb[4].mxu1 }
 0x1c4   : > { %v1912_v39 = vadd.bf16 %v8697_v20, %v1826_v61  ;;  %v1530_v1 = vpop.f32.mrb[4].mxu0  ;;  %v1419_v47 = vpop.f32.mrb[5].mxu1  ;;  %v6798_v61 = vcombine.high %v2127_v41, %v2131_v42 }
 0x1c5   : > { %v1531_v7 = vadd.f32 %v1530_v1, %v1417_v32  ;;  %v1532_v6 = vpop.f32.mrb[5].mxu0  ;;  %v1421_v10 = vpop.f32.mrb[6].mxu1  ;;  %v8725_v48 = vmax.bf16 %v9748_v8, %v1911_v0  ;;  %v2139_v1 = vld [vmem:[#allocation7 + $0x520] sm:$0xff] }
 0x1c6   : > { %v8718_v9 = vmax.bf16 %v9748_v8, %v1912_v39  ;;  %v1533_v59 = vadd.f32 %v1532_v6, %v1419_v47  ;;  %v1534_v63 = vpop.f32.mrb[6].mxu0  ;;  %v1423_v17 = vpop.f32.mrb[7].mxu1  ;;  %v2135_v39 = vld [vmem:[#allocation7 + $0x500] sm:$0xff]  ;;  %v2140_v47 = vld [vmem:[#allocation7 + $0x528] sm:$0xff] }
 0x1c7   : > { %v1535_v16 = vadd.f32 %v1534_v63, %v1421_v10  ;;  %v1536_v11 = vpop.f32.mrb[7].mxu0  ;;  %v6799_v10 = vcombine.low %v2128_v56, %v2132_v57  ;;  %v6816_v57 = vcombine.high %v2144_v2, %v2148_v21 }
 0x1c8   : > { %v1537_v60 = vadd.f32 %v1536_v11, %v1423_v17  ;;  %3543 = vmatprep.mubr.bf16.mxu0 %v8718_v9  ;;  %3769 = vmatprep.mubr.bf16.mxu1 %v8718_v9  ;;  %v2143_v11 = vld [vmem:[#allocation7 + $0x540] sm:$0xff] }
 0x1c9   : > { %v1829_v25 = vpack.c.bf16 %v1535_v16, %v1531_v7  ;;  %3544 = vmatmul.mubr.bf16.vlgmr.msra.gmra.mrb[32].mxu0 %v8725_v48  ;;  %3770 = vmatmul.mubr.bf16.vlgmr.msra.gmra.mrb[64].mxu1 %v8725_v48  ;;  %v2136_v7 = vld [vmem:[#allocation7 + $0x508] sm:$0xff]  ;;  %v6806_v16 = vcombine.high %v2135_v39, %v2139_v1 }
 0x1ca   : > { %v1830_v26 = vpack.c.bf16 %v1537_v60, %v1533_v59  ;;  %3625 = vmatpush1.bf16.msra.mxu0 %v6773_v24  ;;  %3851 = vmatpush1.bf16.msra.mxu1 %v6775_v36  ;;  %v6797_v59 = vcombine.low %v2127_v41, %v2131_v42  ;;  %v6808_v17 = vcombine.high %v2136_v7, %v2140_v47 }
 0x1cb   : > { %v1915_v13 = vadd.bf16 %v8694_v53, %v1829_v25  ;;  %3626 = vmatprep.subr.bf16.mxu0 %v6782_v18  ;;  %3852 = vmatprep.subr.bf16.mxu1 %v6784_v15  ;;  %v1427_v46 = vpop.f32.mrb[8].mxu1  ;;  %v2147_v18 = vld [vmem:[#allocation7 + $0x560] sm:$0xff] }
 0x1cc   : > { %v1916_v45 = vadd.bf16 %v8697_v20, %v1830_v26  ;;  %v1540_v50 = vpop.f32.mrb[8].mxu0  ;;  %v1429_v51 = vpop.f32.mrb[9].mxu1  ;;  %v6814_v42 = vcombine.high %v2143_v11, %v2147_v18 }
 0x1cd   : > { %v1541_v24 = vadd.f32 %v1540_v50, %v1427_v46  ;;  %v1542_v52 = vpop.f32.mrb[9].mxu0  ;;  %v1431_v31 = vpop.f32.mrb[10].mxu1  ;;  %v8746_v62 = vmax.bf16 %v9748_v8, %v1915_v13 }
 0x1ce   : > { %v8743_v54 = vmax.bf16 %v9748_v8, %v1916_v45  ;;  %v1543_v55 = vadd.f32 %v1542_v52, %v1429_v51  ;;  %v1544_v58 = vpop.f32.mrb[10].mxu0  ;;  %3627 = vmatpush1.bf16.msra.mxu0 %v6781_v29  ;;  %3853 = vmatpush1.bf16.msra.mxu1 %v6783_v30  ;;  %v1433_v28 = vpop.f32.mrb[11].mxu1  ;;  %v6805_v29 = vcombine.low %v2135_v39, %v2139_v1  ;;  %v2155_v52 = vld [vmem:[#allocation7 + $0x5a0] sm:$0xff] }
 0x1cf   : > { %v1545_v0 = vadd.f32 %v1544_v58, %v1431_v31  ;;  %v1546_v3 = vpop.f32.mrb[11].mxu0  ;;  %3628 = vmatprep.subr.bf16.mxu0 %v6790_v23  ;;  %3854 = vmatprep.subr.bf16.mxu1 %v6792_v38  ;;  %v6807_v30 = vcombine.low %v2136_v7, %v2140_v47  ;;  %v6813_v58 = vcombine.low %v2143_v11, %v2147_v18  ;;  %v2163_v39 = vld [vmem:[#allocation7 + $0x5e0] sm:$0xff]  ;;  %v2160_v47 = vld [vmem:[#allocation7 + $0x5c8] sm:$0xff] }
 0x1d0   : > { %v1547_v32 = vadd.f32 %v1546_v3, %v1433_v28  ;;  %3553 = vmatprep.mubr.bf16.mxu0 %v8743_v54  ;;  %3779 = vmatprep.mubr.bf16.mxu1 %v8743_v54 }
 0x1d1   : > { %v1833_v6 = vpack.c.bf16 %v1545_v0, %v1541_v24  ;;  %3554 = vmatmul.mubr.bf16.gmra.mrb[36].mxu0 %v8746_v62  ;;  %3780 = vmatmul.mubr.bf16.gmra.mrb[68].mxu1 %v8746_v62  ;;  %v2151_v24 = vld [vmem:[#allocation7 + $0x580] sm:$0xff] }
 0x1d2   : > { %v1834_v36 = vpack.c.bf16 %v1547_v32, %v1543_v55  ;;  %3629 = vmatpush1.bf16.msra.mxu0 %v6789_v49  ;;  %3855 = vmatpush1.bf16.msra.mxu1 %v6791_v27  ;;  %v2152_v49 = vld [vmem:[#allocation7 + $0x588] sm:$0xff]  ;;  %v6822_v28 = vcombine.high %v2151_v24, %v2155_v52 }
 0x1d3   : > { %v1919_v63 = vadd.bf16 %v8694_v53, %v1833_v6  ;;  %3630 = vmatprep.subr.bf16.mxu0 %v6798_v61  ;;  %3856 = vmatprep.subr.bf16.mxu1 %v6800_v35  ;;  %v1437_v12 = vpop.f32.mrb[12].mxu1  ;;  %v2156_v27 = vld [vmem:[#allocation7 + $0x5a8] sm:$0xff]  ;;  %v6815_v61 = vcombine.low %v2144_v2, %v2148_v21  ;;  %v2159_v35 = vld [vmem:[#allocation7 + $0x5c0] sm:$0xff] }
 0x1d4   : > { %v1920_v15 = vadd.bf16 %v8697_v20, %v1834_v36  ;;  %v1550_v60 = vpop.f32.mrb[12].mxu0  ;;  %v1439_v25 = vpop.f32.mrb[13].mxu1  ;;  %v6824_v3 = vcombine.high %v2152_v49, %v2156_v27  ;;  %v2164_v6 = vld [vmem:[#allocation7 + $0x5e8] sm:$0xff] }
 0x1d5   : > { %v1551_v22 = vadd.f32 %v1550_v60, %v1437_v12  ;;  %v1552_v26 = vpop.f32.mrb[13].mxu0  ;;  %v1441_v38 = vpop.f32.mrb[14].mxu1  ;;  %v8758_v45 = vmax.bf16 %v9748_v8, %v1919_v63  ;;  %v6821_v63 = vcombine.low %v2151_v24, %v2155_v52  ;;  %v6830_v12 = vcombine.high %v2159_v35, %v2163_v39  ;;  %v2179_v52 = vld [vmem:[#allocation7 + $0x660] sm:$0xff] }
 0x1d6   : > { %v8755_v13 = vmax.bf16 %v9748_v8, %v1920_v15  ;;  %v1553_v23 = vadd.f32 %v1552_v26, %v1439_v25  ;;  %v1554_v41 = vpop.f32.mrb[14].mxu0  ;;  %3631 = vmatpush1.bf16.msra.mxu0 %v6797_v59  ;;  %3857 = vmatpush1.bf16.msra.mxu1 %v6799_v10  ;;  %v1443_v50 = vpop.f32.mrb[15].mxu1  ;;  %v6832_v25 = vcombine.high %v2160_v47, %v2164_v6  ;;  %v2167_v26 = vld [vmem:[#allocation7 + $0x600] sm:$0xff] }
 0x1d7   : > { %v1555_v46 = vadd.f32 %v1554_v41, %v1441_v38  ;;  %v1556_v56 = vpop.f32.mrb[15].mxu0  ;;  %3632 = vmatprep.subr.bf16.mxu0 %v6806_v16  ;;  %3858 = vmatprep.subr.bf16.mxu1 %v6808_v17  ;;  %v6823_v16 = vcombine.low %v2152_v49, %v2156_v27  ;;  %v2172_v38 = vld [vmem:[#allocation7 + $0x628] sm:$0xff] }
 0x1d8   : > { %v1557_v51 = vadd.f32 %v1556_v56, %v1443_v50  ;;  %3563 = vmatprep.mubr.bf16.mxu0 %v8755_v13  ;;  %3789 = vmatprep.mubr.bf16.mxu1 %v8755_v13  ;;  %v6831_v50 = vcombine.low %v2160_v47, %v2164_v6 }
 0x1d9   : > { %v1837_v55 = vpack.c.bf16 %v1555_v46, %v1551_v22  ;;  %3564 = vmatmul.mubr.bf16.gmra.mrb[40].mxu0 %v8758_v45  ;;  %3790 = vmatmul.mubr.bf16.gmra.mrb[72].mxu1 %v8758_v45  ;;  %v6829_v46 = vcombine.low %v2159_v35, %v2163_v39 }
 0x1da   : > { %v1838_v31 = vpack.c.bf16 %v1557_v51, %v1553_v23  ;;  %3633 = vmatpush1.bf16.msra.mxu0 %v6805_v29  ;;  %3859 = vmatpush1.bf16.msra.mxu1 %v6807_v30  ;;  %v2171_v30 = vld [vmem:[#allocation7 + $0x620] sm:$0xff]  ;;  %v2168_v23 = vld [vmem:[#allocation7 + $0x608] sm:$0xff] }
 0x1db   : > { %v1923_v0 = vadd.bf16 %v8694_v53, %v1837_v55  ;;  %3634 = vmatprep.subr.bf16.mxu0 %v6814_v42  ;;  %3860 = vmatprep.subr.bf16.mxu1 %v6816_v57  ;;  %v1447_v1 = vpop.f32.mrb[16].mxu1  ;;  %v6838_v57 = vcombine.high %v2167_v26, %v2171_v30  ;;  %v6840_v24 = vcombine.high %v2168_v23, %v2172_v38  ;;  %v2175_v51 = vld [vmem:[#allocation7 + $0x640] sm:$0xff] }
 0x1dc   : > { %v1924_v32 = vadd.bf16 %v8697_v20, %v1838_v31  ;;  %v1560_v7 = vpop.f32.mrb[16].mxu0  ;;  %v1449_v59 = vpop.f32.mrb[17].mxu1  ;;  %v2176_v31 = vld [vmem:[#allocation7 + $0x648] sm:$0xff]  ;;  %v6839_v35 = vcombine.low %v2168_v23, %v2172_v38  ;;  %v6846_v47 = vcombine.high %v2175_v51, %v2179_v52  ;;  %v2191_v23 = vld [vmem:[#allocation7 + $0x6c0] sm:$0xff] }
 0x1dd   : > { %v1561_v36 = vadd.f32 %v1560_v7, %v1447_v1  ;;  %v1562_v10 = vpop.f32.mrb[17].mxu0  ;;  %v1451_v18 = vpop.f32.mrb[18].mxu1  ;;  %v8770_v60 = vmax.bf16 %v9748_v8, %v1923_v0  ;;  %v2195_v38 = vld [vmem:[#allocation7 + $0x6e0] sm:$0xff] }
 0x1de   : > { %v8767_v17 = vmax.bf16 %v9748_v8, %v1924_v32  ;;  %v1563_v11 = vadd.f32 %v1562_v10, %v1449_v59  ;;  %v1564_v15 = vpop.f32.mrb[18].mxu0  ;;  %3635 = vmatpush1.bf16.msra.mxu0 %v6813_v58  ;;  %3861 = vmatpush1.bf16.msra.mxu1 %v6815_v61  ;;  %v1453_v21 = vpop.f32.mrb[19].mxu1  ;;  %v2180_v58 = vld [vmem:[#allocation7 + $0x668] sm:$0xff] }
 0x1df   : > { %v1565_v2 = vadd.f32 %v1564_v15, %v1451_v18  ;;  %v1566_v22 = vpop.f32.mrb[19].mxu0  ;;  %3636 = vmatprep.subr.bf16.mxu0 %v6822_v28  ;;  %3862 = vmatprep.subr.bf16.mxu1 %v6824_v3  ;;  %v6837_v3 = vcombine.low %v2167_v26, %v2171_v30  ;;  %v2187_v18 = vld [vmem:[#allocation7 + $0x6a0] sm:$0xff]  ;;  %v2184_v15 = vld [vmem:[#allocation7 + $0x688] sm:$0xff] }
 0x1e0   : > { %v1567_v29 = vadd.f32 %v1566_v22, %v1453_v21  ;;  %3573 = vmatprep.mubr.bf16.mxu0 %v8767_v17  ;;  %3799 = vmatprep.mubr.bf16.mxu1 %v8767_v17  ;;  %v6845_v22 = vcombine.low %v2175_v51, %v2179_v52 }
 0x1e1   : > { %v1841_v41 = vpack.c.bf16 %v1565_v2, %v1561_v36  ;;  %3574 = vmatmul.mubr.bf16.gmra.mrb[44].mxu0 %v8770_v60  ;;  %3800 = vmatmul.mubr.bf16.gmra.mrb[76].mxu1 %v8770_v60 }
 0x1e2   : > { %v1842_v42 = vpack.c.bf16 %v1567_v29, %v1563_v11  ;;  %3637 = vmatpush1.bf16.msra.mxu0 %v6821_v63  ;;  %3863 = vmatpush1.bf16.msra.mxu1 %v6823_v16  ;;  %v6848_v63 = vcombine.high %v2176_v31, %v2180_v58  ;;  %v2183_v16 = vld [vmem:[#allocation7 + $0x680] sm:$0xff] }
 0x1e3   : > { %v1927_v56 = vadd.bf16 %v8694_v53, %v1841_v41  ;;  %3638 = vmatprep.subr.bf16.mxu0 %v6830_v12  ;;  %3864 = vmatprep.subr.bf16.mxu1 %v6832_v25  ;;  %v1457_v27 = vpop.f32.mrb[20].mxu1  ;;  %v2188_v12 = vld [vmem:[#allocation7 + $0x6a8] sm:$0xff]  ;;  %v6847_v25 = vcombine.low %v2176_v31, %v2180_v58  ;;  %v6854_v29 = vcombine.high %v2183_v16, %v2187_v18 }
 0x1e4   : > { %v1928_v49 = vadd.bf16 %v8697_v20, %v1842_v42  ;;  %v1570_v55 = vpop.f32.mrb[20].mxu0  ;;  %v1459_v0 = vpop.f32.mrb[21].mxu1  ;;  %v6856_v30 = vcombine.high %v2184_v15, %v2188_v12  ;;  %v6855_v51 = vcombine.low %v2184_v15, %v2188_v12 }
 0x1e5   : > { %v1571_v61 = vadd.f32 %v1570_v55, %v1457_v27  ;;  %v1572_v28 = vpop.f32.mrb[21].mxu0  ;;  %v1461_v1 = vpop.f32.mrb[22].mxu1  ;;  %v8782_v6 = vmax.bf16 %v9748_v8, %v1927_v56  ;;  %v2196_v56 = vld [vmem:[#allocation7 + $0x6e8] sm:$0xff]  ;;  %v6853_v27 = vcombine.low %v2183_v16, %v2187_v18  ;;  %v6861_v16 = vcombine.low %v2191_v23, %v2195_v38 }
 0x1e6   : > { %v8779_v39 = vmax.bf16 %v9748_v8, %v1928_v49  ;;  %v1573_v32 = vadd.f32 %v1572_v28, %v1459_v0  ;;  %v1574_v7 = vpop.f32.mrb[22].mxu0  ;;  %3639 = vmatpush1.bf16.msra.mxu0 %v6829_v46  ;;  %3865 = vmatpush1.bf16.msra.mxu1 %v6831_v50  ;;  %v1463_v59 = vpop.f32.mrb[23].mxu1  ;;  %v2192_v50 = vld [vmem:[#allocation7 + $0x6c8] sm:$0xff] }
 0x1e7   : > { %v1575_v36 = vadd.f32 %v1574_v7, %v1461_v1  ;;  %v1576_v10 = vpop.f32.mrb[23].mxu0  ;;  %3640 = vmatprep.subr.bf16.mxu0 %v6838_v57  ;;  %3866 = vmatprep.subr.bf16.mxu1 %v6840_v24  ;;  %v2199_v1 = vld [vmem:[#allocation7 + $0x700] sm:$0xff] }
 0x1e8   : > { %v1577_v11 = vadd.f32 %v1576_v10, %v1463_v59  ;;  %3583 = vmatprep.mubr.bf16.mxu0 %v8779_v39  ;;  %3809 = vmatprep.mubr.bf16.mxu1 %v8779_v39  ;;  %v2204_v59 = vld [vmem:[#allocation7 + $0x728] sm:$0xff] }
 0x1e9   : > { %v1845_v2 = vpack.c.bf16 %v1575_v36, %v1571_v61  ;;  %3584 = vmatmul.mubr.bf16.gmra.mrb[48].mxu0 %v8782_v6  ;;  %3810 = vmatmul.mubr.bf16.gmra.mrb[80].mxu1 %v8782_v6  ;;  %v6862_v61 = vcombine.high %v2191_v23, %v2195_v38  ;;  %v2200_v36 = vld [vmem:[#allocation7 + $0x708] sm:$0xff] }
 0x1ea   : > { %v1846_v21 = vpack.c.bf16 %v1577_v11, %v1573_v32  ;;  %3641 = vmatpush1.bf16.msra.mxu0 %v6837_v3  ;;  %3867 = vmatpush1.bf16.msra.mxu1 %v6839_v35  ;;  %v6864_v32 = vcombine.high %v2192_v50, %v2196_v56  ;;  %v6863_v11 = vcombine.low %v2192_v50, %v2196_v56 }
 0x1eb   : > { %v1931_v26 = vadd.bf16 %v8694_v53, %v1845_v2  ;;  %3642 = vmatprep.subr.bf16.mxu0 %v6846_v47  ;;  %3868 = vmatprep.subr.bf16.mxu1 %v6848_v63  ;;  %v1467_v42 = vpop.f32.mrb[24].mxu1  ;;  %v2203_v47 = vld [vmem:[#allocation7 + $0x720] sm:$0xff]  ;;  %v6872_v12 = vcombine.high %v2200_v36, %v2204_v59  ;;  %v6871_v23 = vcombine.low %v2200_v36, %v2204_v59 }
 0x1ec   : > { %v1932_v41 = vadd.bf16 %v8697_v20, %v1846_v21  ;;  %v1580_v46 = vpop.f32.mrb[24].mxu0  ;;  %v1469_v24 = vpop.f32.mrb[25].mxu1  ;;  %v6870_v15 = vcombine.high %v2199_v1, %v2203_v47  ;;  %v2207_v2 = vld [vmem:[#allocation7 + $0x740] sm:$0xff] }
 0x1ed   : > { %v1581_v57 = vadd.f32 %v1580_v46, %v1467_v42  ;;  %v1582_v49 = vpop.f32.mrb[25].mxu0  ;;  %v1471_v31 = vpop.f32.mrb[26].mxu1  ;;  %v8794_v0 = vmax.bf16 %v9748_v8, %v1931_v26  ;;  %v2211_v21 = vld [vmem:[#allocation7 + $0x760] sm:$0xff] }
 0x1ee   : > { %v8791_v52 = vmax.bf16 %v9748_v8, %v1932_v41  ;;  %v1583_v55 = vadd.f32 %v1582_v49, %v1469_v24  ;;  %v1584_v58 = vpop.f32.mrb[26].mxu0  ;;  %3643 = vmatpush1.bf16.msra.mxu0 %v6845_v22  ;;  %3869 = vmatpush1.bf16.msra.mxu1 %v6847_v25  ;;  %v1473_v3 = vpop.f32.mrb[27].mxu1  ;;  %v6878_v49 = vcombine.high %v2207_v2, %v2211_v21 }
 0x1ef   : > { %v1585_v28 = vadd.f32 %v1584_v58, %v1471_v31  ;;  %v1586_v35 = vpop.f32.mrb[27].mxu0  ;;  %3644 = vmatprep.subr.bf16.mxu0 %v6854_v29  ;;  %3870 = vmatprep.subr.bf16.mxu1 %v6856_v30  ;;  %v2208_v29 = vld [vmem:[#allocation7 + $0x748] sm:$0xff] }
 0x1f0   : > { %v1587_v7 = vadd.f32 %v1586_v35, %v1473_v3  ;;  %3593 = vmatprep.mubr.bf16.mxu0 %v8791_v52  ;;  %3819 = vmatprep.mubr.bf16.mxu1 %v8791_v52  ;;  %v2212_v30 = vld [vmem:[#allocation7 + $0x768] sm:$0xff]  ;;  %v2219_v3 = vld [vmem:[#allocation7 + $0x7a0] sm:$0xff] }
 0x1f1   : > { %v1849_v10 = vpack.c.bf16 %v1585_v28, %v1581_v57  ;;  %3594 = vmatmul.mubr.bf16.gmra.mrb[52].mxu0 %v8794_v0  ;;  %3820 = vmatmul.mubr.bf16.gmra.mrb[84].mxu1 %v8794_v0  ;;  %v6869_v57 = vcombine.low %v2199_v1, %v2203_v47  ;;  %v6880_v58 = vcombine.high %v2208_v29, %v2212_v30  ;;  %v2216_v35 = vld [vmem:[#allocation7 + $0x788] sm:$0xff] }
 0x1f2   : > { %v1850_v63 = vpack.c.bf16 %v1587_v7, %v1583_v55  ;;  %3645 = vmatpush1.bf16.msra.mxu0 %v6853_v27  ;;  %3871 = vmatpush1.bf16.msra.mxu1 %v6855_v51  ;;  %v6877_v47 = vcombine.low %v2207_v2, %v2211_v21  ;;  %v6879_v36 = vcombine.low %v2208_v29, %v2212_v30 }
 0x1f3   : > { %v1935_v18 = vadd.bf16 %v8694_v53, %v1849_v10  ;;  %3646 = vmatprep.subr.bf16.mxu0 %v6862_v61  ;;  %3872 = vmatprep.subr.bf16.mxu1 %v6864_v32  ;;  %v1477_v25 = vpop.f32.mrb[28].mxu1  ;;  %v2215_v61 = vld [vmem:[#allocation7 + $0x780] sm:$0xff]  ;;  %v2220_v32 = vld [vmem:[#allocation7 + $0x7a8] sm:$0xff]  ;;  %v6650_v30 = vcombine.high %v8707_v4, %v8709_v43 }
 0x1f4   : > { %v1936_v22 = vadd.bf16 %v8697_v20, %v1850_v63  ;;  %v1590_v26 = vpop.f32.mrb[28].mxu0  ;;  %v1479_v42 = vpop.f32.mrb[29].mxu1  ;;  %v6886_v10 = vcombine.high %v2215_v61, %v2219_v3  ;;  %v6888_v63 = vcombine.high %v2216_v35, %v2220_v32  ;;  %v6887_v2 = vcombine.low %v2216_v35, %v2220_v32  ;;  %v1990_v35 = vld [vmem:[#allocation7 + $0x78] sm:$0xff] }
 0x1f5   : > { %v1591_v41 = vadd.f32 %v1590_v26, %v1477_v25  ;;  %v1592_v46 = vpop.f32.mrb[29].mxu0  ;;  %v1481_v56 = vpop.f32.mrb[30].mxu1  ;;  %v8806_v27 = vmax.bf16 %v9748_v8, %v1935_v18  ;;  %v2227_v18 = vld [vmem:[#allocation7 + $0x7e0] sm:$0xff]  ;;  %v6885_v25 = vcombine.low %v2215_v61, %v2219_v3  ;;  %v1986_v3 = vld [vmem:[#allocation7 + $0x58] sm:$0xff] }
 0x1f6   : > { %v8803_v38 = vmax.bf16 %v9748_v8, %v1936_v22  ;;  %v1593_v50 = vadd.f32 %v1592_v46, %v1479_v42  ;;  %v1594_v24 = vpop.f32.mrb[30].mxu0  ;;  %3647 = vmatpush1.bf16.msra.mxu0 %v6861_v16  ;;  %3873 = vmatpush1.bf16.msra.mxu1 %v6863_v11  ;;  %v1483_v55 = vpop.f32.mrb[31].mxu1  ;;  %v2223_v16 = vld [vmem:[#allocation7 + $0x7c0] sm:$0xff]  ;;  %v1881_v42 = vcombine.high %v8682_v19, %v8682_v19  ;;  %v1985_v19 = vld [vmem:[#allocation7 + $0x50] sm:$0xff] }
 0x1f7   : > { %v1595_v51 = vadd.f32 %v1594_v24, %v1481_v56  ;;  %v1596_v31 = vpop.f32.mrb[31].mxu0  ;;  %3648 = vmatprep.subr.bf16.mxu0 %v6870_v15  ;;  %3874 = vmatprep.subr.bf16.mxu1 %v6872_v12  ;;  %v2224_v15 = vld [vmem:[#allocation7 + $0x7c8] sm:$0xff]  ;;  %v1882_v46 = vcombine.high %v8685_v34, %v8685_v34  ;;  %v1989_v34 = vld [vmem:[#allocation7 + $0x70] sm:$0xff] }
 0x1f8   : > { %v1597_v28 = vadd.f32 %v1596_v31, %v1483_v55  ;;  %3603 = vmatprep.mubr.bf16.mxu0 %v8803_v38  ;;  %3829 = vmatprep.mubr.bf16.mxu1 %v8803_v38  ;;  %v2228_v12 = vld [vmem:[#allocation7 + $0x7e8] sm:$0xff] }
 0x1f9   : > { %v1853_v1 = vpack.c.bf16 %v1595_v51, %v1591_v41  ;;  %3604 = vmatmul.mubr.bf16.gmra.mrb[56].mxu0 %v8806_v27  ;;  %3830 = vmatmul.mubr.bf16.gmra.mrb[88].mxu1 %v8806_v27  ;;  %v6896_v26 = vcombine.high %v2224_v15, %v2228_v12  ;;  %v6895_v29 = vcombine.low %v2224_v15, %v2228_v12 }
 0x1fa   : > { %v1854_v7 = vpack.c.bf16 %v1597_v28, %v1593_v50  ;;  %3649 = vmatpush1.bf16.msra.mxu0 %v6869_v57  ;;  %3875 = vmatpush1.bf16.msra.mxu1 %v6871_v23  ;;  %v6652_v41 = vcombine.high %v8711_v5, %v8715_v40  ;;  %v1898_v57 = vpack.i.b16 %v1881_v42, %v1881_v42  ;;  %v2005_v42 = vld [vmem:[#allocation7 + $0xf0] sm:$0xff] }
 0x1fb   : > { %v1939_v59 = vadd.bf16 %v8694_v53, %v1853_v1  ;;  %3650 = vmatprep.subr.bf16.mxu0 %v6878_v49  ;;  %3876 = vmatprep.subr.bf16.mxu1 %v6880_v58  ;;  %v6894_v53 = vcombine.high %v2223_v16, %v2227_v18  ;;  %v1905_v23 = vpack.i.b16 %v1882_v46, %v1882_v46  ;;  %v2002_v46 = vld [vmem:[#allocation7 + $0xd8] sm:$0xff] }
 0x1fc   : > { %v1940_v11 = vadd.bf16 %v8697_v20, %v1854_v7  ;;  %v6893_v20 = vcombine.low %v2223_v16, %v2227_v18  ;;  %v8833_v24 = vrot.slane %v1898_v57, %v8689_v37  ;;  %v1997_v16 = vld [vmem:[#allocation7 + $0xb0] sm:$0xff]  ;;  %v1998_v18 = vld [vmem:[#allocation7 + $0xb8] sm:$0xff] }
 0x1fd   : > { %v8818_v21 = vmax.bf16 %v9748_v8, %v1939_v59  ;;  %v8836_v51 = vrot.slane %v1905_v23, %v8689_v37  ;;  %v6660_v59 = vcombine.high %v1986_v3, %v1990_v35  ;;  %v2006_v57 = vld [vmem:[#allocation7 + $0xf8] sm:$0xff] }
 0x1fe   : > { %v8815_v22 = vmax.bf16 %v9748_v8, %v1940_v11  ;;  %3651 = vmatpush1.bf16.msra.mxu0 %v6877_v47  ;;  %3877 = vmatpush1.bf16.msra.mxu1 %v6879_v36  ;;  %v6658_v36 = vcombine.high %v1985_v19, %v1989_v34  ;;  %v1994_v11 = vld [vmem:[#allocation7 + $0x98] sm:$0xff] }
 0x1ff   : > { %3652 = vmatprep.subr.bf16.mxu0 %v6886_v10  ;;  %3878 = vmatprep.subr.bf16.mxu1 %v6888_v63  ;;  %v1993_v10 = vld [vmem:[#allocation7 + $0x90] sm:$0xff]  ;;  %v6667_v40 = vcombine.low %v1994_v11, %v1998_v18 }
 0x200   : > { %3613 = vmatprep.mubr.bf16.mxu0 %v8815_v22  ;;  %3839 = vmatprep.mubr.bf16.mxu1 %v8815_v22  ;;  %v6665_v5 = vcombine.low %v1993_v10, %v1997_v16 }
 0x201   : > { %3614 = vmatmul.mubr.bf16.gmra.mrb[60].mxu0 %v8818_v21  ;;  %3840 = vmatmul.mubr.bf16.gmra.mrb[92].mxu1 %v8818_v21 }
 0x202   : > { %3653 = vmatpush1.bf16.msra.mxu0 %v6885_v25  ;;  %3879 = vmatpush1.bf16.msra.mxu1 %v6887_v2  ;;  %v6657_v2 = vcombine.low %v1985_v19, %v1989_v34 }
 0x203   : > { %3654 = vmatprep.subr.bf16.mxu0 %v6894_v53  ;;  %3880 = vmatprep.subr.bf16.mxu1 %v6896_v26  ;;  %v6659_v53 = vcombine.low %v1986_v3, %v1990_v35  ;;  %v6675_v3 = vcombine.low %v2002_v46, %v2006_v57 }
 0x206   : > { %3655 = vmatpush1.bf16.msra.mxu0 %v6893_v20  ;;  %3881 = vmatpush1.bf16.msra.mxu1 %v6895_v29  ;;  %v6666_v20 = vcombine.high %v1993_v10, %v1997_v16  ;;  %v6668_v29 = vcombine.high %v1994_v11, %v1998_v18  ;;  %v2021_v10 = vld [vmem:[#allocation7 + $0x170] sm:$0xff]  ;;  %v2022_v16 = vld [vmem:[#allocation7 + $0x178] sm:$0xff] }
 0x207   : > { %3963 = vmatprep.subr.bf16.mxu0 %v6650_v30  ;;  %4189 = vmatprep.subr.bf16.mxu1 %v6652_v41  ;;  %v2001_v30 = vld [vmem:[#allocation7 + $0xd0] sm:$0xff] }
 0x208   : > { %v6674_v23 = vcombine.high %v2001_v30, %v2005_v42  ;;  %v6673_v34 = vcombine.low %v2001_v30, %v2005_v42  ;;  %v2029_v30 = vld [vmem:[#allocation7 + $0x1b0] sm:$0xff]  ;;  %v2030_v42 = vld [vmem:[#allocation7 + $0x1b8] sm:$0xff] }
 0x23b   : > { %v1746_v50 = vpop.f32.mrb[32].mxu1 }
 0x23c   : > { %v1748_v56 = vpop.f32.mrb[33].mxu1 }
 0x23d   : > { %v1750_v49 = vpop.f32.mrb[34].mxu1 }
 0x23e   : > { %v1827_v55 = vpack.c.bf16 %v1750_v49, %v1746_v50  ;;  %v1752_v31 = vpop.f32.mrb[35].mxu1  ;;  %v6676_v50 = vcombine.high %v2002_v46, %v2006_v57 }
 0x23f   : > { %v1828_v58 = vpack.c.bf16 %v1752_v31, %v1748_v56  ;;  %v2009_v56 = vld [vmem:[#allocation7 + $0x110] sm:$0xff]  ;;  %v2010_v31 = vld [vmem:[#allocation7 + $0x118] sm:$0xff] }
 0x240   : > { %v1913_v61 = vadd.bf16 %v8833_v24, %v1827_v55  ;;  %v2013_v55 = vld [vmem:[#allocation7 + $0x130] sm:$0xff] }
 0x241   : > { %v1914_v28 = vadd.bf16 %v8836_v51, %v1828_v58  ;;  %v2014_v58 = vld [vmem:[#allocation7 + $0x138] sm:$0xff] }
 0x242   : > { %v8844_v7 = vmax.bf16 %v9748_v8, %v1913_v61 }
 0x243   : > { %v8841_v32 = vmax.bf16 %v9748_v8, %v1914_v28  ;;  %v1756_v1 = vpop.f32.mrb[36].mxu1 }
 0x244   : > { %v1758_v47 = vpop.f32.mrb[37].mxu1 }
 0x245   : > { %v1760_v63 = vpop.f32.mrb[38].mxu1  ;;  %3656 = vmatprep.mubr.bf16.mxu0 %v8841_v32  ;;  %3882 = vmatprep.mubr.bf16.mxu1 %v8841_v32 }
 0x246   : > { %v1831_v15 = vpack.c.bf16 %v1760_v63, %v1756_v1  ;;  %v1762_v12 = vpop.f32.mrb[39].mxu1  ;;  %3657 = vmatmul.mubr.bf16.vlgmr.msra.gmra.mrb[32].mxu0 %v8844_v7  ;;  %3883 = vmatmul.mubr.bf16.vlgmr.msra.gmra.mrb[64].mxu1 %v8844_v7  ;;  %v6682_v1 = vcombine.high %v2009_v56, %v2013_v55  ;;  %v2018_v63 = vld [vmem:[#allocation7 + $0x158] sm:$0xff] }
 0x247   : > { %v1832_v25 = vpack.c.bf16 %v1762_v12, %v1758_v47  ;;  %3964 = vmatpush1.bf16.msra.mxu0 %v6649_v14  ;;  %4190 = vmatpush1.bf16.msra.mxu1 %v6651_v44  ;;  %v6684_v47 = vcombine.high %v2010_v31, %v2014_v58  ;;  %v6683_v12 = vcombine.low %v2010_v31, %v2014_v58  ;;  %v2034_v31 = vld [vmem:[#allocation7 + $0x1d8] sm:$0xff] }
 0x248   : > { %v1917_v26 = vadd.bf16 %v8833_v24, %v1831_v15  ;;  %3965 = vmatprep.subr.bf16.mxu0 %v6658_v36  ;;  %4191 = vmatprep.subr.bf16.mxu1 %v6660_v59  ;;  %v2017_v36 = vld [vmem:[#allocation7 + $0x150] sm:$0xff]  ;;  %v6681_v15 = vcombine.low %v2009_v56, %v2013_v55  ;;  %v2038_v58 = vld [vmem:[#allocation7 + $0x1f8] sm:$0xff] }
 0x249   : > { %v1918_v41 = vadd.bf16 %v8836_v51, %v1832_v25  ;;  %v2033_v56 = vld [vmem:[#allocation7 + $0x1d0] sm:$0xff] }
 0x24a   : > { %v8862_v14 = vmax.bf16 %v9748_v8, %v1917_v26  ;;  %v6692_v26 = vcombine.high %v2018_v63, %v2022_v16  ;;  %v2037_v55 = vld [vmem:[#allocation7 + $0x1f0] sm:$0xff] }
 0x24b   : > { %v8859_v4 = vmax.bf16 %v9748_v8, %v1918_v41  ;;  %v1766_v43 = vpop.f32.mrb[40].mxu1  ;;  %3966 = vmatpush1.bf16.msra.mxu0 %v6657_v2  ;;  %4192 = vmatpush1.bf16.msra.mxu1 %v6659_v53  ;;  %v6690_v53 = vcombine.high %v2017_v36, %v2021_v10  ;;  %v2026_v41 = vld [vmem:[#allocation7 + $0x198] sm:$0xff] }
 0x24c   : > { %v1768_v44 = vpop.f32.mrb[41].mxu1  ;;  %3967 = vmatprep.subr.bf16.mxu0 %v6666_v20  ;;  %4193 = vmatprep.subr.bf16.mxu1 %v6668_v29  ;;  %v2025_v20 = vld [vmem:[#allocation7 + $0x190] sm:$0xff] }
 0x24d   : > { %v1770_v49 = vpop.f32.mrb[42].mxu1  ;;  %3666 = vmatprep.mubr.bf16.mxu0 %v8859_v4  ;;  %3892 = vmatprep.mubr.bf16.mxu1 %v8859_v4 }
 0x24e   : > { %v1835_v61 = vpack.c.bf16 %v1770_v49, %v1766_v43  ;;  %v1772_v19 = vpop.f32.mrb[43].mxu1  ;;  %3667 = vmatmul.mubr.bf16.gmra.mrb[36].mxu0 %v8862_v14  ;;  %3893 = vmatmul.mubr.bf16.gmra.mrb[68].mxu1 %v8862_v14 }
 0x24f   : > { %v1836_v28 = vpack.c.bf16 %v1772_v19, %v1768_v44  ;;  %3968 = vmatpush1.bf16.msra.mxu0 %v6665_v5  ;;  %4194 = vmatpush1.bf16.msra.mxu1 %v6667_v40  ;;  %v6689_v5 = vcombine.low %v2017_v36, %v2021_v10  ;;  %v6691_v40 = vcombine.low %v2018_v63, %v2022_v16  ;;  %v2041_v36 = vld [vmem:[#allocation7 + $0x210] sm:$0xff]  ;;  %v2042_v63 = vld [vmem:[#allocation7 + $0x218] sm:$0xff] }
 0x250   : > { %v1921_v35 = vadd.bf16 %v8833_v24, %v1835_v61  ;;  %3969 = vmatprep.subr.bf16.mxu0 %v6674_v23  ;;  %4195 = vmatprep.subr.bf16.mxu1 %v6676_v50  ;;  %v6698_v23 = vcombine.high %v2025_v20, %v2029_v30  ;;  %v6700_v50 = vcombine.high %v2026_v41, %v2030_v42  ;;  %v2045_v10 = vld [vmem:[#allocation7 + $0x230] sm:$0xff]  ;;  %v2046_v16 = vld [vmem:[#allocation7 + $0x238] sm:$0xff] }
 0x251   : > { %v1922_v59 = vadd.bf16 %v8836_v51, %v1836_v28  ;;  %v6697_v28 = vcombine.low %v2025_v20, %v2029_v30  ;;  %v6714_v20 = vcombine.high %v2041_v36, %v2045_v10  ;;  %v2049_v30 = vld [vmem:[#allocation7 + $0x250] sm:$0xff] }
 0x252   : > { %v8874_v25 = vmax.bf16 %v9748_v8, %v1921_v35 }
 0x253   : > { %v8871_v11 = vmax.bf16 %v9748_v8, %v1922_v59  ;;  %v1776_v18 = vpop.f32.mrb[44].mxu1  ;;  %3970 = vmatpush1.bf16.msra.mxu0 %v6673_v34  ;;  %4196 = vmatpush1.bf16.msra.mxu1 %v6675_v3  ;;  %v6699_v34 = vcombine.low %v2026_v41, %v2030_v42  ;;  %v2053_v42 = vld [vmem:[#allocation7 + $0x270] sm:$0xff] }
 0x254   : > { %v1778_v2 = vpop.f32.mrb[45].mxu1  ;;  %3971 = vmatprep.subr.bf16.mxu0 %v6682_v1  ;;  %4197 = vmatprep.subr.bf16.mxu1 %v6684_v47  ;;  %v6706_v1 = vcombine.high %v2033_v56, %v2037_v55  ;;  %v6708_v47 = vcombine.high %v2034_v31, %v2038_v58 }
 0x255   : > { %v1780_v29 = vpop.f32.mrb[46].mxu1  ;;  %3676 = vmatprep.mubr.bf16.mxu0 %v8871_v11  ;;  %3902 = vmatprep.mubr.bf16.mxu1 %v8871_v11 }
 0x256   : > { %v1839_v46 = vpack.c.bf16 %v1780_v29, %v1776_v18  ;;  %v1782_v57 = vpop.f32.mrb[47].mxu1  ;;  %3677 = vmatmul.mubr.bf16.gmra.mrb[40].mxu0 %v8874_v25  ;;  %3903 = vmatmul.mubr.bf16.gmra.mrb[72].mxu1 %v8874_v25  ;;  %v6716_v29 = vcombine.high %v2042_v63, %v2046_v16 }
 0x257   : > { %v1840_v43 = vpack.c.bf16 %v1782_v57, %v1778_v2  ;;  %3972 = vmatpush1.bf16.msra.mxu0 %v6681_v15  ;;  %4198 = vmatpush1.bf16.msra.mxu1 %v6683_v12  ;;  %v6705_v2 = vcombine.low %v2033_v56, %v2037_v55  ;;  %v2054_v57 = vld [vmem:[#allocation7 + $0x278] sm:$0xff]  ;;  %v6722_v56 = vcombine.high %v2049_v30, %v2053_v42  ;;  %v2057_v55 = vld [vmem:[#allocation7 + $0x290] sm:$0xff] }
 0x258   : > { %v1925_v44 = vadd.bf16 %v8833_v24, %v1839_v46  ;;  %3973 = vmatprep.subr.bf16.mxu0 %v6690_v53  ;;  %4199 = vmatprep.subr.bf16.mxu1 %v6692_v26  ;;  %v6707_v53 = vcombine.low %v2034_v31, %v2038_v58  ;;  %v2050_v46 = vld [vmem:[#allocation7 + $0x258] sm:$0xff]  ;;  %v2061_v58 = vld [vmem:[#allocation7 + $0x2b0] sm:$0xff] }
 0x259   : > { %v1926_v49 = vadd.bf16 %v8836_v51, %v1840_v43 }
 0x25a   : > { %v8886_v3 = vmax.bf16 %v9748_v8, %v1925_v44  ;;  %v6715_v44 = vcombine.low %v2042_v63, %v2046_v16  ;;  %v2065_v16 = vld [vmem:[#allocation7 + $0x2d0] sm:$0xff] }
 0x25b   : > { %v8883_v61 = vmax.bf16 %v9748_v8, %v1926_v49  ;;  %v1786_v19 = vpop.f32.mrb[48].mxu1  ;;  %3974 = vmatpush1.bf16.msra.mxu0 %v6689_v5  ;;  %4200 = vmatpush1.bf16.msra.mxu1 %v6691_v40  ;;  %v6713_v40 = vcombine.low %v2041_v36, %v2045_v10  ;;  %v6724_v49 = vcombine.high %v2050_v46, %v2054_v57 }
 0x25c   : > { %v1788_v35 = vpop.f32.mrb[49].mxu1  ;;  %3975 = vmatprep.subr.bf16.mxu0 %v6698_v23  ;;  %4201 = vmatprep.subr.bf16.mxu1 %v6700_v50  ;;  %v6723_v36 = vcombine.low %v2050_v46, %v2054_v57  ;;  %v6730_v10 = vcombine.high %v2057_v55, %v2061_v58  ;;  %v2073_v57 = vld [vmem:[#allocation7 + $0x310] sm:$0xff] }
 0x25d   : > { %v1790_v59 = vpop.f32.mrb[50].mxu1  ;;  %3686 = vmatprep.mubr.bf16.mxu0 %v8883_v61  ;;  %3912 = vmatprep.mubr.bf16.mxu1 %v8883_v61 }
 0x25e   : > { %v1843_v18 = vpack.c.bf16 %v1790_v59, %v1786_v19  ;;  %v1792_v15 = vpop.f32.mrb[51].mxu1  ;;  %3687 = vmatmul.mubr.bf16.gmra.mrb[44].mxu0 %v8886_v3  ;;  %3913 = vmatmul.mubr.bf16.gmra.mrb[76].mxu1 %v8886_v3  ;;  %v2058_v19 = vld [vmem:[#allocation7 + $0x298] sm:$0xff] }
 0x25f   : > { %v1844_v12 = vpack.c.bf16 %v1792_v15, %v1788_v35  ;;  %3976 = vmatpush1.bf16.msra.mxu0 %v6697_v28  ;;  %4202 = vmatpush1.bf16.msra.mxu1 %v6699_v34  ;;  %v2062_v28 = vld [vmem:[#allocation7 + $0x2b8] sm:$0xff]  ;;  %v2069_v15 = vld [vmem:[#allocation7 + $0x2f0] sm:$0xff] }
 0x260   : > { %v1929_v26 = vadd.bf16 %v8833_v24, %v1843_v18  ;;  %3977 = vmatprep.subr.bf16.mxu0 %v6706_v1  ;;  %4203 = vmatprep.subr.bf16.mxu1 %v6708_v47  ;;  %v6721_v47 = vcombine.low %v2049_v30, %v2053_v42  ;;  %v6732_v63 = vcombine.high %v2058_v19, %v2062_v28 }
 0x261   : > { %v1930_v41 = vadd.bf16 %v8836_v51, %v1844_v12  ;;  %v2066_v12 = vld [vmem:[#allocation7 + $0x2d8] sm:$0xff]  ;;  %v6738_v42 = vcombine.high %v2065_v16, %v2069_v15 }
 0x262   : > { %v8898_v23 = vmax.bf16 %v9748_v8, %v1929_v26 }
 0x263   : > { %v8895_v43 = vmax.bf16 %v9748_v8, %v1930_v41  ;;  %v1796_v5 = vpop.f32.mrb[52].mxu1  ;;  %3978 = vmatpush1.bf16.msra.mxu0 %v6705_v2  ;;  %4204 = vmatpush1.bf16.msra.mxu1 %v6707_v53  ;;  %v2070_v2 = vld [vmem:[#allocation7 + $0x2f8] sm:$0xff] }
 0x264   : > { %v1798_v50 = vpop.f32.mrb[53].mxu1  ;;  %3979 = vmatprep.subr.bf16.mxu0 %v6714_v20  ;;  %4205 = vmatprep.subr.bf16.mxu1 %v6716_v29  ;;  %v6729_v20 = vcombine.low %v2057_v55, %v2061_v58  ;;  %v6731_v29 = vcombine.low %v2058_v19, %v2062_v28  ;;  %v6740_v46 = vcombine.high %v2066_v12, %v2070_v2 }
 0x265   : > { %v1800_v31 = vpop.f32.mrb[54].mxu1  ;;  %3696 = vmatprep.mubr.bf16.mxu0 %v8895_v43  ;;  %3922 = vmatprep.mubr.bf16.mxu1 %v8895_v43  ;;  %v6739_v58 = vcombine.low %v2066_v12, %v2070_v2 }
 0x266   : > { %v1847_v34 = vpack.c.bf16 %v1800_v31, %v1796_v5  ;;  %v1802_v35 = vpop.f32.mrb[55].mxu1  ;;  %3697 = vmatmul.mubr.bf16.gmra.mrb[48].mxu0 %v8898_v23  ;;  %3923 = vmatmul.mubr.bf16.gmra.mrb[80].mxu1 %v8898_v23  ;;  %v6737_v31 = vcombine.low %v2065_v16, %v2069_v15 }
 0x267   : > { %v1848_v1 = vpack.c.bf16 %v1802_v35, %v1798_v50  ;;  %3980 = vmatpush1.bf16.msra.mxu0 %v6713_v40  ;;  %4206 = vmatpush1.bf16.msra.mxu1 %v6715_v44  ;;  %v2077_v40 = vld [vmem:[#allocation7 + $0x330] sm:$0xff]  ;;  %v2074_v44 = vld [vmem:[#allocation7 + $0x318] sm:$0xff] }
 0x268   : > { %v1933_v59 = vadd.bf16 %v8833_v24, %v1847_v34  ;;  %3981 = vmatprep.subr.bf16.mxu0 %v6722_v56  ;;  %4207 = vmatprep.subr.bf16.mxu1 %v6724_v49  ;;  %v2078_v50 = vld [vmem:[#allocation7 + $0x338] sm:$0xff]  ;;  %v6746_v28 = vcombine.high %v2073_v57, %v2077_v40  ;;  %v2081_v35 = vld [vmem:[#allocation7 + $0x350] sm:$0xff]  ;;  %v6745_v16 = vcombine.low %v2073_v57, %v2077_v40 }
 0x269   : > { %v1934_v18 = vadd.bf16 %v8836_v51, %v1848_v1  ;;  %v6748_v34 = vcombine.high %v2074_v44, %v2078_v50 }
 0x26a   : > { %v8910_v30 = vmax.bf16 %v9748_v8, %v1933_v59  ;;  %v2086_v59 = vld [vmem:[#allocation7 + $0x378] sm:$0xff] }
 0x26b   : > { %v8907_v53 = vmax.bf16 %v9748_v8, %v1934_v18  ;;  %v1806_v26 = vpop.f32.mrb[56].mxu1  ;;  %3982 = vmatpush1.bf16.msra.mxu0 %v6721_v47  ;;  %4208 = vmatpush1.bf16.msra.mxu1 %v6723_v36  ;;  %v2085_v47 = vld [vmem:[#allocation7 + $0x370] sm:$0xff]  ;;  %v2082_v36 = vld [vmem:[#allocation7 + $0x358] sm:$0xff]  ;;  %v6747_v18 = vcombine.low %v2074_v44, %v2078_v50 }
 0x26c   : > { %v1808_v41 = vpop.f32.mrb[57].mxu1  ;;  %3983 = vmatprep.subr.bf16.mxu0 %v6730_v10  ;;  %4209 = vmatprep.subr.bf16.mxu1 %v6732_v63  ;;  %v6754_v2 = vcombine.high %v2081_v35, %v2085_v47  ;;  %v6753_v44 = vcombine.low %v2081_v35, %v2085_v47  ;;  %v6755_v50 = vcombine.low %v2082_v36, %v2086_v59 }
 0x26d   : > { %v1810_v5 = vpop.f32.mrb[58].mxu1  ;;  %3706 = vmatprep.mubr.bf16.mxu0 %v8907_v53  ;;  %3932 = vmatprep.mubr.bf16.mxu1 %v8907_v53 }
 0x26e   : > { %v1851_v56 = vpack.c.bf16 %v1810_v5, %v1806_v26  ;;  %v1812_v49 = vpop.f32.mrb[59].mxu1  ;;  %3707 = vmatmul.mubr.bf16.gmra.mrb[52].mxu0 %v8910_v30  ;;  %3933 = vmatmul.mubr.bf16.gmra.mrb[84].mxu1 %v8910_v30  ;;  %v6756_v26 = vcombine.high %v2082_v36, %v2086_v59  ;;  %v2105_v36 = vld [vmem:[#allocation7 + $0x410] sm:$0xff] }
 0x26f   : > { %v1852_v55 = vpack.c.bf16 %v1812_v49, %v1808_v41  ;;  %3984 = vmatpush1.bf16.msra.mxu0 %v6729_v20  ;;  %4210 = vmatpush1.bf16.msra.mxu1 %v6731_v29  ;;  %v2089_v20 = vld [vmem:[#allocation7 + $0x390] sm:$0xff] }
 0x270   : > { %v1937_v19 = vadd.bf16 %v8833_v24, %v1851_v56  ;;  %3985 = vmatprep.subr.bf16.mxu0 %v6738_v42  ;;  %4211 = vmatprep.subr.bf16.mxu1 %v6740_v46  ;;  %v2093_v41 = vld [vmem:[#allocation7 + $0x3b0] sm:$0xff]  ;;  %v2090_v42 = vld [vmem:[#allocation7 + $0x398] sm:$0xff] }
 0x271   : > { %v1938_v1 = vadd.bf16 %v8836_v51, %v1852_v55  ;;  %v2094_v46 = vld [vmem:[#allocation7 + $0x3b8] sm:$0xff]  ;;  %v6762_v49 = vcombine.high %v2089_v20, %v2093_v41  ;;  %v2109_v59 = vld [vmem:[#allocation7 + $0x430] sm:$0xff] }
 0x272   : > { %v8922_v15 = vmax.bf16 %v9748_v8, %v1937_v19  ;;  %v6764_v55 = vcombine.high %v2090_v42, %v2094_v46  ;;  %v2101_v19 = vld [vmem:[#allocation7 + $0x3f0] sm:$0xff] }
 0x273   : > { %v8919_v10 = vmax.bf16 %v9748_v8, %v1938_v1  ;;  %v1816_v63 = vpop.f32.mrb[60].mxu1  ;;  %3986 = vmatpush1.bf16.msra.mxu0 %v6737_v31  ;;  %4212 = vmatpush1.bf16.msra.mxu1 %v6739_v58  ;;  %v2097_v58 = vld [vmem:[#allocation7 + $0x3d0] sm:$0xff] }
 0x274   : > { %v1818_v12 = vpop.f32.mrb[61].mxu1  ;;  %3987 = vmatprep.subr.bf16.mxu0 %v6746_v28  ;;  %4213 = vmatprep.subr.bf16.mxu1 %v6748_v34  ;;  %v2098_v28 = vld [vmem:[#allocation7 + $0x3d8] sm:$0xff] }
 0x275   : > { %v1820_v29 = vpop.f32.mrb[62].mxu1  ;;  %3716 = vmatprep.mubr.bf16.mxu0 %v8919_v10  ;;  %3942 = vmatprep.mubr.bf16.mxu1 %v8919_v10  ;;  %v2102_v34 = vld [vmem:[#allocation7 + $0x3f8] sm:$0xff] }
 0x276   : > { %v1855_v5 = vpack.c.bf16 %v1820_v29, %v1816_v63  ;;  %v1822_v57 = vpop.f32.mrb[63].mxu1  ;;  %3717 = vmatmul.mubr.bf16.gmra.mrb[56].mxu0 %v8922_v15  ;;  %3943 = vmatmul.mubr.bf16.gmra.mrb[88].mxu1 %v8922_v15  ;;  %v6761_v63 = vcombine.low %v2089_v20, %v2093_v41  ;;  %v6772_v47 = vcombine.high %v2098_v28, %v2102_v34  ;;  %v2113_v29 = vld [vmem:[#allocation7 + $0x450] sm:$0xff] }
 0x277   : > { %v1856_v40 = vpack.c.bf16 %v1822_v57, %v1818_v12  ;;  %3988 = vmatpush1.bf16.msra.mxu0 %v6745_v16  ;;  %4214 = vmatpush1.bf16.msra.mxu1 %v6747_v18  ;;  %v2106_v16 = vld [vmem:[#allocation7 + $0x418] sm:$0xff]  ;;  %v6769_v12 = vcombine.low %v2097_v58, %v2101_v19  ;;  %v2117_v41 = vld [vmem:[#allocation7 + $0x470] sm:$0xff] }
 0x278   : > { %v1941_v56 = vadd.bf16 %v8833_v24, %v1855_v5  ;;  %3989 = vmatprep.subr.bf16.mxu0 %v6754_v2  ;;  %4215 = vmatprep.subr.bf16.mxu1 %v6756_v26  ;;  %v6763_v24 = vcombine.low %v2090_v42, %v2094_v46  ;;  %v2110_v18 = vld [vmem:[#allocation7 + $0x438] sm:$0xff]  ;;  %v6771_v2 = vcombine.low %v2098_v28, %v2102_v34  ;;  %v2129_v28 = vld [vmem:[#allocation7 + $0x4d0] sm:$0xff] }
 0x279   : > { %v1942_v31 = vadd.bf16 %v8836_v51, %v1856_v40  ;;  %v6770_v51 = vcombine.high %v2097_v58, %v2101_v19  ;;  %v6778_v26 = vcombine.high %v2105_v36, %v2109_v59  ;;  %v6780_v20 = vcombine.high %v2106_v16, %v2110_v18  ;;  %v2114_v42 = vld [vmem:[#allocation7 + $0x458] sm:$0xff]  ;;  %v2133_v34 = vld [vmem:[#allocation7 + $0x4f0] sm:$0xff] }
 0x27a   : > { %v8934_v35 = vmax.bf16 %v9748_v8, %v1941_v56  ;;  %v2118_v46 = vld [vmem:[#allocation7 + $0x478] sm:$0xff]  ;;  %v6777_v5 = vcombine.low %v2105_v36, %v2109_v59  ;;  %v6779_v57 = vcombine.low %v2106_v16, %v2110_v18  ;;  %v6786_v40 = vcombine.high %v2113_v29, %v2117_v41  ;;  %v2137_v36 = vld [vmem:[#allocation7 + $0x510] sm:$0xff] }
 0x27b   : > { %v8931_v1 = vmax.bf16 %v9748_v8, %v1942_v31  ;;  %3990 = vmatpush1.bf16.msra.mxu0 %v6753_v44  ;;  %4216 = vmatpush1.bf16.msra.mxu1 %v6755_v50  ;;  %v6788_v44 = vcombine.high %v2114_v42, %v2118_v46  ;;  %v2125_v50 = vld [vmem:[#allocation7 + $0x4b0] sm:$0xff]  ;;  %v2122_v56 = vld [vmem:[#allocation7 + $0x498] sm:$0xff]  ;;  %v6787_v31 = vcombine.low %v2114_v42, %v2118_v46 }
 0x27c   : > { %3991 = vmatprep.subr.bf16.mxu0 %v6762_v49  ;;  %4217 = vmatprep.subr.bf16.mxu1 %v6764_v55  ;;  %v2126_v49 = vld [vmem:[#allocation7 + $0x4b8] sm:$0xff]  ;;  %v6785_v55 = vcombine.low %v2113_v29, %v2117_v41  ;;  %v2141_v59 = vld [vmem:[#allocation7 + $0x530] sm:$0xff] }
 0x27d   : > { %3726 = vmatprep.mubr.bf16.mxu0 %v8931_v1  ;;  %3952 = vmatprep.mubr.bf16.mxu1 %v8931_v1  ;;  %v6796_v19 = vcombine.high %v2122_v56, %v2126_v49  ;;  %v2138_v16 = vld [vmem:[#allocation7 + $0x518] sm:$0xff]  ;;  %v2145_v29 = vld [vmem:[#allocation7 + $0x550] sm:$0xff] }
 0x27e   : > { %3727 = vmatmul.mubr.bf16.gmra.mrb[60].mxu0 %v8934_v35  ;;  %3953 = vmatmul.mubr.bf16.gmra.mrb[92].mxu1 %v8934_v35  ;;  %v2142_v18 = vld [vmem:[#allocation7 + $0x538] sm:$0xff]  ;;  %v2149_v41 = vld [vmem:[#allocation7 + $0x570] sm:$0xff] }
 0x27f   : > { %3992 = vmatpush1.bf16.msra.mxu0 %v6761_v63  ;;  %3995 = vmatprep.mubr.bf16.mxu0 %v8718_v9  ;;  %v2130_v63 = vld [vmem:[#allocation7 + $0x4d8] sm:$0xff] }
 0x280   : > { %4218 = vmatpush1.bf16.msra.mxu1 %v6763_v24  ;;  %4221 = vmatprep.mubr.bf16.mxu1 %v8718_v9  ;;  %v2121_v9 = vld [vmem:[#allocation7 + $0x490] sm:$0xff]  ;;  %v2134_v24 = vld [vmem:[#allocation7 + $0x4f8] sm:$0xff] }
 0x281   : > { %3993 = vmatprep.subr.bf16.mxu0 %v6770_v51  ;;  %4219 = vmatprep.subr.bf16.mxu1 %v6772_v47  ;;  %v6794_v58 = vcombine.high %v2121_v9, %v2125_v50  ;;  %v6795_v51 = vcombine.low %v2122_v56, %v2126_v49  ;;  %v6802_v47 = vcombine.high %v2129_v28, %v2133_v34  ;;  %v2146_v42 = vld [vmem:[#allocation7 + $0x558] sm:$0xff] }
 0x282   : > { %v2150_v46 = vld [vmem:[#allocation7 + $0x578] sm:$0xff]  ;;  %v6817_v56 = vcombine.low %v2145_v29, %v2149_v41 }
 0x283   : > { %3994 = vmatpush1.bf16.msra.mxu0 %v6769_v12  ;;  %v6801_v12 = vcombine.low %v2129_v28, %v2133_v34  ;;  %v6819_v49 = vcombine.low %v2146_v42, %v2150_v46  ;;  %v2162_v28 = vld [vmem:[#allocation7 + $0x5d8] sm:$0xff] }
 0x284   : > { %4220 = vmatpush1.bf16.msra.mxu1 %v6771_v2  ;;  %4076 = vmatprep.subr.bf16.mxu0 %v6778_v26  ;;  %v6803_v2 = vcombine.low %v2130_v63, %v2134_v24  ;;  %v6810_v26 = vcombine.high %v2137_v36, %v2141_v59  ;;  %v2166_v34 = vld [vmem:[#allocation7 + $0x5f8] sm:$0xff] }
 0x285   : > { %4302 = vmatprep.subr.bf16.mxu1 %v6780_v20  ;;  %v6812_v20 = vcombine.high %v2138_v16, %v2142_v18 }
 0x286   : > { %3996 = vmatmul.mubr.bf16.vlgmr.msra.gmra.mrb[64].mxu0 %v8725_v48 }
 0x287   : > { %4222 = vmatmul.mubr.bf16.vlgmr.msra.gmra.mrb[96].mxu1 %v8725_v48  ;;  %4005 = vmatprep.mubr.bf16.mxu0 %v8743_v54  ;;  %v6793_v48 = vcombine.low %v2121_v9, %v2125_v50  ;;  %v2154_v9 = vld [vmem:[#allocation7 + $0x598] sm:$0xff] }
 0x288   : > { %4077 = vmatpush1.bf16.msra.mxu0 %v6777_v5  ;;  %4231 = vmatprep.mubr.bf16.mxu1 %v8743_v54  ;;  %v6804_v54 = vcombine.high %v2130_v63, %v2134_v24  ;;  %v6811_v5 = vcombine.low %v2138_v16, %v2142_v18  ;;  %v2158_v50 = vld [vmem:[#allocation7 + $0x5b8] sm:$0xff] }
 0x289   : > { %4303 = vmatpush1.bf16.msra.mxu1 %v6779_v57  ;;  %4078 = vmatprep.subr.bf16.mxu0 %v6786_v40  ;;  %v6818_v57 = vcombine.high %v2145_v29, %v2149_v41  ;;  %v2153_v40 = vld [vmem:[#allocation7 + $0x590] sm:$0xff]  ;;  %v6827_v63 = vcombine.low %v2154_v9, %v2158_v50 }
 0x28a   : > { %4304 = vmatprep.subr.bf16.mxu1 %v6788_v44  ;;  %v2157_v44 = vld [vmem:[#allocation7 + $0x5b0] sm:$0xff] }
 0x28c   : > { %4079 = vmatpush1.bf16.msra.mxu0 %v6785_v55  ;;  %v6826_v55 = vcombine.high %v2153_v40, %v2157_v44 }
 0x28d   : > { %4305 = vmatpush1.bf16.msra.mxu1 %v6787_v31  ;;  %4080 = vmatprep.subr.bf16.mxu0 %v6794_v58  ;;  %v6828_v31 = vcombine.high %v2154_v9, %v2158_v50  ;;  %v2161_v58 = vld [vmem:[#allocation7 + $0x5d0] sm:$0xff] }
 0x28e   : > { %4006 = vmatmul.mubr.bf16.gmra.mrb[68].mxu0 %v8746_v62  ;;  %4306 = vmatprep.subr.bf16.mxu1 %v6796_v19  ;;  %v2165_v19 = vld [vmem:[#allocation7 + $0x5f0] sm:$0xff] }
 0x28f   : > { %4232 = vmatmul.mubr.bf16.gmra.mrb[100].mxu1 %v8746_v62  ;;  %4015 = vmatprep.mubr.bf16.mxu0 %v8755_v13  ;;  %v6809_v62 = vcombine.low %v2137_v36, %v2141_v59  ;;  %v6834_v24 = vcombine.high %v2161_v58, %v2165_v19  ;;  %v6833_v36 = vcombine.low %v2161_v58, %v2165_v19  ;;  %v2193_v9 = vld [vmem:[#allocation7 + $0x6d0] sm:$0xff] }
 0x290   : > { %4081 = vmatpush1.bf16.msra.mxu0 %v6793_v48  ;;  %4241 = vmatprep.mubr.bf16.mxu1 %v8755_v13  ;;  %v6820_v13 = vcombine.high %v2146_v42, %v2150_v46  ;;  %v2169_v48 = vld [vmem:[#allocation7 + $0x610] sm:$0xff]  ;;  %v6835_v59 = vcombine.low %v2162_v28, %v2166_v34 }
 0x291   : > { %4307 = vmatpush1.bf16.msra.mxu1 %v6795_v51  ;;  %4082 = vmatprep.subr.bf16.mxu0 %v6802_v47  ;;  %v2173_v51 = vld [vmem:[#allocation7 + $0x630] sm:$0xff]  ;;  %v2170_v47 = vld [vmem:[#allocation7 + $0x618] sm:$0xff] }
 0x292   : > { %4308 = vmatprep.subr.bf16.mxu1 %v6804_v54  ;;  %v2174_v54 = vld [vmem:[#allocation7 + $0x638] sm:$0xff]  ;;  %v6842_v16 = vcombine.high %v2169_v48, %v2173_v51  ;;  %v2185_v42 = vld [vmem:[#allocation7 + $0x690] sm:$0xff] }
 0x293   : > { %v6844_v18 = vcombine.high %v2170_v47, %v2174_v54  ;;  %v6843_v29 = vcombine.low %v2170_v47, %v2174_v54  ;;  %v2189_v46 = vld [vmem:[#allocation7 + $0x6b0] sm:$0xff]  ;;  %v2210_v47 = vld [vmem:[#allocation7 + $0x758] sm:$0xff] }
 0x294   : > { %4083 = vmatpush1.bf16.msra.mxu0 %v6801_v12  ;;  %v2177_v12 = vld [vmem:[#allocation7 + $0x650] sm:$0xff]  ;;  %v2214_v54 = vld [vmem:[#allocation7 + $0x778] sm:$0xff] }
 0x295   : > { %4309 = vmatpush1.bf16.msra.mxu1 %v6803_v2  ;;  %4084 = vmatprep.subr.bf16.mxu0 %v6810_v26  ;;  %v2181_v2 = vld [vmem:[#allocation7 + $0x670] sm:$0xff]  ;;  %v2178_v26 = vld [vmem:[#allocation7 + $0x658] sm:$0xff] }
 0x296   : > { %4016 = vmatmul.mubr.bf16.gmra.mrb[72].mxu0 %v8758_v45  ;;  %4310 = vmatprep.subr.bf16.mxu1 %v6812_v20  ;;  %v2182_v20 = vld [vmem:[#allocation7 + $0x678] sm:$0xff]  ;;  %v6850_v41 = vcombine.high %v2177_v12, %v2181_v2  ;;  %v2197_v50 = vld [vmem:[#allocation7 + $0x6f0] sm:$0xff] }
 0x297   : > { %4242 = vmatmul.mubr.bf16.gmra.mrb[104].mxu1 %v8758_v45  ;;  %4025 = vmatprep.mubr.bf16.mxu0 %v8767_v17  ;;  %v6825_v45 = vcombine.low %v2153_v40, %v2157_v44  ;;  %v6858_v40 = vcombine.high %v2185_v42, %v2189_v46  ;;  %v2201_v58 = vld [vmem:[#allocation7 + $0x710] sm:$0xff] }
 0x298   : > { %4085 = vmatpush1.bf16.msra.mxu0 %v6809_v62  ;;  %4251 = vmatprep.mubr.bf16.mxu1 %v8767_v17  ;;  %v6836_v17 = vcombine.high %v2162_v28, %v2166_v34  ;;  %v2186_v62 = vld [vmem:[#allocation7 + $0x698] sm:$0xff]  ;;  %v2205_v19 = vld [vmem:[#allocation7 + $0x730] sm:$0xff] }
 0x299   : > { %4311 = vmatpush1.bf16.msra.mxu1 %v6811_v5  ;;  %4086 = vmatprep.subr.bf16.mxu0 %v6818_v57  ;;  %v2190_v5 = vld [vmem:[#allocation7 + $0x6b8] sm:$0xff]  ;;  %v6849_v57 = vcombine.low %v2177_v12, %v2181_v2 }
 0x29a   : > { %4312 = vmatprep.subr.bf16.mxu1 %v6820_v13  ;;  %v6851_v13 = vcombine.low %v2178_v26, %v2182_v20  ;;  %v6860_v44 = vcombine.high %v2186_v62, %v2190_v5  ;;  %v2202_v28 = vld [vmem:[#allocation7 + $0x718] sm:$0xff] }
 0x29b   : > { %v2206_v34 = vld [vmem:[#allocation7 + $0x738] sm:$0xff] }
 0x29c   : > { %4087 = vmatpush1.bf16.msra.mxu0 %v6817_v56  ;;  %v2194_v56 = vld [vmem:[#allocation7 + $0x6d8] sm:$0xff] }
 0x29d   : > { %4313 = vmatpush1.bf16.msra.mxu1 %v6819_v49  ;;  %4088 = vmatprep.subr.bf16.mxu0 %v6826_v55  ;;  %v2198_v49 = vld [vmem:[#allocation7 + $0x6f8] sm:$0xff]  ;;  %v6859_v55 = vcombine.low %v2186_v62, %v2190_v5 }
 0x29e   : > { %4026 = vmatmul.mubr.bf16.gmra.mrb[76].mxu0 %v8770_v60  ;;  %4314 = vmatprep.subr.bf16.mxu1 %v6828_v31  ;;  %v6866_v31 = vcombine.high %v2193_v9, %v2197_v50  ;;  %v2218_v12 = vld [vmem:[#allocation7 + $0x798] sm:$0xff] }
 0x29f   : > { %4252 = vmatmul.mubr.bf16.gmra.mrb[108].mxu1 %v8770_v60  ;;  %4035 = vmatprep.mubr.bf16.mxu0 %v8779_v39  ;;  %v6841_v60 = vcombine.low %v2169_v48, %v2173_v51  ;;  %v2209_v48 = vld [vmem:[#allocation7 + $0x750] sm:$0xff]  ;;  %v2222_v2 = vld [vmem:[#allocation7 + $0x7b8] sm:$0xff] }
 0x2a0   : > { %4089 = vmatpush1.bf16.msra.mxu0 %v6825_v45  ;;  %4261 = vmatprep.mubr.bf16.mxu1 %v8779_v39  ;;  %v6852_v39 = vcombine.high %v2178_v26, %v2182_v20  ;;  %v6865_v45 = vcombine.low %v2193_v9, %v2197_v50  ;;  %v2213_v51 = vld [vmem:[#allocation7 + $0x770] sm:$0xff]  ;;  %v6883_v20 = vcombine.low %v2210_v47, %v2214_v54  ;;  %v7799_v50 = vld [vmem:[#allocation8 + $0x20] ss:$8 sps:$4 sm:$0xff]  }
 0x2a1   : > { %4315 = vmatpush1.bf16.msra.mxu1 %v6827_v63  ;;  %4090 = vmatprep.subr.bf16.mxu0 %v6834_v24  ;;  %v6867_v63 = vcombine.low %v2194_v56, %v2198_v49  ;;  %v6874_v24 = vcombine.high %v2201_v58, %v2205_v19  ;;  %v6881_v26 = vcombine.low %v2209_v48, %v2213_v51  ;;  %v7798_v9 = vld [vmem:[#allocation8 + $0x14] ss:$8 sps:$4 sm:$0xff]  }
 0x2a2   : > { %4316 = vmatprep.subr.bf16.mxu1 %v6836_v17  ;;  %v6876_v17 = vcombine.high %v2202_v28, %v2206_v34  ;;  %v6891_v62 = vcombine.low %v2218_v12, %v2222_v2 }
 0x2a4   : > { %4091 = vmatpush1.bf16.msra.mxu0 %v6833_v36  ;;  %v6875_v36 = vcombine.low %v2202_v28, %v2206_v34  ;;  %v7828_v28 = vld [vmem:[#allocation8 + $0xb4] ss:$8 sps:$4 sm:$0xff]   ;;  %v7829_v34 = vld [vmem:[#allocation8 + $0xc0] ss:$8 sps:$4 sm:$0xff]  }
 0x2a5   : > { %4317 = vmatpush1.bf16.msra.mxu1 %v6835_v59  ;;  %4092 = vmatprep.subr.bf16.mxu0 %v6842_v16  ;;  %v6882_v59 = vcombine.high %v2209_v48, %v2213_v51  ;;  %v2217_v16 = vld [vmem:[#allocation7 + $0x790] sm:$0xff]  ;;  %v9004_v48 = vld [vmem:[#allocation8 + $0x300] ss:$8 sps:$4 sm:$0xff]  }
 0x2a6   : > { %4036 = vmatmul.mubr.bf16.gmra.mrb[80].mxu0 %v8782_v6  ;;  %4318 = vmatprep.subr.bf16.mxu1 %v6844_v18  ;;  %v2221_v18 = vld [vmem:[#allocation7 + $0x7b0] sm:$0xff] }
 0x2a7   : > { %4262 = vmatmul.mubr.bf16.gmra.mrb[112].mxu1 %v8782_v6  ;;  %4045 = vmatprep.mubr.bf16.mxu0 %v8791_v52  ;;  %v6857_v6 = vcombine.low %v2185_v42, %v2189_v46  ;;  %v2226_v42 = vld [vmem:[#allocation7 + $0x7d8] sm:$0xff] }
 0x2a8   : > { %4093 = vmatpush1.bf16.msra.mxu0 %v6841_v60  ;;  %4271 = vmatprep.mubr.bf16.mxu1 %v8791_v52  ;;  %v6868_v52 = vcombine.high %v2194_v56, %v2198_v49  ;;  %v6890_v60 = vcombine.high %v2217_v16, %v2221_v18  ;;  %v2230_v46 = vld [vmem:[#allocation7 + $0x7f8] sm:$0xff]  ;;  %v7805_v49 = vld [vmem:[#allocation8 + $0x40] ss:$8 sps:$4 sm:$0xff]  }
 0x2a9   : > { %4319 = vmatpush1.bf16.msra.mxu1 %v6843_v29  ;;  %4094 = vmatprep.subr.bf16.mxu0 %v6850_v41  ;;  %v6892_v29 = vcombine.high %v2218_v12, %v2222_v2  ;;  %v2225_v41 = vld [vmem:[#allocation7 + $0x7d0] sm:$0xff]  ;;  %v9038_v12 = vld [vmem:[#allocation8 + $0x340] ss:$8 sps:$4 sm:$0xff]  }
 0x2aa   : > { %4320 = vmatprep.subr.bf16.mxu1 %v6852_v39  ;;  %v2229_v39 = vld [vmem:[#allocation7 + $0x7f0] sm:$0xff]  ;;  %9789 = vst [vmem:[#allocation18_spill] sm:$0xff] %v9038_v12 }
 0x2ab   : > { %v6898_v5 = vcombine.high %v2225_v41, %v2229_v39  ;;  %v7804_v56 = vld [vmem:[#allocation8 + $0x34] ss:$8 sps:$4 sm:$0xff]  }
 0x2ac   : > { %4095 = vmatpush1.bf16.msra.mxu0 %v6849_v57  ;;  %v6897_v57 = vcombine.low %v2225_v41, %v2229_v39  ;;  %v9008_v51 = vld [vmem:[#allocation8 + $0x314] ss:$8 sps:$4 sm:$0xff]   ;;  %v9053_v41 = vld [vmem:[#allocation8 + $0x350] ss:$8 sps:$4 sm:$0xff]  }
 0x2ad   : > { %4321 = vmatpush1.bf16.msra.mxu1 %v6851_v13  ;;  %4096 = vmatprep.subr.bf16.mxu0 %v6858_v40  ;;  %v6899_v13 = vcombine.low %v2226_v42, %v2230_v46  ;;  %v7795_v40 = vld [vmem:[#allocation8 + $0x4] ss:$8 sps:$4 sm:$0xff]   ;;  %9792 = vst [vmem:[#allocation21_spill] sm:$0xff] %v9053_v41 }
 0x2ae   : > { %4046 = vmatmul.mubr.bf16.gmra.mrb[84].mxu0 %v8794_v0  ;;  %4322 = vmatprep.subr.bf16.mxu1 %v6860_v44  ;;  %v7793_v44 = vld [vmem:[#allocation8] ss:$8 sps:$4 sm:$0xff]  }
 0x2af   : > { %4272 = vmatmul.mubr.bf16.gmra.mrb[116].mxu1 %v8794_v0  ;;  %4055 = vmatprep.mubr.bf16.mxu0 %v8803_v38  ;;  %v6873_v0 = vcombine.low %v2201_v58, %v2205_v19  ;;  %v7822_v58 = vld [vmem:[#allocation8 + $0x94] ss:$8 sps:$4 sm:$0xff]   ;;  %v7823_v19 = vld [vmem:[#allocation8 + $0xa0] ss:$8 sps:$4 sm:$0xff]  }
 0x2b0   : > { %4097 = vmatpush1.bf16.msra.mxu0 %v6857_v6  ;;  %4281 = vmatprep.mubr.bf16.mxu1 %v8803_v38  ;;  %v6884_v38 = vcombine.high %v2210_v47, %v2214_v54  ;;  %v7810_v6 = vld [vmem:[#allocation8 + $0x54] ss:$8 sps:$4 sm:$0xff]   ;;  %v9012_v47 = vld [vmem:[#allocation8 + $0x310] ss:$8 sps:$4 sm:$0xff]   ;;  %v9021_v54 = vld [vmem:[#allocation8 + $0x320] ss:$8 sps:$4 sm:$0xff]  }
 0x2b1   : > { %4323 = vmatpush1.bf16.msra.mxu1 %v6859_v55  ;;  %4098 = vmatprep.subr.bf16.mxu0 %v6866_v31  ;;  %v7811_v55 = vld [vmem:[#allocation8 + $0x60] ss:$8 sps:$4 sm:$0xff]   ;;  %v7816_v31 = vld [vmem:[#allocation8 + $0x74] ss:$8 sps:$4 sm:$0xff]  }
 0x2b2   : > { %4324 = vmatprep.subr.bf16.mxu1 %v6868_v52  ;;  %v7817_v52 = vld [vmem:[#allocation8 + $0x80] ss:$8 sps:$4 sm:$0xff]  }
 0x2b4   : > { %4099 = vmatpush1.bf16.msra.mxu0 %v6865_v45  ;;  %v7834_v45 = vld [vmem:[#allocation8 + $0xd4] ss:$8 sps:$4 sm:$0xff]  }
 0x2b5   : > { %4325 = vmatpush1.bf16.msra.mxu1 %v6867_v63  ;;  %4100 = vmatprep.subr.bf16.mxu0 %v6874_v24  ;;  %v7835_v63 = vld [vmem:[#allocation8 + $0xe0] ss:$8 sps:$4 sm:$0xff]   ;;  %v7840_v24 = vld [vmem:[#allocation8 + $0xf4] ss:$8 sps:$4 sm:$0xff]  }
 0x2b6   : > { %4056 = vmatmul.mubr.bf16.gmra.mrb[88].mxu0 %v8806_v27  ;;  %4326 = vmatprep.subr.bf16.mxu1 %v6876_v17  ;;  %v7838_v17 = vld [vmem:[#allocation8 + $0xf0] ss:$8 sps:$4 sm:$0xff]  }
 0x2b7   : > { %4282 = vmatmul.mubr.bf16.gmra.mrb[120].mxu1 %v8806_v27  ;;  %4065 = vmatprep.mubr.bf16.mxu0 %v8815_v22  ;;  %v6889_v27 = vcombine.low %v2217_v16, %v2221_v18 }
 0x2b8   : > { %4101 = vmatpush1.bf16.msra.mxu0 %v6873_v0  ;;  %4291 = vmatprep.mubr.bf16.mxu1 %v8815_v22  ;;  %v6900_v22 = vcombine.high %v2226_v42, %v2230_v46 }
 0x2b9   : > { %4327 = vmatpush1.bf16.msra.mxu1 %v6875_v36  ;;  %4102 = vmatprep.subr.bf16.mxu0 %v6882_v59  ;;  %v9025_v36 = vld [vmem:[#allocation8 + $0x324] ss:$8 sps:$4 sm:$0xff]   ;;  %v9027_v59 = vld [vmem:[#allocation8 + $0x334] ss:$8 sps:$4 sm:$0xff]  }
 0x2ba   : > { %4328 = vmatprep.subr.bf16.mxu1 %v6884_v38  ;;  %v9031_v38 = vld [vmem:[#allocation8 + $0x330] ss:$8 sps:$4 sm:$0xff]  }
 0x2bc   : > { %4103 = vmatpush1.bf16.msra.mxu0 %v6881_v26  ;;  %v9043_v26 = vld [vmem:[#allocation8 + $0x344] ss:$8 sps:$4 sm:$0xff]  }
 0x2bd   : > { %4329 = vmatpush1.bf16.msra.mxu1 %v6883_v20  ;;  %4104 = vmatprep.subr.bf16.mxu0 %v6890_v60  ;;  %9790 = vst [vmem:[#allocation19_spill] sm:$0xff] %v9043_v26  ;;  %v9047_v60 = vld [vmem:[#allocation8 + $0x354] ss:$8 sps:$4 sm:$0xff]  }
 0x2be   : > { %4066 = vmatmul.mubr.bf16.gmra.mrb[92].mxu0 %v8818_v21  ;;  %4330 = vmatprep.subr.bf16.mxu1 %v6892_v29  ;;  %9791 = vst [vmem:[#allocation20_spill] sm:$0xff] %v9047_v60 }
 0x2bf   : > { %4292 = vmatmul.mubr.bf16.gmra.mrb[124].mxu1 %v8818_v21  ;;  %4108 = vmatprep.mubr.bf16.mxu0 %v8841_v32  ;;  %v7796_v21 = vld [vmem:[#allocation8 + $0x10] ss:$8 sps:$4 sm:$0xff]  }
 0x2c0   : > { %4105 = vmatpush1.bf16.msra.mxu0 %v6889_v27  ;;  %4334 = vmatprep.mubr.bf16.mxu1 %v8841_v32  ;;  %v7801_v32 = vld [vmem:[#allocation8 + $0x24] ss:$8 sps:$4 sm:$0xff]  }
 0x2c1   : > { %4331 = vmatpush1.bf16.msra.mxu1 %v6891_v62  ;;  %4106 = vmatprep.subr.bf16.mxu0 %v6898_v5 }
 0x2c2   : > { %4332 = vmatprep.subr.bf16.mxu1 %v6900_v22 }
 0x2c4   : > { %4107 = vmatpush1.bf16.msra.mxu0 %v6897_v57 }
 0x2c5   : > { %4333 = vmatpush1.bf16.msra.mxu1 %v6899_v13  ;;  %5482 = vmatprep.subr.bf16.mxu0 %v7795_v40  ;;  %v9161_v40 = vld [vmem:[#allocation8 + $0x3c0] ss:$8 sps:$4 sm:$0xff]  }
 0x2c6   : > { %9806 = vst [vmem:[#allocation35_spill] sm:$0xff] %v9161_v40 }
 0x2c7   : > { %4109 = vmatmul.mubr.bf16.vlgmr.msra.gmra.mrb[64].mxu0 %v8844_v7 }
 0x2c8   : > { %4335 = vmatmul.mubr.bf16.vlgmr.msra.gmra.mrb[96].mxu1 %v8844_v7  ;;  %4118 = vmatprep.mubr.bf16.mxu0 %v8859_v4  ;;  %v7802_v7 = vld [vmem:[#allocation8 + $0x30] ss:$8 sps:$4 sm:$0xff]  }
 0x2c9   : > { %4344 = vmatprep.mubr.bf16.mxu1 %v8859_v4  ;;  %5483 = vmatpush1.bf16.msra.mxu0 %v7793_v44  ;;  %v7807_v4 = vld [vmem:[#allocation8 + $0x44] ss:$8 sps:$4 sm:$0xff]  }
 0x2ca   : > { %5484 = vmatprep.subr.bf16.mxu0 %v7798_v9 }
 0x2cd   : > { %5485 = vmatpush1.bf16.msra.mxu0 %v7796_v21  ;;  %v9073_v21 = vld [vmem:[#allocation8 + $0x364] ss:$8 sps:$4 sm:$0xff]  }
 0x2ce   : > { %5486 = vmatprep.subr.bf16.mxu0 %v7801_v32  ;;  %9793 = vst [vmem:[#allocation22_spill] sm:$0xff] %v9073_v21 }
 0x2cf   : > { %4119 = vmatmul.mubr.bf16.gmra.mrb[68].mxu0 %v8862_v14 }
 0x2d0   : > { %4345 = vmatmul.mubr.bf16.gmra.mrb[100].mxu1 %v8862_v14  ;;  %4128 = vmatprep.mubr.bf16.mxu0 %v8871_v11  ;;  %v7808_v14 = vld [vmem:[#allocation8 + $0x50] ss:$8 sps:$4 sm:$0xff]  }
 0x2d1   : > { %4354 = vmatprep.mubr.bf16.mxu1 %v8871_v11  ;;  %5487 = vmatpush1.bf16.msra.mxu0 %v7799_v50  ;;  %v7813_v11 = vld [vmem:[#allocation8 + $0x64] ss:$8 sps:$4 sm:$0xff]  }
 0x2d2   : > { %5488 = vmatprep.subr.bf16.mxu0 %v7804_v56  ;;  %v9077_v56 = vld [vmem:[#allocation8 + $0x360] ss:$8 sps:$4 sm:$0xff]  }
 0x2d3   : > { %9794 = vst [vmem:[#allocation23_spill] sm:$0xff] %v9077_v56 }
 0x2d5   : > { %5489 = vmatpush1.bf16.msra.mxu0 %v7802_v7 }
 0x2d6   : > { %5490 = vmatprep.subr.bf16.mxu0 %v7807_v4 }
 0x2d7   : > { %4129 = vmatmul.mubr.bf16.gmra.mrb[72].mxu0 %v8874_v25 }
 0x2d8   : > { %4355 = vmatmul.mubr.bf16.gmra.mrb[104].mxu1 %v8874_v25  ;;  %4138 = vmatprep.mubr.bf16.mxu0 %v8883_v61  ;;  %v7814_v25 = vld [vmem:[#allocation8 + $0x70] ss:$8 sps:$4 sm:$0xff]  }
 0x2d9   : > { %4364 = vmatprep.mubr.bf16.mxu1 %v8883_v61  ;;  %5491 = vmatpush1.bf16.msra.mxu0 %v7805_v49  ;;  %v7819_v61 = vld [vmem:[#allocation8 + $0x84] ss:$8 sps:$4 sm:$0xff]   ;;  %v9083_v49 = vld [vmem:[#allocation8 + $0x374] ss:$8 sps:$4 sm:$0xff]  }
 0x2da   : > { %5492 = vmatprep.subr.bf16.mxu0 %v7810_v6  ;;  %9795 = vst [vmem:[#allocation24_spill] sm:$0xff] %v9083_v49 }
 0x2dd   : > { %5493 = vmatpush1.bf16.msra.mxu0 %v7808_v14 }
 0x2de   : > { %5494 = vmatprep.subr.bf16.mxu0 %v7813_v11 }
 0x2df   : > { %4139 = vmatmul.mubr.bf16.gmra.mrb[76].mxu0 %v8886_v3 }
 0x2e0   : > { %4365 = vmatmul.mubr.bf16.gmra.mrb[108].mxu1 %v8886_v3  ;;  %4148 = vmatprep.mubr.bf16.mxu0 %v8895_v43  ;;  %v7820_v3 = vld [vmem:[#allocation8 + $0x90] ss:$8 sps:$4 sm:$0xff]  }
 0x2e1   : > { %4374 = vmatprep.mubr.bf16.mxu1 %v8895_v43  ;;  %5495 = vmatpush1.bf16.msra.mxu0 %v7811_v55  ;;  %v7825_v43 = vld [vmem:[#allocation8 + $0xa4] ss:$8 sps:$4 sm:$0xff]   ;;  %v7841_v55 = vld [vmem:[#allocation8 + $0x100] ss:$8 sps:$4 sm:$0xff]  }
 0x2e2   : > { %5496 = vmatprep.subr.bf16.mxu0 %v7816_v31  ;;  %v9088_v31 = vld [vmem:[#allocation8 + $0x370] ss:$8 sps:$4 sm:$0xff]  }
 0x2e3   : > { %9796 = vst [vmem:[#allocation25_spill] sm:$0xff] %v9088_v31 }
 0x2e5   : > { %5497 = vmatpush1.bf16.msra.mxu0 %v7814_v25 }
 0x2e6   : > { %5498 = vmatprep.subr.bf16.mxu0 %v7819_v61 }
 0x2e7   : > { %4149 = vmatmul.mubr.bf16.gmra.mrb[80].mxu0 %v8898_v23 }
 0x2e8   : > { %4375 = vmatmul.mubr.bf16.gmra.mrb[112].mxu1 %v8898_v23  ;;  %4158 = vmatprep.mubr.bf16.mxu0 %v8907_v53  ;;  %v7826_v23 = vld [vmem:[#allocation8 + $0xb0] ss:$8 sps:$4 sm:$0xff]  }
 0x2e9   : > { %4384 = vmatprep.mubr.bf16.mxu1 %v8907_v53  ;;  %5499 = vmatpush1.bf16.msra.mxu0 %v7817_v52  ;;  %v7831_v53 = vld [vmem:[#allocation8 + $0xc4] ss:$8 sps:$4 sm:$0xff]  }
 0x2ea   : > { %5500 = vmatprep.subr.bf16.mxu0 %v7822_v58  ;;  %v7846_v58 = vld [vmem:[#allocation8 + $0x114] ss:$8 sps:$4 sm:$0xff]  }
 0x2ed   : > { %5501 = vmatpush1.bf16.msra.mxu0 %v7820_v3 }
 0x2ee   : > { %5502 = vmatprep.subr.bf16.mxu0 %v7825_v43 }
 0x2ef   : > { %4159 = vmatmul.mubr.bf16.gmra.mrb[84].mxu0 %v8910_v30 }
 0x2f0   : > { %4385 = vmatmul.mubr.bf16.gmra.mrb[116].mxu1 %v8910_v30  ;;  %4168 = vmatprep.mubr.bf16.mxu0 %v8919_v10  ;;  %v7832_v30 = vld [vmem:[#allocation8 + $0xd0] ss:$8 sps:$4 sm:$0xff]  }
 0x2f1   : > { %4394 = vmatprep.mubr.bf16.mxu1 %v8919_v10  ;;  %5503 = vmatpush1.bf16.msra.mxu0 %v7823_v19  ;;  %v7837_v10 = vld [vmem:[#allocation8 + $0xe4] ss:$8 sps:$4 sm:$0xff]  }
 0x2f2   : > { %5504 = vmatprep.subr.bf16.mxu0 %v7828_v28  ;;  %v9157_v28 = vld [vmem:[#allocation8 + $0x3c4] ss:$8 sps:$4 sm:$0xff]  }
 0x2f3   : > { %9805 = vst [vmem:[#allocation34_spill] sm:$0xff] %v9157_v28 }
 0x2f5   : > { %5505 = vmatpush1.bf16.msra.mxu0 %v7826_v23 }
 0x2f6   : > { %5506 = vmatprep.subr.bf16.mxu0 %v7831_v53 }
 0x2f7   : > { %4169 = vmatmul.mubr.bf16.gmra.mrb[88].mxu0 %v8922_v15 }
 0x2f8   : > { %4395 = vmatmul.mubr.bf16.gmra.mrb[120].mxu1 %v8922_v15  ;;  %4178 = vmatprep.mubr.bf16.mxu0 %v8931_v1  ;;  %v7843_v15 = vld [vmem:[#allocation8 + $0x104] ss:$8 sps:$4 sm:$0xff]  }
 0x2f9   : > { %4404 = vmatprep.mubr.bf16.mxu1 %v8931_v1  ;;  %5507 = vmatpush1.bf16.msra.mxu0 %v7829_v34  ;;  %v9006_v1 = vld [vmem:[#allocation8 + $0x304] ss:$8 sps:$4 sm:$0xff]  }
 0x2fa   : > { %5508 = vmatprep.subr.bf16.mxu0 %v7834_v45  ;;  %7134 = vmatprep.subr.bf16.mxu1 %v9006_v1  ;;  %v9101_v34 = vld [vmem:[#allocation8 + $0x384] ss:$8 sps:$4 sm:$0xff]  }
 0x2fb   : > { %7150 = vmatpush1.bf16.msra.mxu1 %v9004_v48  ;;  %9797 = vst [vmem:[#allocation26_spill] sm:$0xff] %v9101_v34 }
 0x2fc   : > { %7135 = vmatprep.subr.bf16.mxu1 %v9008_v51 }
 0x2fd   : > { %5509 = vmatpush1.bf16.msra.mxu0 %v7832_v30  ;;  %v7856_v30 = vld [vmem:[#allocation8 + $0x150] ss:$8 sps:$4 sm:$0xff]  }
 0x2fe   : > { %5510 = vmatprep.subr.bf16.mxu0 %v7837_v10  ;;  %v7844_v10 = vld [vmem:[#allocation8 + $0x110] ss:$8 sps:$4 sm:$0xff]  }
 0x2ff   : > { %4179 = vmatmul.mubr.bf16.gmra.mrb[92].mxu0 %v8934_v35  ;;  %7151 = vmatpush1.bf16.msra.mxu1 %v9012_v47 }
 0x300   : > { %4405 = vmatmul.mubr.bf16.gmra.mrb[124].mxu1 %v8934_v35  ;;  %v9018_v35 = vld [vmem:[%s9730_s4] sm:$0xff]  ;;  %7136 = vmatprep.subr.bf16.mxu1 %v9025_v36 }
 0x301   : > { %5511 = vmatpush1.bf16.msra.mxu0 %v7835_v63  ;;  %v4488_v0 = vrot.slane %v9018_v35, %v8679_v33  ;;  %v9105_v63 = vld [vmem:[#allocation8 + $0x380] ss:$8 sps:$4 sm:$0xff]  }
 0x302   : > { %5512 = vmatprep.subr.bf16.mxu0 %v7840_v24  ;;  %9798 = vst [vmem:[#allocation27_spill] sm:$0xff] %v9105_v63 }
 0x303   : > { %7152 = vmatpush1.bf16.msra.mxu1 %v9021_v54  ;;  %v4496_v16 = vcombine.high %v4488_v0, %v4488_v0  ;;  %v9035_v18 = vrot.slane %v4488_v0, %v8679_v33  ;;  %v9111_v0 = vld [vmem:[#allocation8 + $0x394] ss:$8 sps:$4 sm:$0xff]  }
 0x304   : > { %7137 = vmatprep.subr.bf16.mxu1 %v9027_v59  ;;  %9799 = vst [vmem:[#allocation28_spill] sm:$0xff] %v9111_v0 }
 0x305   : > { %5513 = vmatpush1.bf16.msra.mxu0 %v7838_v17  ;;  %v9041_v2 = vrot.slane %v4496_v16, %v8679_v33  ;;  %v4531_v20 = vpack.i.b16 %v9035_v18, %v9035_v18  ;;  %v7849_v17 = vld [vmem:[#allocation8 + $0x124] ss:$8 sps:$4 sm:$0xff]  }
 0x306   : > { %5595 = vmatprep.subr.bf16.mxu0 %v7843_v15 }
 0x307   : > { %7153 = vmatpush1.bf16.msra.mxu1 %v9031_v38  ;;  %v4538_v29 = vpack.i.b16 %v9041_v2, %v9041_v2  ;;  %v9061_v62 = vrot.slane %v4531_v20, %v8689_v37 }
 0x308   : > { %7138 = vmatprep.subr.bf16.mxu1 %v9043_v26  ;;  %v7885_v26 = vld [vmem:[#allocation8 + $0x1e4] ss:$8 sps:$4 sm:$0xff]  }
 0x309   : > { %v9066_v57 = vrot.slane %v4538_v29, %v8689_v37 }
 0x30b   : > { %7154 = vmatpush1.bf16.msra.mxu1 %v9038_v12 }
 0x30c   : > { %7139 = vmatprep.subr.bf16.mxu1 %v9047_v60 }
 0x30f   : > { %7155 = vmatpush1.bf16.msra.mxu1 %v9053_v41 }
 0x310   : > { %7140 = vmatprep.subr.bf16.mxu1 %v9073_v21 }
 0x313   : > { %7156 = vmatpush1.bf16.msra.mxu1 %v9077_v56  ;;  %v7879_v56 = vld [vmem:[#allocation8 + $0x1c4] ss:$8 sps:$4 sm:$0xff]  }
 0x314   : > { %7141 = vmatprep.subr.bf16.mxu1 %v9083_v49 }
 0x317   : > { %7157 = vmatpush1.bf16.msra.mxu1 %v9088_v31 }
 0x318   : > { %7142 = vmatprep.subr.bf16.mxu1 %v9101_v34  ;;  %v7871_v34 = vld [vmem:[#allocation8 + $0x1a0] ss:$8 sps:$4 sm:$0xff]  }
 0x319   : > { %v3658_v39 = vpop.f32.mrb[32].mxu0  ;;  %v9055_v42 = vpop.f32.mrb[64].mxu1 }
 0x31a   : > { %v3660_v46 = vpop.f32.mrb[33].mxu0  ;;  %v9058_v27 = vpop.f32.mrb[65].mxu1 }
 0x31b   : > { %v3662_v5 = vpop.f32.mrb[34].mxu0  ;;  %v9063_v22 = vpop.f32.mrb[66].mxu1  ;;  %7158 = vmatpush1.bf16.msra.mxu1 %v9105_v63 }
 0x31c   : > { %v4415_v13 = vpack.c.bf16 %v3662_v5, %v3658_v39  ;;  %v3664_v44 = vpop.f32.mrb[35].mxu0  ;;  %v9070_v9 = vpop.f32.mrb[67].mxu1  ;;  %v7847_v39 = vld [vmem:[#allocation8 + $0x120] ss:$8 sps:$4 sm:$0xff]   ;;  %7143 = vmatprep.subr.bf16.mxu1 %v9111_v0 }
 0x31d   : > { %v4416_v32 = vpack.c.bf16 %v3664_v44, %v3660_v46  ;;  %v9116_v46 = vld [vmem:[#allocation8 + $0x390] ss:$8 sps:$4 sm:$0xff]  }
 0x31e   : > { %v4586_v7 = vadd.bf16 %v9061_v62, %v4415_v13  ;;  %9800 = vst [vmem:[#allocation29_spill] sm:$0xff] %v9116_v46 }
 0x31f   : > { %v4587_v4 = vadd.bf16 %v9066_v57, %v4416_v32  ;;  %v7852_v32 = vld [vmem:[#allocation8 + $0x134] ss:$8 sps:$4 sm:$0xff]   ;;  %7159 = vmatpush1.bf16.msra.mxu1 %v9116_v46 }
 0x320   : > { %v4650_v25 = vmax.bf16 %v9748_v8, %v4586_v7 }
 0x321   : > { %v3668_v6 = vpop.f32.mrb[36].mxu0  ;;  %v9085_v14 = vpop.f32.mrb[68].mxu1  ;;  %v4651_v11 = vmax.bf16 %v9748_v8, %v4587_v4 }
 0x322   : > { %v3670_v61 = vpop.f32.mrb[37].mxu0  ;;  %v9091_v52 = vpop.f32.mrb[69].mxu1 }
 0x323   : > { %v3672_v3 = vpop.f32.mrb[38].mxu0  ;;  %v9094_v43 = vpop.f32.mrb[70].mxu1  ;;  %5514 = vmatprep.mubr.bf16.mxu0 %v4651_v11 }
 0x324   : > { %v4423_v19 = vpack.c.bf16 %v3672_v3, %v3668_v6  ;;  %v3674_v23 = vpop.f32.mrb[39].mxu0  ;;  %v9098_v53 = vpop.f32.mrb[71].mxu1  ;;  %5515 = vmatmul.mubr.bf16.vlgmr.msra.gmra.mrb[96].mxu0 %v4650_v25 }
 0x325   : > { %v4424_v45 = vpack.c.bf16 %v3674_v23, %v3670_v61  ;;  %5596 = vmatpush1.bf16.msra.mxu0 %v7841_v55  ;;  %v9129_v61 = vld [vmem:[#allocation8 + $0x3a4] ss:$8 sps:$4 sm:$0xff]   ;;  %v9133_v23 = vld [vmem:[#allocation8 + $0x3a0] ss:$8 sps:$4 sm:$0xff]  }
 0x326   : > { %v4594_v24 = vadd.bf16 %v9061_v62, %v4423_v19  ;;  %5597 = vmatprep.subr.bf16.mxu0 %v7846_v58  ;;  %9801 = vst [vmem:[#allocation30_spill] sm:$0xff] %v9129_v61  ;;  %v7850_v19 = vld [vmem:[#allocation8 + $0x130] ss:$8 sps:$4 sm:$0xff]   ;;  %9802 = vst [vmem:[#allocation31_spill] sm:$0xff] %v9133_v23  ;;  %7144 = vmatprep.subr.bf16.mxu1 %v9129_v61 }
 0x327   : > { %v4595_v15 = vadd.bf16 %v9066_v57, %v4424_v45  ;;  %7160 = vmatpush1.bf16.msra.mxu1 %v9133_v23  ;;  %v9185_v23 = vld [vmem:[#allocation8 + $0x3e4] ss:$8 sps:$4 sm:$0xff]  }
 0x328   : > { %v4658_v44 = vmax.bf16 %v9748_v8, %v4594_v24  ;;  %9809 = vst [vmem:[#allocation38_spill] sm:$0xff] %v9185_v23 }
 0x329   : > { %v3678_v16 = vpop.f32.mrb[40].mxu0  ;;  %v9113_v20 = vpop.f32.mrb[72].mxu1  ;;  %5598 = vmatpush1.bf16.msra.mxu0 %v7844_v10  ;;  %v4659_v29 = vmax.bf16 %v9748_v8, %v4595_v15  ;;  %v7855_v10 = vld [vmem:[#allocation8 + $0x144] ss:$8 sps:$4 sm:$0xff]  }
 0x32a   : > { %v3680_v5 = vpop.f32.mrb[41].mxu0  ;;  %v9118_v13 = vpop.f32.mrb[73].mxu1  ;;  %5599 = vmatprep.subr.bf16.mxu0 %v7849_v17  ;;  %v9139_v17 = vld [vmem:[#allocation8 + $0x3b4] ss:$8 sps:$4 sm:$0xff]  }
 0x32b   : > { %v3682_v7 = vpop.f32.mrb[42].mxu0  ;;  %v9122_v4 = vpop.f32.mrb[74].mxu1  ;;  %5524 = vmatprep.mubr.bf16.mxu0 %v4659_v29  ;;  %9803 = vst [vmem:[#allocation32_spill] sm:$0xff] %v9139_v17  ;;  %7145 = vmatprep.subr.bf16.mxu1 %v9139_v17 }
 0x32c   : > { %v4431_v6 = vpack.c.bf16 %v3682_v7, %v3678_v16  ;;  %v3684_v55 = vpop.f32.mrb[43].mxu0  ;;  %v9126_v25 = vpop.f32.mrb[75].mxu1  ;;  %5525 = vmatmul.mubr.bf16.gmra.mrb[100].mxu0 %v4658_v44 }
 0x32d   : > { %v4432_v58 = vpack.c.bf16 %v3684_v55, %v3680_v5  ;;  %5600 = vmatpush1.bf16.msra.mxu0 %v7847_v39  ;;  %v7853_v39 = vld [vmem:[#allocation8 + $0x140] ss:$8 sps:$4 sm:$0xff]   ;;  %v9144_v5 = vld [vmem:[#allocation8 + $0x3b0] ss:$8 sps:$4 sm:$0xff]  }
 0x32e   : > { %v4602_v45 = vadd.bf16 %v9061_v62, %v4431_v6  ;;  %5601 = vmatprep.subr.bf16.mxu0 %v7852_v32  ;;  %9804 = vst [vmem:[#allocation33_spill] sm:$0xff] %v9144_v5  ;;  %v7858_v6 = vld [vmem:[#allocation8 + $0x154] ss:$8 sps:$4 sm:$0xff]   ;;  %7161 = vmatpush1.bf16.msra.mxu1 %v9144_v5 }
 0x32f   : > { %v4603_v24 = vadd.bf16 %v9066_v57, %v4432_v58  ;;  %7146 = vmatprep.subr.bf16.mxu1 %v9157_v28 }
 0x330   : > { %v4666_v7 = vmax.bf16 %v9748_v8, %v4602_v45 }
 0x331   : > { %v3688_v15 = vpop.f32.mrb[44].mxu0  ;;  %v9141_v16 = vpop.f32.mrb[76].mxu1  ;;  %5602 = vmatpush1.bf16.msra.mxu0 %v7850_v19  ;;  %v4667_v29 = vmax.bf16 %v9748_v8, %v4603_v24  ;;  %v7859_v19 = vld [vmem:[#allocation8 + $0x160] ss:$8 sps:$4 sm:$0xff]  }
 0x332   : > { %v3690_v44 = vpop.f32.mrb[45].mxu0  ;;  %v9146_v32 = vpop.f32.mrb[77].mxu1  ;;  %5603 = vmatprep.subr.bf16.mxu0 %v7855_v10  ;;  %7162 = vmatpush1.bf16.msra.mxu1 %v9161_v40  ;;  %v9172_v10 = vld [vmem:[#allocation8 + $0x3d0] ss:$8 sps:$4 sm:$0xff]  }
 0x333   : > { %v3692_v55 = vpop.f32.mrb[46].mxu0  ;;  %v9150_v58 = vpop.f32.mrb[78].mxu1  ;;  %5534 = vmatprep.mubr.bf16.mxu0 %v4667_v29  ;;  %v7861_v29 = vld [vmem:[#allocation8 + $0x164] ss:$8 sps:$4 sm:$0xff]   ;;  %9808 = vst [vmem:[#allocation37_spill] sm:$0xff] %v9172_v10 }
 0x334   : > { %v4439_v11 = vpack.c.bf16 %v3692_v55, %v3688_v15  ;;  %v3694_v24 = vpop.f32.mrb[47].mxu0  ;;  %v9154_v3 = vpop.f32.mrb[79].mxu1  ;;  %5535 = vmatmul.mubr.bf16.gmra.mrb[104].mxu0 %v4666_v7  ;;  %v9167_v55 = vld [vmem:[#allocation8 + $0x3d4] ss:$8 sps:$4 sm:$0xff]  }
 0x335   : > { %v4440_v45 = vpack.c.bf16 %v3694_v24, %v3690_v44  ;;  %5604 = vmatpush1.bf16.msra.mxu0 %v7853_v39  ;;  %9807 = vst [vmem:[#allocation36_spill] sm:$0xff] %v9167_v55  ;;  %7147 = vmatprep.subr.bf16.mxu1 %v9167_v55  ;;  %v9189_v55 = vld [vmem:[#allocation8 + $0x3e0] ss:$8 sps:$4 sm:$0xff]  }
 0x336   : > { %v4610_v15 = vadd.bf16 %v9061_v62, %v4439_v11  ;;  %5605 = vmatprep.subr.bf16.mxu0 %v7858_v6  ;;  %7163 = vmatpush1.bf16.msra.mxu1 %v9172_v10  ;;  %9810 = vst [vmem:[#allocation39_spill] sm:$0xff] %v9189_v55  ;;  %v9200_v10 = vld [vmem:[#allocation8 + $0x3f0] ss:$8 sps:$4 sm:$0xff]  }
 0x337   : > { %v4611_v7 = vadd.bf16 %v9066_v57, %v4440_v45  ;;  %v7864_v45 = vld [vmem:[#allocation8 + $0x174] ss:$8 sps:$4 sm:$0xff]   ;;  %7148 = vmatprep.subr.bf16.mxu1 %v9185_v23  ;;  %9813 = vst [vmem:[#allocation41_spill] sm:$0xff] %v9200_v10 }
 0x338   : > { %v4674_v50 = vmax.bf16 %v9748_v8, %v4610_v15 }
 0x339   : > { %v3698_v44 = vpop.f32.mrb[48].mxu0  ;;  %v9169_v24 = vpop.f32.mrb[80].mxu1  ;;  %5606 = vmatpush1.bf16.msra.mxu0 %v7856_v30  ;;  %v4675_v39 = vmax.bf16 %v9748_v8, %v4611_v7  ;;  %v7862_v8 = vld [vmem:[#allocation8 + $0x170] ss:$8 sps:$4 sm:$0xff]  }
 0x33a   : > { %v3700_v11 = vpop.f32.mrb[49].mxu0  ;;  %v9174_v6 = vpop.f32.mrb[81].mxu1  ;;  %5607 = vmatprep.subr.bf16.mxu0 %v7861_v29  ;;  %7164 = vmatpush1.bf16.msra.mxu1 %v9189_v55  ;;  %v7865_v29 = vld [vmem:[#allocation8 + $0x180] ss:$8 sps:$4 sm:$0xff]  }
 0x33b   : > { %v3702_v40 = vpop.f32.mrb[50].mxu0  ;;  %v9178_v28 = vpop.f32.mrb[82].mxu1  ;;  %5544 = vmatprep.mubr.bf16.mxu0 %v4675_v39  ;;  %v9195_v39 = vld [vmem:[#allocation8 + $0x3f4] ss:$8 sps:$4 sm:$0xff]  }
 0x33c   : > { %v4447_v5 = vpack.c.bf16 %v3702_v40, %v3698_v44  ;;  %v3704_v7 = vpop.f32.mrb[51].mxu0  ;;  %v9182_v17 = vpop.f32.mrb[83].mxu1  ;;  %5545 = vmatmul.mubr.bf16.gmra.mrb[108].mxu0 %v4674_v50  ;;  %v7867_v44 = vld [vmem:[#allocation8 + $0x184] ss:$8 sps:$4 sm:$0xff]   ;;  %9811 = vst [vmem:[#allocation40_spill] sm:$0xff] %v9195_v39  ;;  %7149 = vmatprep.subr.bf16.mxu1 %v9195_v39 }
 0x33d   : > { %v4448_v15 = vpack.c.bf16 %v3704_v7, %v3700_v11  ;;  %5608 = vmatpush1.bf16.msra.mxu0 %v7859_v19  ;;  %v9812_v19 = vmov 0  }
 0x33e   : > { %v4618_v40 = vadd.bf16 %v9061_v62, %v4447_v5  ;;  %5609 = vmatprep.subr.bf16.mxu0 %v7864_v45  ;;  %7165 = vmatpush1.bf16.msra.mxu1 %v9200_v10 }
 0x33f   : > { %v4619_v50 = vadd.bf16 %v9066_v57, %v4448_v15  ;;  %v7870_v15 = vld [vmem:[#allocation8 + $0x194] ss:$8 sps:$4 sm:$0xff]  }
 0x340   : > { %v4682_v23 = vmax.bf16 %v9812_v19, %v4618_v40 }
 0x341   : > { %v3708_v11 = vpop.f32.mrb[52].mxu0  ;;  %v9197_v7 = vpop.f32.mrb[84].mxu1  ;;  %5610 = vmatpush1.bf16.msra.mxu0 %v7862_v8  ;;  %v4683_v30 = vmax.bf16 %v9812_v19, %v4619_v50 }
 0x342   : > { %v3710_v5 = vpop.f32.mrb[53].mxu0  ;;  %v9202_v45 = vpop.f32.mrb[85].mxu1  ;;  %5611 = vmatprep.subr.bf16.mxu0 %v7867_v44  ;;  %v7868_v44 = vld [vmem:[#allocation8 + $0x190] ss:$8 sps:$4 sm:$0xff]  }
 0x343   : > { %v3712_v55 = vpop.f32.mrb[54].mxu0  ;;  %v9206_v61 = vpop.f32.mrb[86].mxu1  ;;  %5554 = vmatprep.mubr.bf16.mxu0 %v4683_v30  ;;  %v7873_v30 = vld [vmem:[#allocation8 + $0x1a4] ss:$8 sps:$4 sm:$0xff]  }
 0x344   : > { %v4455_v46 = vpack.c.bf16 %v3712_v55, %v3708_v11  ;;  %v3714_v50 = vpop.f32.mrb[55].mxu0  ;;  %v9210_v0 = vpop.f32.mrb[87].mxu1  ;;  %5555 = vmatmul.mubr.bf16.gmra.mrb[112].mxu0 %v4682_v23 }
 0x345   : > { %v4456_v63 = vpack.c.bf16 %v3714_v50, %v3710_v5  ;;  %5612 = vmatpush1.bf16.msra.mxu0 %v7865_v29  ;;  %v7876_v29 = vld [vmem:[#allocation8 + $0x1b4] ss:$8 sps:$4 sm:$0xff]  }
 0x346   : > { %v4626_v39 = vadd.bf16 %v9061_v62, %v4455_v46  ;;  %5613 = vmatprep.subr.bf16.mxu0 %v7870_v15  ;;  %v4528_v46 = vcombine.high %v9041_v2, %v9041_v2 }
 0x347   : > { %v4627_v55 = vadd.bf16 %v9066_v57, %v4456_v63 }
 0x348   : > { %v4690_v50 = vmax.bf16 %v9812_v19, %v4626_v39  ;;  %v4552_v21 = vpack.i.b16 %v4528_v46, %v4528_v46 }
 0x349   : > { %v3718_v11 = vpop.f32.mrb[56].mxu0  ;;  %v9217_v8 = vpop.f32.mrb[88].mxu1  ;;  %5614 = vmatpush1.bf16.msra.mxu0 %v7868_v44  ;;  %v4691_v23 = vmax.bf16 %v9812_v19, %v4627_v55 }
 0x34a   : > { %v3720_v10 = vpop.f32.mrb[57].mxu0  ;;  %v9220_v5 = vpop.f32.mrb[89].mxu1  ;;  %5615 = vmatprep.subr.bf16.mxu0 %v7873_v30  ;;  %v7874_v30 = vld [vmem:[#allocation8 + $0x1b0] ss:$8 sps:$4 sm:$0xff]   ;;  %v9244_v46 = vrot.slane %v4552_v21, %v8689_v37 }
 0x34b   : > { %v3722_v15 = vpop.f32.mrb[58].mxu0  ;;  %v9225_v40 = vpop.f32.mrb[90].mxu1  ;;  %5564 = vmatprep.mubr.bf16.mxu0 %v4691_v23 }
 0x34c   : > { %v4463_v63 = vpack.c.bf16 %v3722_v15, %v3718_v11  ;;  %v3724_v55 = vpop.f32.mrb[59].mxu0  ;;  %v9229_v31 = vpop.f32.mrb[91].mxu1  ;;  %5565 = vmatmul.mubr.bf16.gmra.mrb[116].mxu0 %v4690_v50  ;;  %v7877_v50 = vld [vmem:[#allocation8 + $0x1c0] ss:$8 sps:$4 sm:$0xff]  }
 0x34d   : > { %v4464_v49 = vpack.c.bf16 %v3724_v55, %v3720_v10  ;;  %5616 = vmatpush1.bf16.msra.mxu0 %v7871_v34  ;;  %v4526_v10 = vcombine.high %v9035_v18, %v9035_v18 }
 0x34e   : > { %v4634_v2 = vadd.bf16 %v9061_v62, %v4463_v63  ;;  %5617 = vmatprep.subr.bf16.mxu0 %v7876_v29  ;;  %v7882_v29 = vld [vmem:[#allocation8 + $0x1d4] ss:$8 sps:$4 sm:$0xff]  }
 0x34f   : > { %v4635_v11 = vadd.bf16 %v9066_v57, %v4464_v49  ;;  %v4545_v21 = vpack.i.b16 %v4526_v10, %v4526_v10 }
 0x350   : > { %v4698_v63 = vmax.bf16 %v9812_v19, %v4634_v2  ;;  %v7880_v2 = vld [vmem:[#allocation8 + $0x1d0] ss:$8 sps:$4 sm:$0xff]  }
 0x351   : > { %v3728_v23 = vpop.f32.mrb[60].mxu0  ;;  %v9235_v15 = vpop.f32.mrb[92].mxu1  ;;  %5618 = vmatpush1.bf16.msra.mxu0 %v7874_v30  ;;  %v4699_v44 = vmax.bf16 %v9812_v19, %v4635_v11 }
 0x352   : > { %v3730_v55 = vpop.f32.mrb[61].mxu0  ;;  %v9240_v34 = vpop.f32.mrb[93].mxu1  ;;  %5619 = vmatprep.subr.bf16.mxu0 %v7879_v56 }
 0x353   : > { %v3732_v49 = vpop.f32.mrb[62].mxu0  ;;  %v9246_v39 = vpop.f32.mrb[94].mxu1  ;;  %5574 = vmatprep.mubr.bf16.mxu0 %v4699_v44  ;;  %v9814_v44 = vpack.c.bf16 %v9070_v9, %v9058_v27  ;;  %v7886_v27 = vld [vmem:[#allocation8 + $0x1f0] ss:$8 sps:$4 sm:$0xff]   ;;  %v7891_v9 = vld [vmem:[#allocation8 + $0x204] ss:$8 sps:$4 sm:$0xff]  }
 0x354   : > { %v4471_v30 = vpack.c.bf16 %v3732_v49, %v3728_v23  ;;  %v4473_v11 = vpack.c.bf16 %v9246_v39, %v9235_v15  ;;  %v3734_v41 = vpop.f32.mrb[63].mxu0  ;;  %v9250_v18 = vpop.f32.mrb[95].mxu1  ;;  %5575 = vmatmul.mubr.bf16.gmra.mrb[120].mxu0 %v4698_v63  ;;  %v9262_v63 = vrot.slane %v4545_v21, %v8689_v37  ;;  %v7958_v39 = vld [vmem:[#allocation8 + $0x2f4] ss:$8 sps:$4 sm:$0xff]  }
 0x355   : > { %v4472_v60 = vpack.c.bf16 %v3734_v41, %v3730_v55  ;;  %v4474_v56 = vpack.c.bf16 %v9250_v18, %v9240_v34  ;;  %5620 = vmatpush1.bf16.msra.mxu0 %v7877_v50  ;;  %v4589_v23 = vadd.bf16 %v9244_v46, %v9814_v44  ;;  %v7883_v55 = vld [vmem:[#allocation8 + $0x1e0] ss:$8 sps:$4 sm:$0xff]   ;;  %v7952_v18 = vld [vmem:[#allocation8 + $0x2e4] ss:$8 sps:$4 sm:$0xff]  }
 0x356   : > { %v4642_v12 = vadd.bf16 %v9061_v62, %v4471_v30  ;;  %5621 = vmatprep.subr.bf16.mxu0 %v7882_v29  ;;  %v7888_v62 = vld [vmem:[#allocation8 + $0x1f4] ss:$8 sps:$4 sm:$0xff]   ;;  %v9816_v29 = vpack.c.bf16 %v9098_v53, %v9091_v52  ;;  %v7897_v52 = vld [vmem:[#allocation8 + $0x224] ss:$8 sps:$4 sm:$0xff]   ;;  %v9818_v53 = vpack.c.bf16 %v9126_v25, %v9118_v13  ;;  %v9820_v25 = vpack.c.bf16 %v9154_v3, %v9146_v32 }
 0x357   : > { %v4643_v49 = vadd.bf16 %v9066_v57, %v4472_v60  ;;  %v4653_v10 = vmax.bf16 %v9812_v19, %v4589_v23  ;;  %v9815_v60 = vpack.c.bf16 %v9063_v22, %v9055_v42  ;;  %v7892_v42 = vld [vmem:[#allocation8 + $0x210] ss:$8 sps:$4 sm:$0xff]   ;;  %v9817_v22 = vpack.c.bf16 %v9094_v43, %v9085_v14  ;;  %v7903_v13 = vld [vmem:[#allocation8 + $0x244] ss:$8 sps:$4 sm:$0xff]  }
 0x358   : > { %v4706_v50 = vmax.bf16 %v9812_v19, %v4642_v12  ;;  %v4597_v12 = vadd.bf16 %v9244_v46, %v9816_v29  ;;  %v4605_v23 = vadd.bf16 %v9244_v46, %v9818_v53  ;;  %v7898_v14 = vld [vmem:[#allocation8 + $0x230] ss:$8 sps:$4 sm:$0xff]   ;;  %v9819_v43 = vpack.c.bf16 %v9122_v4, %v9113_v20  ;;  %v7909_v3 = vld [vmem:[#allocation8 + $0x264] ss:$8 sps:$4 sm:$0xff]   ;;  %v7921_v53 = vld [vmem:[#allocation8 + $0x294] ss:$8 sps:$4 sm:$0xff]  }
 0x359   : > { %5622 = vmatpush1.bf16.msra.mxu0 %v7880_v2  ;;  %v4707_v41 = vmax.bf16 %v9812_v19, %v4643_v49  ;;  %v4588_v57 = vadd.bf16 %v9262_v63, %v9815_v60  ;;  %v7894_v2 = vld [vmem:[#allocation8 + $0x214] ss:$8 sps:$4 sm:$0xff]   ;;  %v4596_v44 = vadd.bf16 %v9262_v63, %v9817_v22  ;;  %v7895_v49 = vld [vmem:[#allocation8 + $0x220] ss:$8 sps:$4 sm:$0xff]   ;;  %v7904_v20 = vld [vmem:[#allocation8 + $0x250] ss:$8 sps:$4 sm:$0xff]   ;;  %v9821_v4 = vpack.c.bf16 %v9150_v58, %v9141_v16 }
 0x35a   : > { %5623 = vmatprep.subr.bf16.mxu0 %v7885_v26  ;;  %v7889_v26 = vld [vmem:[#allocation8 + $0x200] ss:$8 sps:$4 sm:$0xff]   ;;  %v4661_v21 = vmax.bf16 %v9812_v19, %v4597_v12  ;;  %v9822_v32 = vpack.c.bf16 %v9182_v17, %v9174_v6  ;;  %v7910_v16 = vld [vmem:[#allocation8 + $0x270] ss:$8 sps:$4 sm:$0xff]   ;;  %v9823_v58 = vpack.c.bf16 %v9178_v28, %v9169_v24  ;;  %v7915_v17 = vld [vmem:[#allocation8 + $0x284] ss:$8 sps:$4 sm:$0xff]   ;;  %v9824_v6 = vpack.c.bf16 %v9210_v0, %v9202_v45 }
 0x35b   : > { %5584 = vmatprep.mubr.bf16.mxu0 %v4707_v41  ;;  %v4652_v30 = vmax.bf16 %v9812_v19, %v4588_v57  ;;  %v4660_v41 = vmax.bf16 %v9812_v19, %v4596_v44  ;;  %v7906_v57 = vld [vmem:[#allocation8 + $0x254] ss:$8 sps:$4 sm:$0xff]   ;;  %v4612_v29 = vadd.bf16 %v9262_v63, %v9821_v4  ;;  %v7913_v44 = vld [vmem:[#allocation8 + $0x280] ss:$8 sps:$4 sm:$0xff]   ;;  %v7919_v28 = vld [vmem:[#allocation8 + $0x290] ss:$8 sps:$4 sm:$0xff]   ;;  %v9825_v24 = vpack.c.bf16 %v9206_v61, %v9197_v7 }
 0x35c   : > { %5585 = vmatmul.mubr.bf16.gmra.mrb[124].mxu0 %v4706_v50  ;;  %v4669_v50 = vmax.bf16 %v9812_v19, %v4605_v23  ;;  %v4621_v12 = vadd.bf16 %v9244_v46, %v9822_v32  ;;  %v4629_v22 = vadd.bf16 %v9244_v46, %v9824_v6  ;;  %v7927_v0 = vld [vmem:[#allocation8 + $0x2a4] ss:$8 sps:$4 sm:$0xff]   ;;  %v9826_v45 = vpack.c.bf16 %v9229_v31, %v9220_v5  ;;  %v7931_v7 = vld [vmem:[#allocation8 + $0x2b0] ss:$8 sps:$4 sm:$0xff]  }
 0x35d   : > { %5624 = vmatpush1.bf16.msra.mxu0 %v7883_v55  ;;  %5627 = vmatprep.mubr.bf16.mxu0 %v4653_v10  ;;  %v7900_v55 = vld [vmem:[#allocation8 + $0x234] ss:$8 sps:$4 sm:$0xff]   ;;  %v4613_v10 = vadd.bf16 %v9244_v46, %v9820_v25  ;;  %v9827_v31 = vpack.c.bf16 %v9225_v40, %v9217_v8  ;;  %v7937_v25 = vld [vmem:[#allocation8 + $0x2c0] ss:$8 sps:$4 sm:$0xff]   ;;  %v7943_v40 = vld [vmem:[#allocation8 + $0x2d0] ss:$8 sps:$4 sm:$0xff]   ;;  %v4644_v34 = vadd.bf16 %v9262_v63, %v4473_v11 }
 0x35e   : > { %5625 = vmatprep.subr.bf16.mxu0 %v7888_v62  ;;  %v4604_v62 = vadd.bf16 %v9262_v63, %v9819_v43  ;;  %v4693_v23 = vmax.bf16 %v9812_v19, %v4629_v22  ;;  %v4481_v43 = vcombine.high %v9018_v35, %v9018_v35  ;;  %v4645_v35 = vadd.bf16 %v9244_v46, %v4474_v56 }
 0x35f   : > { %v4636_v5 = vadd.bf16 %v9262_v63, %v9827_v31 }
 0x360   : > { %v4668_v60 = vmax.bf16 %v9812_v19, %v4604_v62  ;;  %v7939_v62 = vld [vmem:[#allocation8 + $0x2c4] ss:$8 sps:$4 sm:$0xff]   ;;  %v4709_v8 = vmax.bf16 %v9812_v19, %v4645_v35 }
 0x361   : > { %5626 = vmatpush1.bf16.msra.mxu0 %v7886_v27  ;;  %v7901_v27 = vld [vmem:[#allocation8 + $0x240] ss:$8 sps:$4 sm:$0xff]  }
 0x362   : > { %5708 = vmatprep.subr.bf16.mxu0 %v7891_v9  ;;  %v4677_v9 = vmax.bf16 %v9812_v19, %v4613_v10  ;;  %v4700_v10 = vmax.bf16 %v9812_v19, %v4636_v5 }
 0x364   : > { %5628 = vmatmul.mubr.bf16.vlgmr.msra.gmra.mrb[96].mxu0 %v4652_v30  ;;  %v4676_v30 = vmax.bf16 %v9812_v19, %v4612_v29  ;;  %v4708_v29 = vmax.bf16 %v9812_v19, %v4644_v34 }
 0x365   : > { %5637 = vmatprep.mubr.bf16.mxu0 %v4661_v21  ;;  %5709 = vmatpush1.bf16.msra.mxu0 %v7889_v26  ;;  %v7907_v26 = vld [vmem:[#allocation8 + $0x260] ss:$8 sps:$4 sm:$0xff]   ;;  %v4685_v21 = vmax.bf16 %v9812_v19, %v4621_v12 }
 0x366   : > { %5710 = vmatprep.subr.bf16.mxu0 %v7894_v2  ;;  %v7912_v2 = vld [vmem:[#allocation8 + $0x274] ss:$8 sps:$4 sm:$0xff]  }
 0x369   : > { %5711 = vmatpush1.bf16.msra.mxu0 %v7892_v42  ;;  %v4620_v42 = vadd.bf16 %v9262_v63, %v9823_v58 }
 0x36a   : > { %5712 = vmatprep.subr.bf16.mxu0 %v7897_v52 }
 0x36b   : > { %v4684_v52 = vmax.bf16 %v9812_v19, %v4620_v42 }
 0x36c   : > { %5638 = vmatmul.mubr.bf16.gmra.mrb[100].mxu0 %v4660_v41  ;;  %v4637_v41 = vadd.bf16 %v9244_v46, %v9826_v45 }
 0x36d   : > { %5647 = vmatprep.mubr.bf16.mxu0 %v4669_v50  ;;  %5713 = vmatpush1.bf16.msra.mxu0 %v7895_v49  ;;  %v4628_v49 = vadd.bf16 %v9262_v63, %v9825_v24 }
 0x36e   : > { %5714 = vmatprep.subr.bf16.mxu0 %v7900_v55  ;;  %v7925_v55 = vld [vmem:[#allocation8 + $0x2a0] ss:$8 sps:$4 sm:$0xff]   ;;  %v4701_v61 = vmax.bf16 %v9812_v19, %v4637_v41 }
 0x36f   : > { %v4692_v50 = vmax.bf16 %v9812_v19, %v4628_v49 }
 0x371   : > { %5715 = vmatpush1.bf16.msra.mxu0 %v7898_v14  ;;  %v7933_v14 = vld [vmem:[#allocation8 + $0x2b4] ss:$8 sps:$4 sm:$0xff]  }
 0x372   : > { %5716 = vmatprep.subr.bf16.mxu0 %v7903_v13  ;;  %v4495_v13 = vrot.slane %v4481_v43, %v8679_v33 }
 0x374   : > { %5648 = vmatmul.mubr.bf16.gmra.mrb[104].mxu0 %v4668_v60  ;;  %v4497_v60 = vcombine.high %v4495_v13, %v4495_v13 }
 0x375   : > { %5657 = vmatprep.mubr.bf16.mxu0 %v4677_v9  ;;  %5717 = vmatpush1.bf16.msra.mxu0 %v7901_v27  ;;  %v7945_v27 = vld [vmem:[#allocation8 + $0x2d4] ss:$8 sps:$4 sm:$0xff]  }
 0x376   : > { %5718 = vmatprep.subr.bf16.mxu0 %v7906_v57  ;;  %v9340_v57 = vrot.slane %v4495_v13, %v8679_v33  ;;  %v9347_v46 = vrot.slane %v4497_v60, %v8679_v33 }
 0x378   : > { %v4559_v56 = vpack.i.b16 %v9340_v57, %v9340_v57  ;;  %v4566_v9 = vpack.i.b16 %v9347_v46, %v9347_v46 }
 0x379   : > { %5719 = vmatpush1.bf16.msra.mxu0 %v7904_v20  ;;  %v7950_v20 = vld [vmem:[#allocation8 + $0x2e0] ss:$8 sps:$4 sm:$0xff]  }
 0x37a   : > { %5720 = vmatprep.subr.bf16.mxu0 %v7909_v3  ;;  %v9357_v63 = vrot.slane %v4559_v56, %v8689_v37  ;;  %v9362_v12 = vrot.slane %v4566_v9, %v8689_v37 }
 0x37c   : > { %5658 = vmatmul.mubr.bf16.gmra.mrb[108].mxu0 %v4676_v30 }
 0x37d   : > { %5667 = vmatprep.mubr.bf16.mxu0 %v4685_v21  ;;  %5721 = vmatpush1.bf16.msra.mxu0 %v7907_v26  ;;  %v7956_v21 = vld [vmem:[#allocation8 + $0x2f0] ss:$8 sps:$4 sm:$0xff]  }
 0x37e   : > { %5722 = vmatprep.subr.bf16.mxu0 %v7912_v2 }
 0x381   : > { %5723 = vmatpush1.bf16.msra.mxu0 %v7910_v16 }
 0x382   : > { %5724 = vmatprep.subr.bf16.mxu0 %v7915_v17 }
 0x384   : > { %5668 = vmatmul.mubr.bf16.gmra.mrb[112].mxu0 %v4684_v52 }
 0x385   : > { %5677 = vmatprep.mubr.bf16.mxu0 %v4693_v23  ;;  %5725 = vmatpush1.bf16.msra.mxu0 %v7913_v44 }
 0x386   : > { %5726 = vmatprep.subr.bf16.mxu0 %v7921_v53 }
 0x389   : > { %5727 = vmatpush1.bf16.msra.mxu0 %v7919_v28 }
 0x38a   : > { %5728 = vmatprep.subr.bf16.mxu0 %v7927_v0 }
 0x38c   : > { %5678 = vmatmul.mubr.bf16.gmra.mrb[116].mxu0 %v4692_v50 }
 0x38d   : > { %5687 = vmatprep.mubr.bf16.mxu0 %v4701_v61  ;;  %5729 = vmatpush1.bf16.msra.mxu0 %v7925_v55 }
 0x38e   : > { %5730 = vmatprep.subr.bf16.mxu0 %v7933_v14 }
 0x391   : > { %5731 = vmatpush1.bf16.msra.mxu0 %v7931_v7 }
 0x392   : > { %5732 = vmatprep.subr.bf16.mxu0 %v7939_v62 }
 0x394   : > { %5688 = vmatmul.mubr.bf16.gmra.mrb[120].mxu0 %v4700_v10 }
 0x395   : > { %5697 = vmatprep.mubr.bf16.mxu0 %v4709_v8  ;;  %5733 = vmatpush1.bf16.msra.mxu0 %v7937_v25 }
 0x396   : > { %5734 = vmatprep.subr.bf16.mxu0 %v7945_v27 }
 0x399   : > { %5735 = vmatpush1.bf16.msra.mxu0 %v7943_v40 }
 0x39a   : > { %v4110_v4 = vpop.f32.mrb[64].mxu0  ;;  %5736 = vmatprep.subr.bf16.mxu0 %v7952_v18 }
 0x39b   : > { %v9354_v15 = vpop.f32.mrb[96].mxu1  ;;  %v4112_v11 = vpop.f32.mrb[65].mxu0 }
 0x39c   : > { %v9359_v3 = vpop.f32.mrb[97].mxu1  ;;  %v4114_v32 = vpop.f32.mrb[66].mxu0  ;;  %5698 = vmatmul.mubr.bf16.gmra.mrb[124].mxu0 %v4708_v29 }
 0x39d   : > { %v4419_v26 = vpack.c.bf16 %v4114_v32, %v4110_v4  ;;  %v9364_v30 = vpop.f32.mrb[98].mxu1  ;;  %v4116_v2 = vpop.f32.mrb[67].mxu0  ;;  %5737 = vmatpush1.bf16.msra.mxu0 %v7950_v20 }
 0x39e   : > { %v4421_v16 = vpack.c.bf16 %v9364_v30, %v9354_v15  ;;  %v4420_v58 = vpack.c.bf16 %v4116_v2, %v4112_v11  ;;  %v9368_v42 = vpop.f32.mrb[99].mxu1  ;;  %5738 = vmatprep.subr.bf16.mxu0 %v7958_v39 }
 0x39f   : > { %v4590_v17 = vadd.bf16 %v9357_v63, %v4419_v26  ;;  %v4422_v6 = vpack.c.bf16 %v9368_v42, %v9359_v3  ;;  %v9849_v42 = vld [vmem:[#allocation39_spill] sm:$0xff] }
 0x3a0   : > { %v4591_v22 = vadd.bf16 %v9362_v12, %v4420_v58  ;;  %v4529_v58 = vcombine.high %v9347_v46, %v9347_v46 }
 0x3a1   : > { %5739 = vmatpush1.bf16.msra.mxu0 %v7956_v21  ;;  %v4654_v53 = vmax.bf16 %v9812_v19, %v4590_v17  ;;  %v9829_v21 = vld [vmem:[#allocation18_spill] sm:$0xff] }
 0x3a2   : > { %v4120_v44 = vpop.f32.mrb[68].mxu0  ;;  %v4655_v52 = vmax.bf16 %v9812_v19, %v4591_v22  ;;  %5821 = vmatprep.subr.bf16.mxu0 %v9006_v1 }
 0x3a3   : > { %v9377_v23 = vpop.f32.mrb[100].mxu1  ;;  %v4122_v28 = vpop.f32.mrb[69].mxu0 }
 0x3a4   : > { %v9379_v24 = vpop.f32.mrb[101].mxu1  ;;  %v4124_v49 = vpop.f32.mrb[70].mxu0  ;;  %5740 = vmatprep.mubr.bf16.mxu0 %v4655_v52 }
 0x3a5   : > { %v4427_v0 = vpack.c.bf16 %v4124_v49, %v4120_v44  ;;  %v9381_v45 = vpop.f32.mrb[102].mxu1  ;;  %v4126_v41 = vpop.f32.mrb[71].mxu0  ;;  %5741 = vmatmul.mubr.bf16.vlgmr.msra.gmra.mrb[96].mxu0 %v4654_v53  ;;  %v9830_v44 = vld [vmem:[#allocation20_spill] sm:$0xff] }
 0x3a6   : > { %v4429_v55 = vpack.c.bf16 %v9381_v45, %v9377_v23  ;;  %v4428_v50 = vpack.c.bf16 %v4126_v41, %v4122_v28  ;;  %v9385_v14 = vpop.f32.mrb[103].mxu1  ;;  %5822 = vmatpush1.bf16.msra.mxu0 %v9004_v48  ;;  %v9831_v28 = vld [vmem:[#allocation21_spill] sm:$0xff] }
 0x3a7   : > { %v4598_v1 = vadd.bf16 %v9357_v63, %v4427_v0  ;;  %v4430_v43 = vpack.c.bf16 %v9385_v14, %v9379_v24  ;;  %5823 = vmatprep.subr.bf16.mxu0 %v9008_v51  ;;  %v4580_v0 = vpack.i.b16 %v4529_v58, %v4529_v58 }
 0x3a8   : > { %v4599_v61 = vadd.bf16 %v9362_v12, %v4428_v50 }
 0x3a9   : > { %v4662_v13 = vmax.bf16 %v9812_v19, %v4598_v1  ;;  %v9832_v1 = vld [vmem:[#allocation22_spill] sm:$0xff] }
 0x3aa   : > { %v4130_v7 = vpop.f32.mrb[72].mxu0  ;;  %5824 = vmatpush1.bf16.msra.mxu0 %v9012_v47  ;;  %v4663_v31 = vmax.bf16 %v9812_v19, %v4599_v61 }
 0x3ab   : > { %v9395_v5 = vpop.f32.mrb[104].mxu1  ;;  %v4132_v62 = vpop.f32.mrb[73].mxu0  ;;  %5825 = vmatprep.subr.bf16.mxu0 %v9025_v36 }
 0x3ac   : > { %v9399_v48 = vpop.f32.mrb[105].mxu1  ;;  %v4134_v35 = vpop.f32.mrb[74].mxu0  ;;  %5750 = vmatprep.mubr.bf16.mxu0 %v4663_v31 }
 0x3ad   : > { %v4435_v25 = vpack.c.bf16 %v4134_v35, %v4130_v7  ;;  %v9401_v51 = vpop.f32.mrb[106].mxu1  ;;  %v4136_v10 = vpop.f32.mrb[75].mxu0  ;;  %5751 = vmatmul.mubr.bf16.gmra.mrb[100].mxu0 %v4662_v13 }
 0x3ae   : > { %v4437_v47 = vpack.c.bf16 %v9401_v51, %v9395_v5  ;;  %v4436_v27 = vpack.c.bf16 %v4136_v10, %v4132_v62  ;;  %v9405_v60 = vpop.f32.mrb[107].mxu1  ;;  %5826 = vmatpush1.bf16.msra.mxu0 %v9021_v54  ;;  %v9828_v54 = vld [vmem:[#allocation19_spill] sm:$0xff]  ;;  %v7987_v51 = vld [vmem:[#allocation10] sm:$0xff]  }
 0x3af   : > { %v4606_v8 = vadd.bf16 %v9357_v63, %v4435_v25  ;;  %v4438_v36 = vpack.c.bf16 %v9405_v60, %v9399_v48  ;;  %5827 = vmatprep.subr.bf16.mxu0 %v9027_v59  ;;  %v7986_v48 = vld [vmem:[#allocation10 + $0x40] sm:$0xff]   ;;  %v7989_v60 = vld [vmem:[#allocation10 + $0x8] sm:$0xff]  }
 0x3b0   : > { %v4607_v40 = vadd.bf16 %v9362_v12, %v4436_v27  ;;  %7070 = vmatprep.subr.bf16.mxu1 %v7986_v48 }
 0x3b1   : > { %v4670_v20 = vmax.bf16 %v9812_v19, %v4606_v8  ;;  %v9833_v8 = vld [vmem:[#allocation23_spill] sm:$0xff] }
 0x3b2   : > { %v4140_v34 = vpop.f32.mrb[76].mxu0  ;;  %5828 = vmatpush1.bf16.msra.mxu0 %v9031_v38  ;;  %v4671_v18 = vmax.bf16 %v9812_v19, %v4607_v40  ;;  %v4527_v38 = vcombine.high %v9340_v57, %v9340_v57  ;;  %v9446_v40 = vrot.slane %v4580_v0, %v8689_v37 }
 0x3b3   : > { %v9415_v56 = vpop.f32.mrb[108].mxu1  ;;  %v4142_v9 = vpop.f32.mrb[77].mxu0  ;;  %5829 = vmatprep.subr.bf16.mxu0 %v9828_v54 }
 0x3b4   : > { %v9419_v4 = vpop.f32.mrb[109].mxu1  ;;  %v4144_v29 = vpop.f32.mrb[78].mxu0  ;;  %5760 = vmatprep.mubr.bf16.mxu0 %v4671_v18  ;;  %v4573_v52 = vpack.i.b16 %v4527_v38, %v4527_v38  ;;  %v4609_v30 = vadd.bf16 %v9446_v40, %v4438_v36  ;;  %v7990_v36 = vld [vmem:[#allocation10 + $0x50] sm:$0xff]  }
 0x3b5   : > { %v4443_v39 = vpack.c.bf16 %v4144_v29, %v4140_v34  ;;  %v9421_v59 = vpop.f32.mrb[110].mxu1  ;;  %v4146_v11 = vpop.f32.mrb[79].mxu0  ;;  %5761 = vmatmul.mubr.bf16.gmra.mrb[104].mxu0 %v4670_v20 }
 0x3b6   : > { %v4445_v32 = vpack.c.bf16 %v9421_v59, %v9415_v56  ;;  %v4444_v26 = vpack.c.bf16 %v4146_v11, %v4142_v9  ;;  %v9427_v2 = vpop.f32.mrb[111].mxu1  ;;  %5830 = vmatpush1.bf16.msra.mxu0 %v9829_v21  ;;  %v9442_v35 = vrot.slane %v4573_v52, %v8689_v37  ;;  %v9834_v9 = vld [vmem:[#allocation24_spill] sm:$0xff]  ;;  %v9835_v11 = vld [vmem:[#allocation25_spill] sm:$0xff]  ;;  %v4673_v24 = vmax.bf16 %v9812_v19, %v4609_v30  ;;  %v7994_v56 = vld [vmem:[#allocation10 + $0x60] sm:$0xff]  }
 0x3b7   : > { %v4614_v17 = vadd.bf16 %v9357_v63, %v4443_v39  ;;  %v4446_v22 = vpack.c.bf16 %v9427_v2, %v9419_v4  ;;  %5831 = vmatprep.subr.bf16.mxu0 %v9830_v44  ;;  %v9836_v44 = vld [vmem:[#allocation26_spill] sm:$0xff]  ;;  %v7991_v4 = vld [vmem:[#allocation10 + $0x10] sm:$0xff]   ;;  %v7992_v2 = vld [vmem:[#allocation10 + $0x58] sm:$0xff]  }
 0x3b8   : > { %v4615_v57 = vadd.bf16 %v9362_v12, %v4444_v26  ;;  %v4600_v15 = vadd.bf16 %v9442_v35, %v4429_v55  ;;  %v4608_v14 = vadd.bf16 %v9442_v35, %v4437_v47  ;;  %v7988_v47 = vld [vmem:[#allocation10 + $0x48] sm:$0xff]   ;;  %v7995_v59 = vld [vmem:[#allocation10 + $0x20] sm:$0xff]  }
 0x3b9   : > { %v4678_v46 = vmax.bf16 %v9812_v19, %v4614_v17  ;;  %v4617_v23 = vadd.bf16 %v9446_v40, %v4446_v22  ;;  %v7993_v22 = vld [vmem:[#allocation10 + $0x18] sm:$0xff]  }
 0x3ba   : > { %v4150_v53 = vpop.f32.mrb[80].mxu0  ;;  %5832 = vmatpush1.bf16.msra.mxu0 %v9831_v28  ;;  %v4679_v49 = vmax.bf16 %v9812_v19, %v4615_v57  ;;  %v4672_v45 = vmax.bf16 %v9812_v19, %v4608_v14  ;;  %v7029_v14 = vld.sshfl [vmem:[%s9732_s6] sm:$0x11 pattern:$0x75316420] }
 0x3bb   : > { %v4376_v41 = vpop.f32.mrb[112].mxu1  ;;  %v4152_v50 = vpop.f32.mrb[81].mxu0  ;;  %5833 = vmatprep.subr.bf16.mxu0 %v9832_v1  ;;  %v9837_v1 = vld [vmem:[#allocation27_spill] sm:$0xff]  ;;  %v4681_v55 = vmax.bf16 %v9812_v19, %v4617_v23 }
 0x3bc   : > { %v4378_v61 = vpop.f32.mrb[113].mxu1  ;;  %v4154_v7 = vpop.f32.mrb[82].mxu0  ;;  %5770 = vmatprep.mubr.bf16.mxu0 %v4679_v49 }
 0x3bd   : > { %v4451_v31 = vpack.c.bf16 %v4154_v7, %v4150_v53  ;;  %v4380_v62 = vpop.f32.mrb[114].mxu1  ;;  %v4156_v13 = vpop.f32.mrb[83].mxu0  ;;  %5771 = vmatmul.mubr.bf16.gmra.mrb[108].mxu0 %v4678_v46 }
 0x3be   : > { %v4453_v25 = vpack.c.bf16 %v4380_v62, %v4376_v41  ;;  %v4452_v10 = vpack.c.bf16 %v4156_v13, %v4152_v50  ;;  %v4382_v27 = vpop.f32.mrb[115].mxu1  ;;  %5834 = vmatpush1.bf16.msra.mxu0 %v9833_v8 }
 0x3bf   : > { %v4622_v34 = vadd.bf16 %v9357_v63, %v4451_v31  ;;  %v4454_v18 = vpack.c.bf16 %v4382_v27, %v4378_v61  ;;  %5835 = vmatprep.subr.bf16.mxu0 %v9834_v9  ;;  %v9838_v31 = vld [vmem:[#allocation28_spill] sm:$0xff]  ;;  %v9839_v27 = vld [vmem:[#allocation29_spill] sm:$0xff] }
 0x3c0   : > { %v4624_v20 = vadd.bf16 %v9442_v35, %v4453_v25  ;;  %v4623_v54 = vadd.bf16 %v9362_v12, %v4452_v10 }
 0x3c1   : > { %v4625_v29 = vadd.bf16 %v9446_v40, %v4454_v18  ;;  %v4686_v17 = vmax.bf16 %v9812_v19, %v4622_v34 }
 0x3c2   : > { %v4160_v39 = vpop.f32.mrb[84].mxu0  ;;  %5836 = vmatpush1.bf16.msra.mxu0 %v9835_v11  ;;  %v4687_v38 = vmax.bf16 %v9812_v19, %v4623_v54  ;;  %v4688_v57 = vmax.bf16 %v9812_v19, %v4624_v20  ;;  %v9840_v54 = vld [vmem:[#allocation30_spill] sm:$0xff] }
 0x3c3   : > { %v4386_v26 = vpop.f32.mrb[116].mxu1  ;;  %v4162_v21 = vpop.f32.mrb[85].mxu0  ;;  %v4689_v58 = vmax.bf16 %v9812_v19, %v4625_v29  ;;  %5837 = vmatprep.subr.bf16.mxu0 %v9836_v44 }
 0x3c4   : > { %v4388_v52 = vpop.f32.mrb[117].mxu1  ;;  %v4164_v53 = vpop.f32.mrb[86].mxu0  ;;  %5780 = vmatprep.mubr.bf16.mxu0 %v4687_v38 }
 0x3c5   : > { %v4459_v28 = vpack.c.bf16 %v4164_v53, %v4160_v39  ;;  %v4390_v49 = vpop.f32.mrb[118].mxu1  ;;  %5893 = vmatprep.mubr.bf16.mxu1 %v4689_v58  ;;  %v4166_v0 = vpop.f32.mrb[87].mxu0  ;;  %5781 = vmatmul.mubr.bf16.gmra.mrb[112].mxu0 %v4686_v17 }
 0x3c6   : > { %v4461_v41 = vpack.c.bf16 %v4390_v49, %v4386_v26  ;;  %v4460_v50 = vpack.c.bf16 %v4166_v0, %v4162_v21  ;;  %v4392_v46 = vpop.f32.mrb[119].mxu1  ;;  %5894 = vmatmul.mubr.bf16.vlgmr.msra.gmra.mrb[128].mxu1 %v4688_v57  ;;  %5838 = vmatpush1.bf16.msra.mxu0 %v9837_v1  ;;  %v9841_v57 = vld [vmem:[#allocation31_spill] sm:$0xff] }
 0x3c7   : > { %v4630_v61 = vadd.bf16 %v9357_v63, %v4459_v28  ;;  %v4462_v7 = vpack.c.bf16 %v4392_v46, %v4388_v52  ;;  %5839 = vmatprep.subr.bf16.mxu0 %v9838_v31  ;;  %v9842_v28 = vld [vmem:[#allocation32_spill] sm:$0xff]  ;;  %v9843_v46 = vld [vmem:[#allocation33_spill] sm:$0xff]  ;;  %7071 = vmatpush3.bf16.msra.mxu1 %v7987_v51 }
 0x3c8   : > { %v4632_v62 = vadd.bf16 %v9442_v35, %v4461_v41  ;;  %v4631_v13 = vadd.bf16 %v9362_v12, %v4460_v50  ;;  %7072 = vmatprep.subr.bf16.mxu1 %v7988_v47 }
 0x3c9   : > { %v4633_v25 = vadd.bf16 %v9446_v40, %v4462_v7  ;;  %v4694_v20 = vmax.bf16 %v9812_v19, %v4630_v61 }
 0x3ca   : > { %v4170_v10 = vpop.f32.mrb[88].mxu0  ;;  %5840 = vmatpush1.bf16.msra.mxu0 %v9839_v27  ;;  %v4695_v8 = vmax.bf16 %v9812_v19, %v4631_v13  ;;  %v4696_v11 = vmax.bf16 %v9812_v19, %v4632_v62  ;;  %v9844_v13 = vld [vmem:[#allocation34_spill] sm:$0xff] }
 0x3cb   : > { %v4396_v34 = vpop.f32.mrb[120].mxu1  ;;  %v4172_v18 = vpop.f32.mrb[89].mxu0  ;;  %v4697_v9 = vmax.bf16 %v9812_v19, %v4633_v25  ;;  %5841 = vmatprep.subr.bf16.mxu0 %v9840_v54  ;;  %7073 = vmatpush3.bf16.msra.mxu1 %v7989_v60 }
 0x3cc   : > { %v4398_v29 = vpop.f32.mrb[121].mxu1  ;;  %v4174_v39 = vpop.f32.mrb[90].mxu0  ;;  %5790 = vmatprep.mubr.bf16.mxu0 %v4695_v8  ;;  %7074 = vmatprep.subr.bf16.mxu1 %v7990_v36 }
 0x3cd   : > { %v4467_v38 = vpack.c.bf16 %v4174_v39, %v4170_v10  ;;  %v4400_v26 = vpop.f32.mrb[122].mxu1  ;;  %5903 = vmatprep.mubr.bf16.mxu1 %v4697_v9  ;;  %v4176_v21 = vpop.f32.mrb[91].mxu0  ;;  %5791 = vmatmul.mubr.bf16.gmra.mrb[116].mxu0 %v4694_v20 }
 0x3ce   : > { %v4469_v58 = vpack.c.bf16 %v4400_v26, %v4396_v34  ;;  %v4468_v17 = vpack.c.bf16 %v4176_v21, %v4172_v18  ;;  %v4402_v44 = vpop.f32.mrb[123].mxu1  ;;  %5904 = vmatmul.mubr.bf16.gmra.mrb[132].mxu1 %v4696_v11  ;;  %5842 = vmatpush1.bf16.msra.mxu0 %v9841_v57 }
 0x3cf   : > { %v4638_v52 = vadd.bf16 %v9357_v63, %v4467_v38  ;;  %v4470_v53 = vpack.c.bf16 %v4402_v44, %v4398_v29  ;;  %5843 = vmatprep.subr.bf16.mxu0 %v9842_v28  ;;  %v9845_v29 = vld [vmem:[#allocation35_spill] sm:$0xff]  ;;  %v9846_v38 = vld [vmem:[#allocation36_spill] sm:$0xff]  ;;  %v9847_v44 = vld [vmem:[#allocation37_spill] sm:$0xff]  ;;  %7075 = vmatpush3.bf16.msra.mxu1 %v7991_v4  ;;  %v5966_v4 = vrot.slane %v7029_v14, %v8679_v33 }
 0x3d0   : > { %v4640_v49 = vadd.bf16 %v9442_v35, %v4469_v58  ;;  %v4639_v0 = vadd.bf16 %v9362_v12, %v4468_v17  ;;  %v4593_v58 = vadd.bf16 %v9446_v40, %v4422_v6  ;;  %v4592_v6 = vadd.bf16 %v9442_v35, %v4421_v16  ;;  %v9850_v28 = vld [vmem:[#allocation40_spill] sm:$0xff]  ;;  %7076 = vmatprep.subr.bf16.mxu1 %v7992_v2 }
 0x3d1   : > { %v4641_v41 = vadd.bf16 %v9446_v40, %v4470_v53  ;;  %v4702_v62 = vmax.bf16 %v9812_v19, %v4638_v52  ;;  %v9848_v53 = vld [vmem:[#allocation38_spill] sm:$0xff]  ;;  %v4664_v16 = vmax.bf16 %v9812_v19, %v4600_v15 }
 0x3d2   : > { %v4180_v50 = vpop.f32.mrb[92].mxu0  ;;  %5844 = vmatpush1.bf16.msra.mxu0 %v9843_v46  ;;  %v4703_v1 = vmax.bf16 %v9812_v19, %v4639_v0  ;;  %v4704_v27 = vmax.bf16 %v9812_v19, %v4640_v49  ;;  %v4657_v3 = vmax.bf16 %v9812_v19, %v4593_v58  ;;  %v4601_v49 = vadd.bf16 %v9446_v40, %v4430_v43  ;;  %v9851_v0 = vld [vmem:[#allocation41_spill] sm:$0xff]  ;;  %v7999_v46 = vld [vmem:[#allocation10 + $0x30] sm:$0xff]  }
 0x3d3   : > { %v4406_v61 = vpop.f32.mrb[124].mxu1  ;;  %v4182_v7 = vpop.f32.mrb[93].mxu0  ;;  %v4705_v31 = vmax.bf16 %v9812_v19, %v4641_v41  ;;  %5845 = vmatprep.subr.bf16.mxu0 %v9844_v13  ;;  %v4656_v41 = vmax.bf16 %v9812_v19, %v4592_v6  ;;  %v4616_v43 = vadd.bf16 %v9442_v35, %v4445_v32  ;;  %7077 = vmatpush3.bf16.msra.mxu1 %v7993_v22  ;;  %v7996_v32 = vld [vmem:[#allocation10 + $0x68] sm:$0xff]  }
 0x3d4   : > { %v4408_v25 = vpop.f32.mrb[125].mxu1  ;;  %v4184_v10 = vpop.f32.mrb[94].mxu0  ;;  %5800 = vmatprep.mubr.bf16.mxu0 %v4703_v1  ;;  %7078 = vmatprep.subr.bf16.mxu1 %v7994_v56  ;;  %v8000_v1 = vld [vmem:[#allocation10 + $0x78] sm:$0xff]  }
 0x3d5   : > { %v4475_v8 = vpack.c.bf16 %v4184_v10, %v4180_v50  ;;  %v4410_v34 = vpop.f32.mrb[126].mxu1  ;;  %5913 = vmatprep.mubr.bf16.mxu1 %v4705_v31  ;;  %v4186_v18 = vpop.f32.mrb[95].mxu0  ;;  %5801 = vmatmul.mubr.bf16.gmra.mrb[120].mxu0 %v4702_v62  ;;  %v4665_v50 = vmax.bf16 %v9812_v19, %v4601_v49  ;;  %v4680_v5 = vmax.bf16 %v9812_v19, %v4616_v43 }
 0x3d6   : > { %v4477_v9 = vpack.c.bf16 %v4410_v34, %v4406_v61  ;;  %v4476_v20 = vpack.c.bf16 %v4186_v18, %v4182_v7  ;;  %v4412_v54 = vpop.f32.mrb[127].mxu1  ;;  %5914 = vmatmul.mubr.bf16.gmra.mrb[136].mxu1 %v4704_v27  ;;  %5846 = vmatpush1.bf16.msra.mxu0 %v9845_v29  ;;  %v8001_v61 = vld [vmem:[#allocation10 + $0x38] sm:$0xff]   ;;  %v5959_v43 = vcombine.high %v7029_v14, %v7029_v14 }
 0x3d7   : > { %v4646_v39 = vadd.bf16 %v9357_v63, %v4475_v8  ;;  %v4478_v11 = vpack.c.bf16 %v4412_v54, %v4408_v25  ;;  %5847 = vmatprep.subr.bf16.mxu0 %v9846_v38  ;;  %7079 = vmatpush3.bf16.msra.mxu1 %v7995_v59 }
 0x3d8   : > { %v4648_v26 = vadd.bf16 %v9442_v35, %v4477_v9  ;;  %v4647_v21 = vadd.bf16 %v9362_v12, %v4476_v20  ;;  %v7997_v35 = vld [vmem:[#allocation10 + $0x28] sm:$0xff]   ;;  %7080 = vmatprep.subr.bf16.mxu1 %v7996_v32  ;;  %v5973_v59 = vrot.slane %v5959_v43, %v8679_v33 }
 0x3d9   : > { %v4649_v17 = vadd.bf16 %v9446_v40, %v4478_v11  ;;  %v4710_v52 = vmax.bf16 %v9812_v19, %v4646_v39  ;;  %v7998_v40 = vld [vmem:[#allocation10 + $0x70] sm:$0xff]  }
 0x3da   : > { %5848 = vmatpush1.bf16.msra.mxu0 %v9847_v44  ;;  %v4711_v57 = vmax.bf16 %v9812_v19, %v4647_v21  ;;  %v4712_v12 = vmax.bf16 %v9812_v19, %v4648_v26 }
 0x3db   : > { %v4713_v63 = vmax.bf16 %v9812_v19, %v4649_v17  ;;  %5849 = vmatprep.subr.bf16.mxu0 %v9848_v53  ;;  %7081 = vmatpush3.bf16.msra.mxu1 %v7997_v35 }
 0x3dc   : > { %5810 = vmatprep.mubr.bf16.mxu0 %v4711_v57  ;;  %7082 = vmatprep.subr.bf16.mxu1 %v7998_v40 }
 0x3dd   : > { %5923 = vmatprep.mubr.bf16.mxu1 %v4713_v63  ;;  %5811 = vmatmul.mubr.bf16.gmra.mrb[124].mxu0 %v4710_v52 }
 0x3de   : > { %5924 = vmatmul.mubr.bf16.gmra.mrb[140].mxu1 %v4712_v12  ;;  %5850 = vmatpush1.bf16.msra.mxu0 %v9849_v42 }
 0x3df   : > { %5853 = vmatprep.mubr.bf16.mxu0 %v4657_v3  ;;  %5851 = vmatprep.subr.bf16.mxu0 %v9850_v28 }
 0x3e0   : > { %7083 = vmatpush3.bf16.msra.mxu1 %v7999_v46 }
 0x3e1   : > { %7084 = vmatprep.subr.bf16.mxu1 %v8000_v1  ;;  %v5975_v1 = vpack.i.b16 %v5966_v4, %v5966_v4 }
 0x3e2   : > { %5852 = vmatpush1.bf16.msra.mxu0 %v9851_v0 }
 0x3e4   : > { %7085 = vmatpush3.bf16.msra.mxu1 %v8001_v61 }
 0x3e5   : > { %5854 = vmatmul.mubr.bf16.vlgmr.msra.gmra.mrb[96].mxu0 %v4656_v41 }
 0x3e6   : > { %5863 = vmatprep.mubr.bf16.mxu0 %v4665_v50 }
 0x3ed   : > { %5864 = vmatmul.mubr.bf16.gmra.mrb[100].mxu0 %v4664_v16 }
 0x3ee   : > { %5873 = vmatprep.mubr.bf16.mxu0 %v4673_v24 }
 0x3f5   : > { %5874 = vmatmul.mubr.bf16.gmra.mrb[104].mxu0 %v4672_v45 }
 0x3f6   : > { %5883 = vmatprep.mubr.bf16.mxu0 %v4681_v55 }
 0x3fd   : > { %5884 = vmatmul.mubr.bf16.gmra.mrb[108].mxu0 %v4680_v5 }
 0x498   : > { %v5782_v7 = vpop.f32.mrb[112].mxu0 }
 0x499   : > { %v5895_v31 = vpop.f32.mrb[128].mxu1  ;;  %v5784_v62 = vpop.f32.mrb[113].mxu0 }
 0x49a   : > { %v9538_v13 = vadd.f32 %v5895_v31, %v5782_v7  ;;  %v5897_v25 = vpop.f32.mrb[129].mxu1  ;;  %v5786_v10 = vpop.f32.mrb[114].mxu0  ;;  %v5982_v7 = vpack.i.b16 %v5973_v59, %v5973_v59 }
 0x49b   : > { %v9540_v27 = vadd.f32 %v5897_v25, %v5784_v62  ;;  %v5899_v8 = vpop.f32.mrb[130].mxu1  ;;  %v5788_v34 = vpop.f32.mrb[115].mxu0 }
 0x49c   : > { %v9542_v18 = vadd.f32 %v5899_v8, %v5786_v10  ;;  %v5901_v9 = vpop.f32.mrb[131].mxu1  ;;  %v9592_v10 = vrot.slane %v5975_v1, %v8689_v37 }
 0x49d   : > { %v9544_v20 = vadd.f32 %v5901_v9, %v5788_v34  ;;  %v5987_v34 = vrot.slane %v5982_v7, %v8689_v37 }
 0x49e   : > { %v5942_v54 = vpack.c.bf16 %v9542_v18, %v9538_v13 }
 0x49f   : > { %v5943_v29 = vpack.c.bf16 %v9544_v20, %v9540_v27 }
 0x4a0   : > { %v5792_v39 = vpop.f32.mrb[116].mxu0 }
 0x4a1   : > { %v5905_v11 = vpop.f32.mrb[132].mxu1  ;;  %v5794_v38 = vpop.f32.mrb[117].mxu0 }
 0x4a2   : > { %v9550_v26 = vadd.f32 %v5905_v11, %v5792_v39  ;;  %v5907_v21 = vpop.f32.mrb[133].mxu1  ;;  %v5796_v58 = vpop.f32.mrb[118].mxu0 }
 0x4a3   : > { %v9552_v17 = vadd.f32 %v5907_v21, %v5794_v38  ;;  %v5909_v44 = vpop.f32.mrb[134].mxu1  ;;  %v5798_v57 = vpop.f32.mrb[119].mxu0 }
 0x4a4   : > { %v9554_v63 = vadd.f32 %v5909_v44, %v5796_v58  ;;  %v5911_v52 = vpop.f32.mrb[135].mxu1 }
 0x4a5   : > { %v9556_v53 = vadd.f32 %v5911_v52, %v5798_v57 }
 0x4a6   : > { %v5944_v12 = vpack.c.bf16 %v9554_v63, %v9550_v26 }
 0x4a7   : > { %v5945_v3 = vpack.c.bf16 %v9556_v53, %v9552_v17 }
 0x4a8   : > { %v5802_v42 = vpop.f32.mrb[120].mxu0 }
 0x4a9   : > { %v5915_v6 = vpop.f32.mrb[136].mxu1  ;;  %v5804_v28 = vpop.f32.mrb[121].mxu0  ;;  %v5999_v27 = vadd.bf16 %v5987_v34, %v5945_v3 }
 0x4aa   : > { %v9562_v49 = vadd.f32 %v5915_v6, %v5802_v42  ;;  %v5917_v0 = vpop.f32.mrb[137].mxu1  ;;  %v5806_v41 = vpop.f32.mrb[122].mxu0 }
 0x4ab   : > { %v9564_v50 = vadd.f32 %v5917_v0, %v5804_v28  ;;  %v5919_v15 = vpop.f32.mrb[138].mxu1  ;;  %v5808_v30 = vpop.f32.mrb[123].mxu0 }
 0x4ac   : > { %v9566_v16 = vadd.f32 %v5919_v15, %v5806_v41  ;;  %v5921_v24 = vpop.f32.mrb[139].mxu1 }
 0x4ad   : > { %v9571_v23 = vadd.f32 %v5921_v24, %v5808_v30 }
 0x4ae   : > { %v5946_v45 = vpack.c.bf16 %v9566_v16, %v9562_v49  ;;  %v6253_v49 = vld [vmem:[%s9734_s8] sm:$0x1] }
 0x4af   : > { %v5947_v55 = vpack.c.bf16 %v9571_v23, %v9564_v50  ;;  %v6255_v16 = vpack.i.b16 %v6253_v49, %v6253_v49 }
 0x4b0   : > { %v5812_v5 = vpop.f32.mrb[124].mxu0  ;;  %v6000_v17 = vadd.bf16 %v9592_v10, %v5946_v45 }
 0x4b1   : > { %v5925_v48 = vpop.f32.mrb[140].mxu1  ;;  %v5814_v51 = vpop.f32.mrb[125].mxu0  ;;  %v6001_v13 = vadd.bf16 %v5987_v34, %v5947_v55 }
 0x4b2   : > { %v9577_v47 = vadd.f32 %v5925_v48, %v5812_v5  ;;  %v5927_v60 = vpop.f32.mrb[141].mxu1  ;;  %v5816_v36 = vpop.f32.mrb[126].mxu0  ;;  %v6016_v63 = vmax.bf16 %v9812_v19, %v6000_v17 }
 0x4b3   : > { %v9580_v2 = vadd.f32 %v5927_v60, %v5814_v51  ;;  %v5929_v22 = vpop.f32.mrb[142].mxu1  ;;  %v5818_v56 = vpop.f32.mrb[127].mxu0 }
 0x4b4   : > { %v9583_v32 = vadd.f32 %v5929_v22, %v5816_v36  ;;  %v5931_v35 = vpop.f32.mrb[143].mxu1 }
 0x4b5   : > { %v9585_v40 = vadd.f32 %v5931_v35, %v5818_v56 }
 0x4b6   : > { %v5948_v46 = vpack.c.bf16 %v9583_v32, %v9577_v47 }
 0x4b7   : > { %v5949_v61 = vpack.c.bf16 %v9585_v40, %v9580_v2 }
 0x4b8   : > { %v5855_v31 = vpop.f32.mrb[96].mxu0 }
 0x4b9   : > { %v5857_v62 = vpop.f32.mrb[97].mxu0  ;;  %v6003_v26 = vadd.bf16 %v5987_v34, %v5949_v61  ;;  %v9647_v61 = vrot.slane %v6255_v16, %v8689_v37 }
 0x4ba   : > { %v5859_v25 = vpop.f32.mrb[98].mxu0 }
 0x4bb   : > { %v5934_v33 = vpack.c.bf16 %v5859_v25, %v5855_v31  ;;  %v5861_v8 = vpop.f32.mrb[99].mxu0  ;;  %v6019_v53 = vmax.bf16 %v9812_v19, %v6003_v26 }
 0x4bc   : > { %v5935_v9 = vpack.c.bf16 %v5861_v8, %v5857_v62  ;;  %v5997_v62 = vadd.bf16 %v5987_v34, %v5943_v29  ;;  %v6015_v29 = vmax.bf16 %v9812_v19, %v5999_v27 }
 0x4bd   : > { %v5988_v39 = vadd.bf16 %v9592_v10, %v5934_v33 }
 0x4be   : > { %v5989_v11 = vadd.bf16 %v5987_v34, %v5935_v9  ;;  %v6013_v9 = vmax.bf16 %v9812_v19, %v5997_v62 }
 0x4bf   : > { %v6004_v58 = vmax.bf16 %v9812_v19, %v5988_v39  ;;  %v5996_v39 = vadd.bf16 %v9592_v10, %v5942_v54  ;;  %v6017_v54 = vmax.bf16 %v9812_v19, %v6001_v13 }
 0x4c0   : > { %v5865_v38 = vpop.f32.mrb[100].mxu0  ;;  %v6005_v21 = vmax.bf16 %v9812_v19, %v5989_v11  ;;  %v5998_v11 = vadd.bf16 %v9592_v10, %v5944_v12  ;;  %v6002_v12 = vadd.bf16 %v9592_v10, %v5948_v46 }
 0x4c1   : > { %v5867_v44 = vpop.f32.mrb[101].mxu0  ;;  %v6012_v20 = vmax.bf16 %v9812_v19, %v5996_v39 }
 0x4c2   : > { %v5869_v57 = vpop.f32.mrb[102].mxu0  ;;  %6180 = vmatprep.mubr.bf16.mxu1 %v6005_v21  ;;  %v6014_v18 = vmax.bf16 %v9812_v19, %v5998_v11  ;;  %v6018_v3 = vmax.bf16 %v9812_v19, %v6002_v12 }
 0x4c3   : > { %v5936_v52 = vpack.c.bf16 %v5869_v57, %v5865_v38  ;;  %v5871_v42 = vpop.f32.mrb[103].mxu0  ;;  %6181 = vmatmul.mubr.bf16.vlgmr.msra.gmra.mrb[144].mxu1 %v6004_v58 }
 0x4c4   : > { %v5937_v6 = vpack.c.bf16 %v5871_v42, %v5867_v44 }
 0x4c5   : > { %v5990_v28 = vadd.bf16 %v9592_v10, %v5936_v52 }
 0x4c6   : > { %v5991_v0 = vadd.bf16 %v5987_v34, %v5937_v6 }
 0x4c7   : > { %v6006_v24 = vmax.bf16 %v9812_v19, %v5990_v28 }
 0x4c8   : > { %v5875_v41 = vpop.f32.mrb[104].mxu0  ;;  %v6007_v15 = vmax.bf16 %v9812_v19, %v5991_v0 }
 0x4c9   : > { %v5877_v30 = vpop.f32.mrb[105].mxu0 }
 0x4ca   : > { %v5879_v14 = vpop.f32.mrb[106].mxu0  ;;  %6188 = vmatprep.mubr.bf16.mxu1 %v6007_v15 }
 0x4cb   : > { %v5938_v43 = vpack.c.bf16 %v5879_v14, %v5875_v41  ;;  %v5881_v5 = vpop.f32.mrb[107].mxu0  ;;  %6189 = vmatmul.mubr.bf16.gmra.mrb[148].mxu1 %v6006_v24 }
 0x4cc   : > { %v5939_v48 = vpack.c.bf16 %v5881_v5, %v5877_v30 }
 0x4cd   : > { %v5992_v51 = vadd.bf16 %v9592_v10, %v5938_v43 }
 0x4ce   : > { %v5993_v60 = vadd.bf16 %v5987_v34, %v5939_v48 }
 0x4cf   : > { %v6008_v56 = vmax.bf16 %v9812_v19, %v5992_v51 }
 0x4d0   : > { %v5885_v36 = vpop.f32.mrb[108].mxu0  ;;  %v6009_v4 = vmax.bf16 %v9812_v19, %v5993_v60 }
 0x4d1   : > { %v5887_v22 = vpop.f32.mrb[109].mxu0 }
 0x4d2   : > { %v5889_v59 = vpop.f32.mrb[110].mxu0  ;;  %6196 = vmatprep.mubr.bf16.mxu1 %v6009_v4 }
 0x4d3   : > { %v5940_v35 = vpack.c.bf16 %v5889_v59, %v5885_v36  ;;  %v5891_v1 = vpop.f32.mrb[111].mxu0  ;;  %6197 = vmatmul.mubr.bf16.gmra.mrb[152].mxu1 %v6008_v56 }
 0x4d4   : > { %v5941_v7 = vpack.c.bf16 %v5891_v1, %v5887_v22 }
 0x4d5   : > { %v5994_v31 = vadd.bf16 %v9592_v10, %v5940_v35 }
 0x4d6   : > { %v5995_v25 = vadd.bf16 %v5987_v34, %v5941_v7 }
 0x4d7   : > { %v6010_v8 = vmax.bf16 %v9812_v19, %v5994_v31 }
 0x4d8   : > { %v6011_v33 = vmax.bf16 %v9812_v19, %v5995_v25 }
 0x4da   : > { %6204 = vmatprep.mubr.bf16.mxu1 %v6011_v33 }
 0x4db   : > { %6205 = vmatmul.mubr.bf16.gmra.mrb[156].mxu1 %v6010_v8 }
 0x4dc   : > { %6212 = vmatprep.mubr.bf16.mxu1 %v6013_v9 }
 0x4e3   : > { %6213 = vmatmul.mubr.bf16.gmra.mrb[160].mxu1 %v6012_v20 }
 0x4e4   : > { %6220 = vmatprep.mubr.bf16.mxu1 %v6015_v29 }
 0x4eb   : > { %6221 = vmatmul.mubr.bf16.gmra.mrb[164].mxu1 %v6014_v18 }
 0x4ec   : > { %6228 = vmatprep.mubr.bf16.mxu1 %v6017_v54 }
 0x4f3   : > { %6229 = vmatmul.mubr.bf16.gmra.mrb[168].mxu1 %v6016_v63 }
 0x4f4   : > { %6236 = vmatprep.mubr.bf16.mxu1 %v6019_v53 }
 0x4fb   : > { %6237 = vmatmul.mubr.bf16.gmra.mrb[172].mxu1 %v6018_v3 }
 0x596   : > { %v7086_v50 = vpop.f32.mrb[144].mxu1 }
 0x597   : > { %v7087_v23 = vpop.f32.mrb[145].mxu1 }
 0x598   : > { %v7088_v45 = vadd.f32 %v7087_v23, %v7086_v50  ;;  %v7089_v55 = vpop.f32.mrb[146].mxu1 }
 0x599   : > { %v7090_v2 = vpop.f32.mrb[147].mxu1 }
 0x59a   : > { %v7091_v40 = vadd.f32 %v7090_v2, %v7089_v55 }
 0x59c   : > { %v6245_v47 = vpack.c.bf16 %v7091_v40, %v7088_v45 }
 0x59e   : > { %v6261_v32 = vadd.bf16 %v9647_v61, %v6245_v47  ;;  %v7092_v19 = vpop.f32.mrb[148].mxu1 }
 0x59f   : > { %v7093_v46 = vpop.f32.mrb[149].mxu1 }
 0x5a0   : > { %v7046_v10 = vcombine.low %v6261_v32, %v6261_v32  ;;  %v7047_v34 = vcombine.high %v6261_v32, %v6261_v32  ;;  %v7094_v38 = vadd.f32 %v7093_v46, %v7092_v19  ;;  %v7095_v21 = vpop.f32.mrb[150].mxu1 }
 0x5a1   : > { %v7096_v58 = vpop.f32.mrb[151].mxu1 }
 0x5a2   : > { %6325 = vst [vmem:[%s9651_s1] sm:$0xf] %v7046_v10  ;;  %6326 = vst [vmem:[%s9651_s1 + $0x4] sm:$0xf] %v7047_v34  ;;  %v7097_v37 = vadd.f32 %v7096_v58, %v7095_v21 }
 0x5a4   : > { %v6246_v44 = vpack.c.bf16 %v7097_v37, %v7094_v38 }
 0x5a6   : > { %v6262_v57 = vadd.bf16 %v9647_v61, %v6246_v44  ;;  %v7098_v52 = vpop.f32.mrb[152].mxu1 }
 0x5a7   : > { %v7099_v42 = vpop.f32.mrb[153].mxu1 }
 0x5a8   : > { %v7048_v6 = vcombine.low %v6262_v57, %v6262_v57  ;;  %v7049_v28 = vcombine.high %v6262_v57, %v6262_v57  ;;  %v7100_v0 = vadd.f32 %v7099_v42, %v7098_v52  ;;  %v7101_v41 = vpop.f32.mrb[154].mxu1 }
 0x5a9   : > { %v7102_v15 = vpop.f32.mrb[155].mxu1 }
 0x5aa   : > { %6327 = vst [vmem:[%s9651_s1 + $0x8] sm:$0xf] %v7048_v6  ;;  %6328 = vst [vmem:[%s9651_s1 + $0xc] sm:$0xf] %v7049_v28  ;;  %v7103_v30 = vadd.f32 %v7102_v15, %v7101_v41 }
 0x5ac   : > { %v6247_v24 = vpack.c.bf16 %v7103_v30, %v7100_v0 }
 0x5ae   : > { %v6263_v14 = vadd.bf16 %v9647_v61, %v6247_v24  ;;  %v7104_v43 = vpop.f32.mrb[156].mxu1 }
 0x5af   : > { %v7105_v5 = vpop.f32.mrb[157].mxu1 }
 0x5b0   : > { %v7050_v48 = vcombine.low %v6263_v14, %v6263_v14  ;;  %v7051_v51 = vcombine.high %v6263_v14, %v6263_v14  ;;  %v7106_v60 = vadd.f32 %v7105_v5, %v7104_v43  ;;  %v7107_v36 = vpop.f32.mrb[158].mxu1 }
 0x5b1   : > { %v7108_v4 = vpop.f32.mrb[159].mxu1 }
 0x5b2   : > { %6329 = vst [vmem:[%s9651_s1 + $0x10] sm:$0xf] %v7050_v48  ;;  %6330 = vst [vmem:[%s9651_s1 + $0x14] sm:$0xf] %v7051_v51  ;;  %v7109_v22 = vadd.f32 %v7108_v4, %v7107_v36 }
 0x5b4   : > { %v6248_v56 = vpack.c.bf16 %v7109_v22, %v7106_v60 }
 0x5b6   : > { %v6264_v59 = vadd.bf16 %v9647_v61, %v6248_v56  ;;  %v7110_v35 = vpop.f32.mrb[160].mxu1 }
 0x5b7   : > { %v7111_v1 = vpop.f32.mrb[161].mxu1 }
 0x5b8   : > { %v7052_v7 = vcombine.low %v6264_v59, %v6264_v59  ;;  %v7053_v31 = vcombine.high %v6264_v59, %v6264_v59  ;;  %v7112_v62 = vadd.f32 %v7111_v1, %v7110_v35  ;;  %v7113_v25 = vpop.f32.mrb[162].mxu1 }
 0x5b9   : > { %v7114_v33 = vpop.f32.mrb[163].mxu1 }
 0x5ba   : > { %6331 = vst [vmem:[%s9651_s1 + $0x18] sm:$0xf] %v7052_v7  ;;  %6332 = vst [vmem:[%s9651_s1 + $0x1c] sm:$0xf] %v7053_v31  ;;  %v7115_v8 = vadd.f32 %v7114_v33, %v7113_v25 }
 0x5bc   : > { %v6249_v9 = vpack.c.bf16 %v7115_v8, %v7112_v62 }
 0x5be   : > { %v6265_v39 = vadd.bf16 %v9647_v61, %v6249_v9  ;;  %v7116_v27 = vpop.f32.mrb[164].mxu1 }
 0x5bf   : > { %v7117_v20 = vpop.f32.mrb[165].mxu1 }
 0x5c0   : > { %v7054_v29 = vcombine.low %v6265_v39, %v6265_v39  ;;  %v7055_v11 = vcombine.high %v6265_v39, %v6265_v39  ;;  %v7118_v13 = vadd.f32 %v7117_v20, %v7116_v27  ;;  %v7119_v18 = vpop.f32.mrb[166].mxu1 }
 0x5c1   : > { %v7120_v54 = vpop.f32.mrb[167].mxu1 }
 0x5c2   : > { %6333 = vst [vmem:[%s9651_s1 + $0x20] sm:$0xf] %v7054_v29  ;;  %6334 = vst [vmem:[%s9651_s1 + $0x24] sm:$0xf] %v7055_v11  ;;  %v7121_v17 = vadd.f32 %v7120_v54, %v7119_v18 }
 0x5c4   : > { %v6250_v26 = vpack.c.bf16 %v7121_v17, %v7118_v13 }
 0x5c6   : > { %v6266_v63 = vadd.bf16 %v9647_v61, %v6250_v26  ;;  %v7122_v53 = vpop.f32.mrb[168].mxu1 }
 0x5c7   : > { %v7123_v12 = vpop.f32.mrb[169].mxu1 }
 0x5c8   : > { %v7056_v3 = vcombine.low %v6266_v63, %v6266_v63  ;;  %v7057_v49 = vcombine.high %v6266_v63, %v6266_v63  ;;  %v7124_v50 = vadd.f32 %v7123_v12, %v7122_v53  ;;  %v7125_v16 = vpop.f32.mrb[170].mxu1 }
 0x5c9   : > { %v7126_v23 = vpop.f32.mrb[171].mxu1 }
 0x5ca   : > { %6335 = vst [vmem:[%s9651_s1 + $0x28] sm:$0xf] %v7056_v3  ;;  %6336 = vst [vmem:[%s9651_s1 + $0x2c] sm:$0xf] %v7057_v49  ;;  %v7127_v45 = vadd.f32 %v7126_v23, %v7125_v16 }
 0x5cc   : > { %v6251_v55 = vpack.c.bf16 %v7127_v45, %v7124_v50 }
 0x5ce   : > { %v6267_v2 = vadd.bf16 %v9647_v61, %v6251_v55  ;;  %v7128_v40 = vpop.f32.mrb[172].mxu1 }
 0x5cf   : > { %v7129_v47 = vpop.f32.mrb[173].mxu1 }
 0x5d0   : > { %v7058_v32 = vcombine.low %v6267_v2, %v6267_v2  ;;  %v7059_v19 = vcombine.high %v6267_v2, %v6267_v2  ;;  %v7130_v46 = vadd.f32 %v7129_v47, %v7128_v40  ;;  %v7131_v10 = vpop.f32.mrb[174].mxu1 }
 0x5d1   : > { %v7132_v34 = vpop.f32.mrb[175].mxu1 }
 0x5d2   : > { %6337 = vst [vmem:[%s9651_s1 + $0x30] sm:$0xf] %v7058_v32  ;;  %6338 = vst [vmem:[%s9651_s1 + $0x34] sm:$0xf] %v7059_v19  ;;  %v7133_v38 = vadd.f32 %v7132_v34, %v7131_v10 }
 0x5d4   : > { %v6252_v21 = vpack.c.bf16 %v7133_v38, %v7130_v46 }
 0x5d6   : > { %v6268_v58 = vadd.bf16 %v9647_v61, %v6252_v21 }
 0x5d8   : > { %v7060_v37 = vcombine.low %v6268_v58, %v6268_v58  ;;  %v7061_v44 = vcombine.high %v6268_v58, %v6268_v58 }
 0x5da   : > { %6339 = vst [vmem:[%s9651_s1 + $0x38] sm:$0xf] %v7060_v37  ;;  %6340 = vst [vmem:[%s9651_s1 + $0x3c] sm:$0xf] %v7061_v44 }
 0x5db   : > { %8162 = shalt.err (!%p8159_p12)
}
 0x5dc   : > { %s8163_s24 = scalar_lea.hbm %s9679_s15, 1024  ;;  %s8167_s30 = scalar_lea.hbm %s9735_s9, 4096 }
 0x5dd   : > { %p8164_p0 = scmp.ne.s32.totalorder %s9679_s15, %s8163_s24  ;;  %p8168_p1 = scmp.lt.u32.totalorder %s9679_s15, %s9735_s9 }
 0x5de   : > { %p8169_p2 = scmp.lt.u32.totalorder %s8167_s30, %s8163_s24  ;;  %p8171_p6 = scmp.lt.u32.totalorder %s8163_s24, %s9679_s15 }
 0x5df   : > { %p8165_p5 = pnand %p8164_p0, %p8447_p8 }
 0x5e0   : > { %p8170_p4 = por %p8169_p2, %p8168_p1 }
 0x5e1   : > { %p8166_p10 = pneg %p8165_p5 }
 0x5e2   : > { %p8172_p11 = por %p8171_p6, %p8170_p4 }
 0x5e4   : > { %p8173_p13 = pnand %p8172_p11, %p8166_p10 }
 0x5e6   : > { %8176 = shalt.err (!%p8173_p13)
}
 0x5e7   : > { %s8241_s18 = smov 64   ;;  %s8242_s20 = smov 4  }
 0x5e8   : > { %7472 = dma.vmem_to_hbm [thread:$0]  (%p8447_p8), %s9681_s16, 1024, %s9679_s15, %s6342_s17, %s8241_s18, %s8241_s18, %s8242_s20  }
 0x5e9 PF: > { %s9852_s22 = sld [smem:[#allocation16_spill]]  ;;  %s9853_s13 = sld [smem:[#allocation17_spill]] }
 0x5ea   : > { %p7504_p3 = scmp.ge.s32.totalorder %s8223_s12, 2 }
 0x5ef   : > { %s6370_s21 = sand.u32 1, %s9852_s22   ;;  %p9854_p7 = scmp.ne.s32.totalorder %s9853_s13, 0 }
 0x5f0   : > { %s6371_s28 = scalar_lea.sflag [#allocation4], %s6370_s21 }
 0x5f1   : > { %p7492_p9 = pnand %p7504_p3, %p9854_p7 }
 0x5f3   : > { %8206 = dma.done.wait (!%p7492_p9), %s6371_s28, 1024  }
 0x5f4   : > { %8208 = vsyncadd (!%p7492_p9), %s6371_s28, 4294966272  ;;  %p24_p12 = scmp.ge.s32.totalorder %s8434_s23, 6   ;;  %s9855_s30 = smov %s8215_s10 }
 0x5f5   : > { %s9856_s10 = smov %s8219_s11  ;;  %s9857_s11 = smov %s8443_s26 }
 0x5f6   : > { %s9858_s12 = smov %s8434_s23  ;;  %26 = sbr.rel (!%p24_p12) target bundleno = 9 (0x9), region = 117 }
 0x5fd   :  { %6376 = vsyncpa [#allocation3], 1 }
 0x5fe   :  { %6378 = vsyncpa [#allocation3 + $0x1], 1 }
 0x5ff   :  { %6379 = vsyncpa [#allocation6], 1 }
 0x600   :  { %6380 = vsyncpa [#allocation9], 1 }
 0x601   :  { %6381 = vsyncpa [#allocation4], 1 }
 0x602   :  { %6383 = vsyncpa [#allocation4 + $0x1], 1 }

</bundles_post_ra>
